<compile_context>
chip_gen: v7x
topology: tpu7x:2x2x1
jax: 0.10.0
libtpu: 0.0.40
codegen_flags: <defaults>
</compile_context>

<pallas_src>
import math

import jax
import jax.numpy as jnp
from jax.experimental import pallas as pl
from jax.experimental.pallas import tpu as pltpu

# ----------------------- synthetic "config" ---------------------------------
VOCAB, D_MODEL, N_HEAD, D_HEAD, D_INNER, N_LAYER = 64, 32, 4, 8, 64, 2
H = N_HEAD * D_HEAD                                  # 32
B, S = 2, 8
SEP_ID, CLS_ID, PAD_ID, UNK_ID = 4, 3, 5, 0          # XLNet special-token ids
SEG_ID_CLS, SEG_ID_SEP = 2, 3                        # as set in XLNetEmbedderModule.__init__
LN_EPS = 1e-12                                       # XLNet layer_norm_eps
SCALE = 1.0 / (D_HEAD ** 0.5)


# ----------------------- fused per-layer Pallas kernel -----------------------
def _layer_kernel(h_ref, pos_ref, sd_ref, mk_ref,
                  w4_ref, wo_ref, rw_ref, rr_ref, rs_ref, seg_ref,
                  ln_ref, w1_ref, b1_ref, w2_ref, b2_ref,
                  o_ref, bd_sc):
    """One XLNet layer for one batch element, entirely in VMEM.

    h_ref   : [S, D]      layer input (content stream)
    pos_ref : [2S, D]     sinusoidal relative positional encoding
    sd_ref  : [S, S]      1.0 where seg(i) != seg(j)
    mk_ref  : [S, S]      1.0 where key j is padding and i != j (XLNet non_tgt_mask)
    w4_ref  : [D, 4H]     fused [Wq | Wk | Wv | Wr]   (lane-dense 128-wide output)
    wo_ref  : [H, D]      output projection
    rw/rr/rs_ref : [NH, Dh] relative attention biases
    seg_ref : [NH, Dh, 2] segment embeddings, column 0 = same segment, 1 = different
    ln_ref  : [4, D]      rows = ln1_gamma, ln1_beta, ln2_gamma, ln2_beta
    w1/b1/w2/b2 : FFN weights/biases
    bd_sc   : [S, S] VMEM scratch used to assemble the rel-shifted bd score
    """
    x = h_ref[...]                                                       # [S, D]
    sd = sd_ref[...]
    mk = mk_ref[...]

    # fused Q|K|V|R projection: one [S, 32] @ [32, 128] MXU pass (lane-dense output);
    # relative-position keys reuse the Wr quarter of the same fused weight.
    proj = jnp.dot(x, w4_ref[...], preferred_element_type=jnp.float32)   # [S, 4H]
    r_proj = jnp.dot(pos_ref[...], w4_ref[:, 3 * H:],
                     preferred_element_type=jnp.float32)                 # [2S, H]

    def dot_t(a, b):  # a @ b.T on the MXU
        return jax.lax.dot_general(a, b, (((1,), (1,)), ((), ())),
                                   preferred_element_type=jnp.float32)

    def layer_norm(y, g, b):  # PyTorch semantics: biased var, eps inside rsqrt
        mu = jnp.mean(y, axis=-1, keepdims=True)
        var = jnp.mean((y - mu) ** 2, axis=-1, keepdims=True)
        return (y - mu) * jax.lax.rsqrt(var + LN_EPS) * g + b

    # --- relative attention, all heads (static unrolled loop; no per-head grid step) ---
    attn_out = None
    for n in range(N_HEAD):
        lo = n * D_HEAD
        q_h = proj[:, lo:lo + D_HEAD]                                    # [S, Dh]
        k_h = proj[:, H + lo:H + lo + D_HEAD]                            # [S, Dh]
        v_h = proj[:, 2 * H + lo:2 * H + lo + D_HEAD]                    # [S, Dh]
        r_h = r_proj[:, lo:lo + D_HEAD]                                  # [2S, Dh]

        # content-based score: ac = (q + r_w_bias) @ k^T
        ac = dot_t(q_h + rw_ref[n:n + 1, :], k_h)                        # [S, S]

        # position-based score: standard XLNet form, rel_shift applied in-kernel.
        bd_raw = dot_t(q_h + rr_ref[n:n + 1, :], r_h)                    # [S, 2S]
        for i in range(S):  # bd[i, j] = bd_raw[i, j + S - i]  (static row slices)
            bd_sc[i:i + 1, :] = bd_raw[i:i + 1, S - i:2 * S - i]
        bd = bd_sc[...]                                                  # [S, S]

        # segment-based score via one (S, Dh) @ (Dh, 2) matmul, then select by seg_diff.
        e01 = jnp.dot(q_h + rs_ref[n:n + 1, :], seg_ref[n],
                      preferred_element_type=jnp.float32)                # [S, 2]
        ef = e01[:, 0:1] * (1.0 - sd) + e01[:, 1:2] * sd                 # [S, S]

        scores = (ac + bd + ef) * SCALE
        scores = scores - 1e30 * mk                                      # mask padded keys

        m = jnp.max(scores, axis=-1, keepdims=True)
        p = jnp.exp(scores - m)
        inv_l = pl.reciprocal(jnp.sum(p, axis=-1, keepdims=True), approx=True)
        ctx = jnp.dot(p * inv_l, v_h, preferred_element_type=jnp.float32)  # [S, Dh]

        # O-projection accumulated per head (block decomposition of attn_vec @ Wo).
        contrib = jnp.dot(ctx, wo_ref[lo:lo + D_HEAD, :],
                          preferred_element_type=jnp.float32)            # [S, D]
        attn_out = contrib if attn_out is None else attn_out + contrib

    h1 = layer_norm(attn_out + x, ln_ref[0:1, :], ln_ref[1:2, :])        # post-attn LN

    # --- position-wise FFN (gelu tanh approximation, as in XLNet) ---
    f1 = jnp.dot(h1, w1_ref[...], preferred_element_type=jnp.float32) + b1_ref[...]
    c = math.sqrt(2.0 / math.pi)
    f1 = 0.5 * f1 * (1.0 + jnp.tanh(c * (f1 + 0.044715 * f1 * f1 * f1)))
    f2 = jnp.dot(f1, w2_ref[...], preferred_element_type=jnp.float32) + b2_ref[...]

    o_ref[...] = layer_norm(f2 + h1, ln_ref[2:3, :], ln_ref[3:4, :])


def xlnet_layer_fused(h, pos, seg_diff, mask_h, lp):
    """One fused pallas_call per layer; grid over the batch only ("parallel")."""
    return pl.pallas_call(
        _layer_kernel,
        out_shape=jax.ShapeDtypeStruct((B, S, D_MODEL), jnp.float32),
        grid=(B,),
        in_specs=[
            pl.BlockSpec((None, S, D_MODEL), lambda b: (b, 0, 0)),        # h
            pl.BlockSpec((2 * S, D_MODEL), lambda b: (0, 0)),             # pos
            pl.BlockSpec((None, S, S), lambda b: (b, 0, 0)),              # seg_diff
            pl.BlockSpec((None, S, S), lambda b: (b, 0, 0)),              # mask_h
            pl.BlockSpec((D_MODEL, 4 * H), lambda b: (0, 0)),             # W4 = [Wq|Wk|Wv|Wr]
            pl.BlockSpec((H, D_MODEL), lambda b: (0, 0)),                 # Wo
            pl.BlockSpec((N_HEAD, D_HEAD), lambda b: (0, 0)),             # r_w_bias
            pl.BlockSpec((N_HEAD, D_HEAD), lambda b: (0, 0)),             # r_r_bias
            pl.BlockSpec((N_HEAD, D_HEAD), lambda b: (0, 0)),             # r_s_bias
            pl.BlockSpec((N_HEAD, D_HEAD, 2), lambda b: (0, 0, 0)),       # seg_embed
            pl.BlockSpec((4, D_MODEL), lambda b: (0, 0)),                 # LN params
            pl.BlockSpec((D_MODEL, D_INNER), lambda b: (0, 0)),           # W1
            pl.BlockSpec((1, D_INNER), lambda b: (0, 0)),                 # b1
            pl.BlockSpec((D_INNER, D_MODEL), lambda b: (0, 0)),           # W2
            pl.BlockSpec((1, D_MODEL), lambda b: (0, 0)),                 # b2
        ],
        out_specs=pl.BlockSpec((None, S, D_MODEL), lambda b: (b, 0, 0)),
        scratch_shapes=[pltpu.VMEM((S, S), jnp.float32)],                 # bd rel-shift scratch
        compiler_params=pltpu.CompilerParams(dimension_semantics=("parallel",)),
    )(h, pos, seg_diff, mask_h, lp["W4"], lp["Wo"], lp["r_w"], lp["r_r"], lp["r_s"],
      lp["seg_embed"], lp["ln"], lp["W1"], lp["b1"], lp["W2"], lp["b2"])


# ----------------------- model glue ------------------------------------------
def rel_positional_embedding(seq_len, d):
    freq = jnp.arange(0, d, 2, dtype=jnp.float32)
    inv_freq = 1.0 / (10000.0 ** (freq / d))
    pos_seq = jnp.arange(seq_len, -seq_len, -1, dtype=jnp.float32)   # length 2*S
    sin_inp = pos_seq[:, None] * inv_freq[None, :]
    return jnp.concatenate([jnp.sin(sin_inp), jnp.cos(sin_inp)], axis=-1)   # (2S, D)


def get_seg_ids(ids):
    """Vectorised PytorchTransformersEmbedderModule.get_seg_ids (alternating segments
    between <sep> tokens, zeros after the last <sep>, then CLS/SEP overrides)."""
    is_sep = (ids == SEP_ID).astype(jnp.int32)
    is_cls = ids == CLS_ID
    seps_before = jnp.cumsum(is_sep, axis=1) - is_sep
    sep_at_or_after = jnp.flip(jnp.cumsum(jnp.flip(is_sep, axis=1), axis=1), axis=1) > 0
    seg = jnp.where(sep_at_or_after, seps_before % 2, 0)
    seg = jnp.where(is_cls, SEG_ID_CLS, seg)
    seg = jnp.where(is_sep > 0, SEG_ID_SEP, seg)
    return seg


def xlnet_embedder_forward(raw_ids, params):
    """XLNetEmbedderModule.forward: jiant id remapping -> XLNetModel (content stream,
    no mems, eval) -> prepare_output with embeddings_mode in {'none','top'}."""
    # --- id preprocessing exactly as in forward() ---
    mask = raw_ids != 0
    ids = jnp.where(raw_ids == 0, PAD_ID + 2, raw_ids)
    ids = jnp.where(ids == 1, UNK_ID + 2, ids)
    ids = ids - 2
    seg = get_seg_ids(ids)

    # TODO(synk): embedding gather + seg-id bookkeeping stay in JAX glue (data-dependent gather).
    h = params["word_emb"][ids]                                   # (B, S, D)

    pos = rel_positional_embedding(S, D_MODEL)                    # (2S, D)

    key_pad = 1.0 - mask.astype(jnp.float32)
    eye = jnp.eye(S, dtype=jnp.float32)
    mask_h = key_pad[:, None, :] * (1.0 - eye)[None, :, :]        # XLNet non_tgt_mask (h-stream)
    seg_diff = (seg[:, :, None] != seg[:, None, :]).astype(jnp.float32)

    for lp in params["layers"]:
        h = xlnet_layer_fused(h, pos, seg_diff, mask_h, lp)

    # prepare_output: embeddings_mode in {'none','top'} -> last hidden layer.
    # TODO(synk): 'only'/'cat'/'mix' (ScalarMix) output modes not implemented.
    return h


def init_params(key):
    keys = jax.random.split(key, 1 + N_LAYER)

    def normal(k, shape):
        return 0.02 * jax.random.normal(k, shape, jnp.float32)

    params = {"word_emb": normal(keys[0], (VOCAB, D_MODEL)), "layers": []}
    for li in range(N_LAYER):
        lk = jax.random.split(keys[1 + li], 8)
        ln = jnp.concatenate([jnp.ones((1, D_MODEL)), jnp.zeros((1, D_MODEL)),
                              jnp.ones((1, D_MODEL)), jnp.zeros((1, D_MODEL))],
                             axis=0).astype(jnp.float32)
        params["layers"].append(dict(
            W4=normal(lk[0], (D_MODEL, 4 * H)),           # fused [Wq | Wk | Wv | Wr]
            Wo=normal(lk[1], (H, D_MODEL)),
            r_w=normal(lk[2], (N_HEAD, D_HEAD)),
            r_r=normal(lk[3], (N_HEAD, D_HEAD)),
            r_s=normal(lk[4], (N_HEAD, D_HEAD)),
            seg_embed=normal(lk[5], (N_HEAD, D_HEAD, 2)),  # [:, :, 0]=same seg, 1=diff seg
            ln=ln,                                         # ln1_g, ln1_b, ln2_g, ln2_b
            W1=normal(lk[6], (D_MODEL, D_INNER)), b1=jnp.zeros((1, D_INNER), jnp.float32),
            W2=normal(lk[7], (D_INNER, D_MODEL)), b2=jnp.zeros((1, D_MODEL), jnp.float32),
        ))
    return params


# ----------------------- driver ----------------------------------------------
if __name__ == "__main__":
    key = jax.random.PRNGKey(0)
    kp, kd = jax.random.split(key)
    params = init_params(kp)

    # jiant-style ids: 0 = pad, 1 = unk, otherwise wordpiece_id + 2
    raw = jax.random.randint(kd, (B, S), 8, VOCAB + 2)
    # row 0: tok tok <unk> <sep> tok tok <sep> <cls>
    raw = raw.at[0, 2].set(1)
    raw = raw.at[0, 3].set(SEP_ID + 2)
    raw = raw.at[0, 6].set(SEP_ID + 2)
    raw = raw.at[0, 7].set(CLS_ID + 2)
    # row 1: tok tok <sep> tok <sep> <cls> <pad> <pad>
    raw = raw.at[1, 2].set(SEP_ID + 2)
    raw = raw.at[1, 4].set(SEP_ID + 2)
    raw = raw.at[1, 5].set(CLS_ID + 2)
    raw = raw.at[1, 6].set(0)
    raw = raw.at[1, 7].set(0)

    fwd = jax.jit(xlnet_embedder_forward)
    h = fwd(raw, params)
    h = jax.block_until_ready(h)
    assert h.shape == (B, S, D_MODEL)
    assert bool(jnp.all(jnp.isfinite(h)))
    print("KERNEL_OK")
</pallas_src>

<mosaic_0001>
module attributes {stable_mosaic.version = 11 : i64} {
  func.func @_layer_kernel(%arg0: i32, %arg1: memref<1x8x32xf32, #tpu.memory_space<vmem>>, %arg2: memref<16x32xf32, #tpu.memory_space<vmem>>, %arg3: memref<1x8x8xf32, #tpu.memory_space<vmem>>, %arg4: memref<1x8x8xf32, #tpu.memory_space<vmem>>, %arg5: memref<32x128xf32, #tpu.memory_space<vmem>>, %arg6: memref<32x32xf32, #tpu.memory_space<vmem>>, %arg7: memref<4x8xf32, #tpu.memory_space<vmem>>, %arg8: memref<4x8xf32, #tpu.memory_space<vmem>>, %arg9: memref<4x8xf32, #tpu.memory_space<vmem>>, %arg10: memref<4x8x2xf32, #tpu.memory_space<vmem>>, %arg11: memref<4x32xf32, #tpu.memory_space<vmem>>, %arg12: memref<32x64xf32, #tpu.memory_space<vmem>>, %arg13: memref<1x64xf32, #tpu.memory_space<vmem>>, %arg14: memref<64x32xf32, #tpu.memory_space<vmem>>, %arg15: memref<1x32xf32, #tpu.memory_space<vmem>>, %arg16: memref<1x8x32xf32, #tpu.memory_space<vmem>>, %arg17: memref<8x8xf32, #tpu.memory_space<vmem>>) attributes {dimension_semantics = [#tpu.dimension_semantics<parallel>], iteration_bounds = array<i64: 2>, scalar_prefetch = 0 : i64, scratch_operands = 1 : i64, tpu.core_type = #tpu.core_type<tc>, window_params = [{transform_indices = @transform_0, window_bounds = array<i64: 1, 8, 32>}, {pipeline_mode = #tpu.pipeline_mode<synchronous>, transform_indices = @transform_1, window_bounds = array<i64: 16, 32>}, {transform_indices = @transform_2, window_bounds = array<i64: 1, 8, 8>}, {transform_indices = @transform_3, window_bounds = array<i64: 1, 8, 8>}, {pipeline_mode = #tpu.pipeline_mode<synchronous>, transform_indices = @transform_4, window_bounds = array<i64: 32, 128>}, {pipeline_mode = #tpu.pipeline_mode<synchronous>, transform_indices = @transform_5, window_bounds = array<i64: 32, 32>}, {pipeline_mode = #tpu.pipeline_mode<synchronous>, transform_indices = @transform_6, window_bounds = array<i64: 4, 8>}, {pipeline_mode = #tpu.pipeline_mode<synchronous>, transform_indices = @transform_7, window_bounds = array<i64: 4, 8>}, {pipeline_mode = #tpu.pipeline_mode<synchronous>, transform_indices = @transform_8, window_bounds = array<i64: 4, 8>}, {pipeline_mode = #tpu.pipeline_mode<synchronous>, transform_indices = @transform_9, window_bounds = array<i64: 4, 8, 2>}, {pipeline_mode = #tpu.pipeline_mode<synchronous>, transform_indices = @transform_10, window_bounds = array<i64: 4, 32>}, {pipeline_mode = #tpu.pipeline_mode<synchronous>, transform_indices = @transform_11, window_bounds = array<i64: 32, 64>}, {pipeline_mode = #tpu.pipeline_mode<synchronous>, transform_indices = @transform_12, window_bounds = array<i64: 1, 64>}, {pipeline_mode = #tpu.pipeline_mode<synchronous>, transform_indices = @transform_13, window_bounds = array<i64: 64, 32>}, {pipeline_mode = #tpu.pipeline_mode<synchronous>, transform_indices = @transform_14, window_bounds = array<i64: 1, 32>}, {transform_indices = @transform_15, window_bounds = array<i64: 1, 8, 32>}]} {
    %c0 = arith.constant 0 : index
    %c0_0 = arith.constant 0 : index
    %c0_1 = arith.constant 0 : index
    %0 = vector.load %arg1[%c0, %c0_0, %c0_1] : memref<1x8x32xf32, #tpu.memory_space<vmem>>, vector<1x8x32xf32>
    %1 = vector.shape_cast %0 : vector<1x8x32xf32> to vector<8x32xf32>
    %c0_2 = arith.constant 0 : index
    %c0_3 = arith.constant 0 : index
    %c0_4 = arith.constant 0 : index
    %2 = vector.load %arg3[%c0_2, %c0_3, %c0_4] : memref<1x8x8xf32, #tpu.memory_space<vmem>>, vector<1x8x8xf32>
    %3 = vector.shape_cast %2 : vector<1x8x8xf32> to vector<8x8xf32>
    %c0_5 = arith.constant 0 : index
    %c0_6 = arith.constant 0 : index
    %c0_7 = arith.constant 0 : index
    %4 = vector.load %arg4[%c0_5, %c0_6, %c0_7] : memref<1x8x8xf32, #tpu.memory_space<vmem>>, vector<1x8x8xf32>
    %5 = vector.shape_cast %4 : vector<1x8x8xf32> to vector<8x8xf32>
    %c0_8 = arith.constant 0 : index
    %c0_9 = arith.constant 0 : index
    %6 = vector.load %arg5[%c0_8, %c0_9] : memref<32x128xf32, #tpu.memory_space<vmem>>, vector<32x128xf32>
    %cst = arith.constant dense<0.000000e+00> : vector<8x128xf32>
    %7 = tpu.matmul %1, %6, %cst {dimension_numbers = #tpu.dot_dimension_numbers<[1], [0], [0], [1], [0, 0, 1, 1], [], []>} : vector<8x32xf32>, vector<32x128xf32>, vector<8x128xf32> -> vector<8x128xf32>
    %c0_10 = arith.constant 0 : index
    %c0_11 = arith.constant 0 : index
    %8 = vector.load %arg2[%c0_10, %c0_11] : memref<16x32xf32, #tpu.memory_space<vmem>>, vector<16x32xf32>
    %c0_12 = arith.constant 0 : index
    %c96 = arith.constant 96 : index
    %9 = vector.load %arg5[%c0_12, %c96] : memref<32x128xf32, #tpu.memory_space<vmem>>, vector<32x32xf32>
    %cst_13 = arith.constant dense<0.000000e+00> : vector<16x32xf32>
    %10 = tpu.matmul %8, %9, %cst_13 {dimension_numbers = #tpu.dot_dimension_numbers<[1], [0], [0], [1], [0, 0, 1, 1], [], []>} : vector<16x32xf32>, vector<32x32xf32>, vector<16x32xf32> -> vector<16x32xf32>
    %11 = vector.extract_strided_slice %7 {offsets = [0, 0], sizes = [8, 8], strides = [1, 1]} : vector<8x128xf32> to vector<8x8xf32>
    %12 = vector.extract_strided_slice %7 {offsets = [0, 32], sizes = [8, 8], strides = [1, 1]} : vector<8x128xf32> to vector<8x8xf32>
    %13 = vector.extract_strided_slice %7 {offsets = [0, 64], sizes = [8, 8], strides = [1, 1]} : vector<8x128xf32> to vector<8x8xf32>
    %14 = vector.extract_strided_slice %10 {offsets = [0, 0], sizes = [16, 8], strides = [1, 1]} : vector<16x32xf32> to vector<16x8xf32>
    %c0_14 = arith.constant 0 : index
    %c0_15 = arith.constant 0 : index
    %15 = vector.load %arg7[%c0_14, %c0_15] : memref<4x8xf32, #tpu.memory_space<vmem>>, vector<1x8xf32>
    %16 = vector.broadcast %15 : vector<1x8xf32> to vector<8x8xf32>
    %17 = arith.addf %11, %16 : vector<8x8xf32>
    %cst_16 = arith.constant dense<0.000000e+00> : vector<8x8xf32>
    %18 = tpu.matmul %17, %12, %cst_16 {dimension_numbers = #tpu.dot_dimension_numbers<[1], [1], [0], [0], [0, 0, 1, 0], [], []>} : vector<8x8xf32>, vector<8x8xf32>, vector<8x8xf32> -> vector<8x8xf32>
    %c0_17 = arith.constant 0 : index
    %c0_18 = arith.constant 0 : index
    %19 = vector.load %arg8[%c0_17, %c0_18] : memref<4x8xf32, #tpu.memory_space<vmem>>, vector<1x8xf32>
    %20 = vector.broadcast %19 : vector<1x8xf32> to vector<8x8xf32>
    %21 = arith.addf %11, %20 : vector<8x8xf32>
    %cst_19 = arith.constant dense<0.000000e+00> : vector<8x16xf32>
    %22 = tpu.matmul %21, %14, %cst_19 {dimension_numbers = #tpu.dot_dimension_numbers<[1], [1], [0], [0], [0, 0, 1, 0], [], []>} : vector<8x8xf32>, vector<16x8xf32>, vector<8x16xf32> -> vector<8x16xf32>
    %23 = vector.extract_strided_slice %22 {offsets = [0, 8], sizes = [1, 8], strides = [1, 1]} : vector<8x16xf32> to vector<1x8xf32>
    %c0_20 = arith.constant 0 : index
    %c0_21 = arith.constant 0 : index
    %24 = vector.load %arg17[%c0_20, %c0_21] : memref<8x8xf32, #tpu.memory_space<vmem>>, vector<1x8xf32>
    tpu.vector_store %arg17[%c0_20, %c0_21], %23 {strides = array<i32>} : memref<8x8xf32, #tpu.memory_space<vmem>>, vector<1x8xf32>,
    %25 = vector.extract_strided_slice %22 {offsets = [1, 7], sizes = [1, 8], strides = [1, 1]} : vector<8x16xf32> to vector<1x8xf32>
    %c1 = arith.constant 1 : index
    %c0_22 = arith.constant 0 : index
    %26 = vector.load %arg17[%c1, %c0_22] : memref<8x8xf32, #tpu.memory_space<vmem>>, vector<1x8xf32>
    tpu.vector_store %arg17[%c1, %c0_22], %25 {strides = array<i32>} : memref<8x8xf32, #tpu.memory_space<vmem>>, vector<1x8xf32>,
    %27 = vector.extract_strided_slice %22 {offsets = [2, 6], sizes = [1, 8], strides = [1, 1]} : vector<8x16xf32> to vector<1x8xf32>
    %c2 = arith.constant 2 : index
    %c0_23 = arith.constant 0 : index
    %28 = vector.load %arg17[%c2, %c0_23] : memref<8x8xf32, #tpu.memory_space<vmem>>, vector<1x8xf32>
    tpu.vector_store %arg17[%c2, %c0_23], %27 {strides = array<i32>} : memref<8x8xf32, #tpu.memory_space<vmem>>, vector<1x8xf32>,
    %29 = vector.extract_strided_slice %22 {offsets = [3, 5], sizes = [1, 8], strides = [1, 1]} : vector<8x16xf32> to vector<1x8xf32>
    %c3 = arith.constant 3 : index
    %c0_24 = arith.constant 0 : index
    %30 = vector.load %arg17[%c3, %c0_24] : memref<8x8xf32, #tpu.memory_space<vmem>>, vector<1x8xf32>
    tpu.vector_store %arg17[%c3, %c0_24], %29 {strides = array<i32>} : memref<8x8xf32, #tpu.memory_space<vmem>>, vector<1x8xf32>,
    %31 = vector.extract_strided_slice %22 {offsets = [4, 4], sizes = [1, 8], strides = [1, 1]} : vector<8x16xf32> to vector<1x8xf32>
    %c4 = arith.constant 4 : index
    %c0_25 = arith.constant 0 : index
    %32 = vector.load %arg17[%c4, %c0_25] : memref<8x8xf32, #tpu.memory_space<vmem>>, vector<1x8xf32>
    tpu.vector_store %arg17[%c4, %c0_25], %31 {strides = array<i32>} : memref<8x8xf32, #tpu.memory_space<vmem>>, vector<1x8xf32>,
    %33 = vector.extract_strided_slice %22 {offsets = [5, 3], sizes = [1, 8], strides = [1, 1]} : vector<8x16xf32> to vector<1x8xf32>
    %c5 = arith.constant 5 : index
    %c0_26 = arith.constant 0 : index
    %34 = vector.load %arg17[%c5, %c0_26] : memref<8x8xf32, #tpu.memory_space<vmem>>, vector<1x8xf32>
    tpu.vector_store %arg17[%c5, %c0_26], %33 {strides = array<i32>} : memref<8x8xf32, #tpu.memory_space<vmem>>, vector<1x8xf32>,
    %35 = vector.extract_strided_slice %22 {offsets = [6, 2], sizes = [1, 8], strides = [1, 1]} : vector<8x16xf32> to vector<1x8xf32>
    %c6 = arith.constant 6 : index
    %c0_27 = arith.constant 0 : index
    %36 = vector.load %arg17[%c6, %c0_27] : memref<8x8xf32, #tpu.memory_space<vmem>>, vector<1x8xf32>
    tpu.vector_store %arg17[%c6, %c0_27], %35 {strides = array<i32>} : memref<8x8xf32, #tpu.memory_space<vmem>>, vector<1x8xf32>,
    %37 = vector.extract_strided_slice %22 {offsets = [7, 1], sizes = [1, 8], strides = [1, 1]} : vector<8x16xf32> to vector<1x8xf32>
    %c7 = arith.constant 7 : index
    %c0_28 = arith.constant 0 : index
    %38 = vector.load %arg17[%c7, %c0_28] : memref<8x8xf32, #tpu.memory_space<vmem>>, vector<1x8xf32>
    tpu.vector_store %arg17[%c7, %c0_28], %37 {strides = array<i32>} : memref<8x8xf32, #tpu.memory_space<vmem>>, vector<1x8xf32>,
    %c0_29 = arith.constant 0 : index
    %c0_30 = arith.constant 0 : index
    %39 = vector.load %arg17[%c0_29, %c0_30] : memref<8x8xf32, #tpu.memory_space<vmem>>, vector<8x8xf32>
    %c0_31 = arith.constant 0 : index
    %c0_32 = arith.constant 0 : index
    %40 = vector.load %arg9[%c0_31, %c0_32] : memref<4x8xf32, #tpu.memory_space<vmem>>, vector<1x8xf32>
    %41 = vector.broadcast %40 : vector<1x8xf32> to vector<8x8xf32>
    %42 = arith.addf %11, %41 : vector<8x8xf32>
    %c0_33 = arith.constant 0 : index
    %c0_34 = arith.constant 0 : index
    %c0_35 = arith.constant 0 : index
    %43 = vector.load %arg10[%c0_33, %c0_34, %c0_35] : memref<4x8x2xf32, #tpu.memory_space<vmem>>, vector<1x8x2xf32>
    %44 = vector.shape_cast %43 : vector<1x8x2xf32> to vector<8x2xf32>
    %cst_36 = arith.constant dense<0.000000e+00> : vector<8x2xf32>
    %45 = tpu.matmul %42, %44, %cst_36 {dimension_numbers = #tpu.dot_dimension_numbers<[1], [0], [0], [1], [0, 0, 1, 1], [], []>} : vector<8x8xf32>, vector<8x2xf32>, vector<8x2xf32> -> vector<8x2xf32>
    %46 = vector.extract_strided_slice %45 {offsets = [0, 0], sizes = [8, 1], strides = [1, 1]} : vector<8x2xf32> to vector<8x1xf32>
    %cst_37 = arith.constant 1.000000e+00 : f32
    %47 = vector.broadcast %cst_37 : f32 to vector<8x8xf32>
    %48 = arith.subf %47, %3 : vector<8x8xf32>
    %49 = vector.broadcast %46 : vector<8x1xf32> to vector<8x8xf32>
    %50 = arith.mulf %49, %48 : vector<8x8xf32>
    %51 = vector.extract_strided_slice %45 {offsets = [0, 1], sizes = [8, 1], strides = [1, 1]} : vector<8x2xf32> to vector<8x1xf32>
    %52 = vector.broadcast %51 : vector<8x1xf32> to vector<8x8xf32>
    %53 = arith.mulf %52, %3 : vector<8x8xf32>
    %54 = arith.addf %50, %53 : vector<8x8xf32>
    %55 = arith.addf %18, %39 : vector<8x8xf32>
    %56 = arith.addf %55, %54 : vector<8x8xf32>
    %cst_38 = arith.constant 0.353553385 : f32
    %57 = vector.broadcast %cst_38 : f32 to vector<8x8xf32>
    %58 = arith.mulf %56, %57 : vector<8x8xf32>
    %cst_39 = arith.constant 1.000000e+30 : f32
    %59 = vector.broadcast %cst_39 : f32 to vector<8x8xf32>
    %60 = arith.mulf %59, %5 : vector<8x8xf32>
    %61 = arith.subf %58, %60 : vector<8x8xf32>
    %cst_40 = arith.constant dense<0xFF800000> : vector<8xf32>
    %62 = vector.multi_reduction <maximumf>, %61, %cst_40 [1] : vector<8x8xf32> to vector<8xf32>
    %63 = vector.shape_cast %62 : vector<8xf32> to vector<8x1xf32>
    %64 = vector.broadcast %63 : vector<8x1xf32> to vector<8x8xf32>
    %65 = arith.subf %61, %64 : vector<8x8xf32>
    %66 = math.exp %65 : vector<8x8xf32>
    %cst_41 = arith.constant dense<0.000000e+00> : vector<8xf32>
    %67 = vector.multi_reduction <add>, %66, %cst_41 [1] : vector<8x8xf32> to vector<8xf32>
    %68 = vector.shape_cast %67 : vector<8xf32> to vector<8x1xf32>
    %69 = tpu.reciprocal %68 {approx = true} : vector<8x1xf32> -> vector<8x1xf32>
    %70 = vector.broadcast %69 : vector<8x1xf32> to vector<8x8xf32>
    %71 = arith.mulf %66, %70 : vector<8x8xf32>
    %cst_42 = arith.constant dense<0.000000e+00> : vector<8x8xf32>
    %72 = tpu.matmul %71, %13, %cst_42 {dimension_numbers = #tpu.dot_dimension_numbers<[1], [0], [0], [1], [0, 0, 1, 1], [], []>} : vector<8x8xf32>, vector<8x8xf32>, vector<8x8xf32> -> vector<8x8xf32>
    %c0_43 = arith.constant 0 : index
    %c0_44 = arith.constant 0 : index
    %73 = vector.load %arg6[%c0_43, %c0_44] : memref<32x32xf32, #tpu.memory_space<vmem>>, vector<8x32xf32>
    %cst_45 = arith.constant dense<0.000000e+00> : vector<8x32xf32>
    %74 = tpu.matmul %72, %73, %cst_45 {dimension_numbers = #tpu.dot_dimension_numbers<[1], [0], [0], [1], [0, 0, 1, 1], [], []>} : vector<8x8xf32>, vector<8x32xf32>, vector<8x32xf32> -> vector<8x32xf32>
    %75 = vector.extract_strided_slice %7 {offsets = [0, 8], sizes = [8, 8], strides = [1, 1]} : vector<8x128xf32> to vector<8x8xf32>
    %76 = vector.extract_strided_slice %7 {offsets = [0, 40], sizes = [8, 8], strides = [1, 1]} : vector<8x128xf32> to vector<8x8xf32>
    %77 = vector.extract_strided_slice %7 {offsets = [0, 72], sizes = [8, 8], strides = [1, 1]} : vector<8x128xf32> to vector<8x8xf32>
    %78 = vector.extract_strided_slice %10 {offsets = [0, 8], sizes = [16, 8], strides = [1, 1]} : vector<16x32xf32> to vector<16x8xf32>
    %c1_46 = arith.constant 1 : index
    %c0_47 = arith.constant 0 : index
    %79 = vector.load %arg7[%c1_46, %c0_47] : memref<4x8xf32, #tpu.memory_space<vmem>>, vector<1x8xf32>
    %80 = vector.broadcast %79 : vector<1x8xf32> to vector<8x8xf32>
    %81 = arith.addf %75, %80 : vector<8x8xf32>
    %cst_48 = arith.constant dense<0.000000e+00> : vector<8x8xf32>
    %82 = tpu.matmul %81, %76, %cst_48 {dimension_numbers = #tpu.dot_dimension_numbers<[1], [1], [0], [0], [0, 0, 1, 0], [], []>} : vector<8x8xf32>, vector<8x8xf32>, vector<8x8xf32> -> vector<8x8xf32>
    %c1_49 = arith.constant 1 : index
    %c0_50 = arith.constant 0 : index
    %83 = vector.load %arg8[%c1_49, %c0_50] : memref<4x8xf32, #tpu.memory_space<vmem>>, vector<1x8xf32>
    %84 = vector.broadcast %83 : vector<1x8xf32> to vector<8x8xf32>
    %85 = arith.addf %75, %84 : vector<8x8xf32>
    %cst_51 = arith.constant dense<0.000000e+00> : vector<8x16xf32>
    %86 = tpu.matmul %85, %78, %cst_51 {dimension_numbers = #tpu.dot_dimension_numbers<[1], [1], [0], [0], [0, 0, 1, 0], [], []>} : vector<8x8xf32>, vector<16x8xf32>, vector<8x16xf32> -> vector<8x16xf32>
    %87 = vector.extract_strided_slice %86 {offsets = [0, 8], sizes = [1, 8], strides = [1, 1]} : vector<8x16xf32> to vector<1x8xf32>
    %c0_52 = arith.constant 0 : index
    %c0_53 = arith.constant 0 : index
    %88 = vector.load %arg17[%c0_52, %c0_53] : memref<8x8xf32, #tpu.memory_space<vmem>>, vector<1x8xf32>
    tpu.vector_store %arg17[%c0_52, %c0_53], %87 {strides = array<i32>} : memref<8x8xf32, #tpu.memory_space<vmem>>, vector<1x8xf32>,
    %89 = vector.extract_strided_slice %86 {offsets = [1, 7], sizes = [1, 8], strides = [1, 1]} : vector<8x16xf32> to vector<1x8xf32>
    %c1_54 = arith.constant 1 : index
    %c0_55 = arith.constant 0 : index
    %90 = vector.load %arg17[%c1_54, %c0_55] : memref<8x8xf32, #tpu.memory_space<vmem>>, vector<1x8xf32>
    tpu.vector_store %arg17[%c1_54, %c0_55], %89 {strides = array<i32>} : memref<8x8xf32, #tpu.memory_space<vmem>>, vector<1x8xf32>,
    %91 = vector.extract_strided_slice %86 {offsets = [2, 6], sizes = [1, 8], strides = [1, 1]} : vector<8x16xf32> to vector<1x8xf32>
    %c2_56 = arith.constant 2 : index
    %c0_57 = arith.constant 0 : index
    %92 = vector.load %arg17[%c2_56, %c0_57] : memref<8x8xf32, #tpu.memory_space<vmem>>, vector<1x8xf32>
    tpu.vector_store %arg17[%c2_56, %c0_57], %91 {strides = array<i32>} : memref<8x8xf32, #tpu.memory_space<vmem>>, vector<1x8xf32>,
    %93 = vector.extract_strided_slice %86 {offsets = [3, 5], sizes = [1, 8], strides = [1, 1]} : vector<8x16xf32> to vector<1x8xf32>
    %c3_58 = arith.constant 3 : index
    %c0_59 = arith.constant 0 : index
    %94 = vector.load %arg17[%c3_58, %c0_59] : memref<8x8xf32, #tpu.memory_space<vmem>>, vector<1x8xf32>
    tpu.vector_store %arg17[%c3_58, %c0_59], %93 {strides = array<i32>} : memref<8x8xf32, #tpu.memory_space<vmem>>, vector<1x8xf32>,
    %95 = vector.extract_strided_slice %86 {offsets = [4, 4], sizes = [1, 8], strides = [1, 1]} : vector<8x16xf32> to vector<1x8xf32>
    %c4_60 = arith.constant 4 : index
    %c0_61 = arith.constant 0 : index
    %96 = vector.load %arg17[%c4_60, %c0_61] : memref<8x8xf32, #tpu.memory_space<vmem>>, vector<1x8xf32>
    tpu.vector_store %arg17[%c4_60, %c0_61], %95 {strides = array<i32>} : memref<8x8xf32, #tpu.memory_space<vmem>>, vector<1x8xf32>,
    %97 = vector.extract_strided_slice %86 {offsets = [5, 3], sizes = [1, 8], strides = [1, 1]} : vector<8x16xf32> to vector<1x8xf32>
    %c5_62 = arith.constant 5 : index
    %c0_63 = arith.constant 0 : index
    %98 = vector.load %arg17[%c5_62, %c0_63] : memref<8x8xf32, #tpu.memory_space<vmem>>, vector<1x8xf32>
    tpu.vector_store %arg17[%c5_62, %c0_63], %97 {strides = array<i32>} : memref<8x8xf32, #tpu.memory_space<vmem>>, vector<1x8xf32>,
    %99 = vector.extract_strided_slice %86 {offsets = [6, 2], sizes = [1, 8], strides = [1, 1]} : vector<8x16xf32> to vector<1x8xf32>
    %c6_64 = arith.constant 6 : index
    %c0_65 = arith.constant 0 : index
    %100 = vector.load %arg17[%c6_64, %c0_65] : memref<8x8xf32, #tpu.memory_space<vmem>>, vector<1x8xf32>
    tpu.vector_store %arg17[%c6_64, %c0_65], %99 {strides = array<i32>} : memref<8x8xf32, #tpu.memory_space<vmem>>, vector<1x8xf32>,
    %101 = vector.extract_strided_slice %86 {offsets = [7, 1], sizes = [1, 8], strides = [1, 1]} : vector<8x16xf32> to vector<1x8xf32>
    %c7_66 = arith.constant 7 : index
    %c0_67 = arith.constant 0 : index
    %102 = vector.load %arg17[%c7_66, %c0_67] : memref<8x8xf32, #tpu.memory_space<vmem>>, vector<1x8xf32>
    tpu.vector_store %arg17[%c7_66, %c0_67], %101 {strides = array<i32>} : memref<8x8xf32, #tpu.memory_space<vmem>>, vector<1x8xf32>,
    %c0_68 = arith.constant 0 : index
    %c0_69 = arith.constant 0 : index
    %103 = vector.load %arg17[%c0_68, %c0_69] : memref<8x8xf32, #tpu.memory_space<vmem>>, vector<8x8xf32>
    %c1_70 = arith.constant 1 : index
    %c0_71 = arith.constant 0 : index
    %104 = vector.load %arg9[%c1_70, %c0_71] : memref<4x8xf32, #tpu.memory_space<vmem>>, vector<1x8xf32>
    %105 = vector.broadcast %104 : vector<1x8xf32> to vector<8x8xf32>
    %106 = arith.addf %75, %105 : vector<8x8xf32>
    %c1_72 = arith.constant 1 : index
    %c0_73 = arith.constant 0 : index
    %c0_74 = arith.constant 0 : index
    %107 = vector.load %arg10[%c1_72, %c0_73, %c0_74] : memref<4x8x2xf32, #tpu.memory_space<vmem>>, vector<1x8x2xf32>
    %108 = vector.shape_cast %107 : vector<1x8x2xf32> to vector<8x2xf32>
    %cst_75 = arith.constant dense<0.000000e+00> : vector<8x2xf32>
    %109 = tpu.matmul %106, %108, %cst_75 {dimension_numbers = #tpu.dot_dimension_numbers<[1], [0], [0], [1], [0, 0, 1, 1], [], []>} : vector<8x8xf32>, vector<8x2xf32>, vector<8x2xf32> -> vector<8x2xf32>
    %110 = vector.extract_strided_slice %109 {offsets = [0, 0], sizes = [8, 1], strides = [1, 1]} : vector<8x2xf32> to vector<8x1xf32>
    %cst_76 = arith.constant 1.000000e+00 : f32
    %111 = vector.broadcast %cst_76 : f32 to vector<8x8xf32>
    %112 = arith.subf %111, %3 : vector<8x8xf32>
    %113 = vector.broadcast %110 : vector<8x1xf32> to vector<8x8xf32>
    %114 = arith.mulf %113, %112 : vector<8x8xf32>
    %115 = vector.extract_strided_slice %109 {offsets = [0, 1], sizes = [8, 1], strides = [1, 1]} : vector<8x2xf32> to vector<8x1xf32>
    %116 = vector.broadcast %115 : vector<8x1xf32> to vector<8x8xf32>
    %117 = arith.mulf %116, %3 : vector<8x8xf32>
    %118 = arith.addf %114, %117 : vector<8x8xf32>
    %119 = arith.addf %82, %103 : vector<8x8xf32>
    %120 = arith.addf %119, %118 : vector<8x8xf32>
    %cst_77 = arith.constant 0.353553385 : f32
    %121 = vector.broadcast %cst_77 : f32 to vector<8x8xf32>
    %122 = arith.mulf %120, %121 : vector<8x8xf32>
    %cst_78 = arith.constant 1.000000e+30 : f32
    %123 = vector.broadcast %cst_78 : f32 to vector<8x8xf32>
    %124 = arith.mulf %123, %5 : vector<8x8xf32>
    %125 = arith.subf %122, %124 : vector<8x8xf32>
    %cst_79 = arith.constant dense<0xFF800000> : vector<8xf32>
    %126 = vector.multi_reduction <maximumf>, %125, %cst_79 [1] : vector<8x8xf32> to vector<8xf32>
    %127 = vector.shape_cast %126 : vector<8xf32> to vector<8x1xf32>
    %128 = vector.broadcast %127 : vector<8x1xf32> to vector<8x8xf32>
    %129 = arith.subf %125, %128 : vector<8x8xf32>
    %130 = math.exp %129 : vector<8x8xf32>
    %cst_80 = arith.constant dense<0.000000e+00> : vector<8xf32>
    %131 = vector.multi_reduction <add>, %130, %cst_80 [1] : vector<8x8xf32> to vector<8xf32>
    %132 = vector.shape_cast %131 : vector<8xf32> to vector<8x1xf32>
    %133 = tpu.reciprocal %132 {approx = true} : vector<8x1xf32> -> vector<8x1xf32>
    %134 = vector.broadcast %133 : vector<8x1xf32> to vector<8x8xf32>
    %135 = arith.mulf %130, %134 : vector<8x8xf32>
    %cst_81 = arith.constant dense<0.000000e+00> : vector<8x8xf32>
    %136 = tpu.matmul %135, %77, %cst_81 {dimension_numbers = #tpu.dot_dimension_numbers<[1], [0], [0], [1], [0, 0, 1, 1], [], []>} : vector<8x8xf32>, vector<8x8xf32>, vector<8x8xf32> -> vector<8x8xf32>
    %c8 = arith.constant 8 : index
    %c0_82 = arith.constant 0 : index
    %137 = vector.load %arg6[%c8, %c0_82] : memref<32x32xf32, #tpu.memory_space<vmem>>, vector<8x32xf32>
    %cst_83 = arith.constant dense<0.000000e+00> : vector<8x32xf32>
    %138 = tpu.matmul %136, %137, %cst_83 {dimension_numbers = #tpu.dot_dimension_numbers<[1], [0], [0], [1], [0, 0, 1, 1], [], []>} : vector<8x8xf32>, vector<8x32xf32>, vector<8x32xf32> -> vector<8x32xf32>
    %139 = arith.addf %74, %138 : vector<8x32xf32>
    %140 = vector.extract_strided_slice %7 {offsets = [0, 16], sizes = [8, 8], strides = [1, 1]} : vector<8x128xf32> to vector<8x8xf32>
    %141 = vector.extract_strided_slice %7 {offsets = [0, 48], sizes = [8, 8], strides = [1, 1]} : vector<8x128xf32> to vector<8x8xf32>
    %142 = vector.extract_strided_slice %7 {offsets = [0, 80], sizes = [8, 8], strides = [1, 1]} : vector<8x128xf32> to vector<8x8xf32>
    %143 = vector.extract_strided_slice %10 {offsets = [0, 16], sizes = [16, 8], strides = [1, 1]} : vector<16x32xf32> to vector<16x8xf32>
    %c2_84 = arith.constant 2 : index
    %c0_85 = arith.constant 0 : index
    %144 = vector.load %arg7[%c2_84, %c0_85] : memref<4x8xf32, #tpu.memory_space<vmem>>, vector<1x8xf32>
    %145 = vector.broadcast %144 : vector<1x8xf32> to vector<8x8xf32>
    %146 = arith.addf %140, %145 : vector<8x8xf32>
    %cst_86 = arith.constant dense<0.000000e+00> : vector<8x8xf32>
    %147 = tpu.matmul %146, %141, %cst_86 {dimension_numbers = #tpu.dot_dimension_numbers<[1], [1], [0], [0], [0, 0, 1, 0], [], []>} : vector<8x8xf32>, vector<8x8xf32>, vector<8x8xf32> -> vector<8x8xf32>
    %c2_87 = arith.constant 2 : index
    %c0_88 = arith.constant 0 : index
    %148 = vector.load %arg8[%c2_87, %c0_88] : memref<4x8xf32, #tpu.memory_space<vmem>>, vector<1x8xf32>
    %149 = vector.broadcast %148 : vector<1x8xf32> to vector<8x8xf32>
    %150 = arith.addf %140, %149 : vector<8x8xf32>
    %cst_89 = arith.constant dense<0.000000e+00> : vector<8x16xf32>
    %151 = tpu.matmul %150, %143, %cst_89 {dimension_numbers = #tpu.dot_dimension_numbers<[1], [1], [0], [0], [0, 0, 1, 0], [], []>} : vector<8x8xf32>, vector<16x8xf32>, vector<8x16xf32> -> vector<8x16xf32>
    %152 = vector.extract_strided_slice %151 {offsets = [0, 8], sizes = [1, 8], strides = [1, 1]} : vector<8x16xf32> to vector<1x8xf32>
    %c0_90 = arith.constant 0 : index
    %c0_91 = arith.constant 0 : index
    %153 = vector.load %arg17[%c0_90, %c0_91] : memref<8x8xf32, #tpu.memory_space<vmem>>, vector<1x8xf32>
    tpu.vector_store %arg17[%c0_90, %c0_91], %152 {strides = array<i32>} : memref<8x8xf32, #tpu.memory_space<vmem>>, vector<1x8xf32>,
    %154 = vector.extract_strided_slice %151 {offsets = [1, 7], sizes = [1, 8], strides = [1, 1]} : vector<8x16xf32> to vector<1x8xf32>
    %c1_92 = arith.constant 1 : index
    %c0_93 = arith.constant 0 : index
    %155 = vector.load %arg17[%c1_92, %c0_93] : memref<8x8xf32, #tpu.memory_space<vmem>>, vector<1x8xf32>
    tpu.vector_store %arg17[%c1_92, %c0_93], %154 {strides = array<i32>} : memref<8x8xf32, #tpu.memory_space<vmem>>, vector<1x8xf32>,
    %156 = vector.extract_strided_slice %151 {offsets = [2, 6], sizes = [1, 8], strides = [1, 1]} : vector<8x16xf32> to vector<1x8xf32>
    %c2_94 = arith.constant 2 : index
    %c0_95 = arith.constant 0 : index
    %157 = vector.load %arg17[%c2_94, %c0_95] : memref<8x8xf32, #tpu.memory_space<vmem>>, vector<1x8xf32>
    tpu.vector_store %arg17[%c2_94, %c0_95], %156 {strides = array<i32>} : memref<8x8xf32, #tpu.memory_space<vmem>>, vector<1x8xf32>,
    %158 = vector.extract_strided_slice %151 {offsets = [3, 5], sizes = [1, 8], strides = [1, 1]} : vector<8x16xf32> to vector<1x8xf32>
    %c3_96 = arith.constant 3 : index
    %c0_97 = arith.constant 0 : index
    %159 = vector.load %arg17[%c3_96, %c0_97] : memref<8x8xf32, #tpu.memory_space<vmem>>, vector<1x8xf32>
    tpu.vector_store %arg17[%c3_96, %c0_97], %158 {strides = array<i32>} : memref<8x8xf32, #tpu.memory_space<vmem>>, vector<1x8xf32>,
    %160 = vector.extract_strided_slice %151 {offsets = [4, 4], sizes = [1, 8], strides = [1, 1]} : vector<8x16xf32> to vector<1x8xf32>
    %c4_98 = arith.constant 4 : index
    %c0_99 = arith.constant 0 : index
    %161 = vector.load %arg17[%c4_98, %c0_99] : memref<8x8xf32, #tpu.memory_space<vmem>>, vector<1x8xf32>
    tpu.vector_store %arg17[%c4_98, %c0_99], %160 {strides = array<i32>} : memref<8x8xf32, #tpu.memory_space<vmem>>, vector<1x8xf32>,
    %162 = vector.extract_strided_slice %151 {offsets = [5, 3], sizes = [1, 8], strides = [1, 1]} : vector<8x16xf32> to vector<1x8xf32>
    %c5_100 = arith.constant 5 : index
    %c0_101 = arith.constant 0 : index
    %163 = vector.load %arg17[%c5_100, %c0_101] : memref<8x8xf32, #tpu.memory_space<vmem>>, vector<1x8xf32>
    tpu.vector_store %arg17[%c5_100, %c0_101], %162 {strides = array<i32>} : memref<8x8xf32, #tpu.memory_space<vmem>>, vector<1x8xf32>,
    %164 = vector.extract_strided_slice %151 {offsets = [6, 2], sizes = [1, 8], strides = [1, 1]} : vector<8x16xf32> to vector<1x8xf32>
    %c6_102 = arith.constant 6 : index
    %c0_103 = arith.constant 0 : index
    %165 = vector.load %arg17[%c6_102, %c0_103] : memref<8x8xf32, #tpu.memory_space<vmem>>, vector<1x8xf32>
    tpu.vector_store %arg17[%c6_102, %c0_103], %164 {strides = array<i32>} : memref<8x8xf32, #tpu.memory_space<vmem>>, vector<1x8xf32>,
    %166 = vector.extract_strided_slice %151 {offsets = [7, 1], sizes = [1, 8], strides = [1, 1]} : vector<8x16xf32> to vector<1x8xf32>
    %c7_104 = arith.constant 7 : index
    %c0_105 = arith.constant 0 : index
    %167 = vector.load %arg17[%c7_104, %c0_105] : memref<8x8xf32, #tpu.memory_space<vmem>>, vector<1x8xf32>
    tpu.vector_store %arg17[%c7_104, %c0_105], %166 {strides = array<i32>} : memref<8x8xf32, #tpu.memory_space<vmem>>, vector<1x8xf32>,
    %c0_106 = arith.constant 0 : index
    %c0_107 = arith.constant 0 : index
    %168 = vector.load %arg17[%c0_106, %c0_107] : memref<8x8xf32, #tpu.memory_space<vmem>>, vector<8x8xf32>
    %c2_108 = arith.constant 2 : index
    %c0_109 = arith.constant 0 : index
    %169 = vector.load %arg9[%c2_108, %c0_109] : memref<4x8xf32, #tpu.memory_space<vmem>>, vector<1x8xf32>
    %170 = vector.broadcast %169 : vector<1x8xf32> to vector<8x8xf32>
    %171 = arith.addf %140, %170 : vector<8x8xf32>
    %c2_110 = arith.constant 2 : index
    %c0_111 = arith.constant 0 : index
    %c0_112 = arith.constant 0 : index
    %172 = vector.load %arg10[%c2_110, %c0_111, %c0_112] : memref<4x8x2xf32, #tpu.memory_space<vmem>>, vector<1x8x2xf32>
    %173 = vector.shape_cast %172 : vector<1x8x2xf32> to vector<8x2xf32>
    %cst_113 = arith.constant dense<0.000000e+00> : vector<8x2xf32>
    %174 = tpu.matmul %171, %173, %cst_113 {dimension_numbers = #tpu.dot_dimension_numbers<[1], [0], [0], [1], [0, 0, 1, 1], [], []>} : vector<8x8xf32>, vector<8x2xf32>, vector<8x2xf32> -> vector<8x2xf32>
    %175 = vector.extract_strided_slice %174 {offsets = [0, 0], sizes = [8, 1], strides = [1, 1]} : vector<8x2xf32> to vector<8x1xf32>
    %cst_114 = arith.constant 1.000000e+00 : f32
    %176 = vector.broadcast %cst_114 : f32 to vector<8x8xf32>
    %177 = arith.subf %176, %3 : vector<8x8xf32>
    %178 = vector.broadcast %175 : vector<8x1xf32> to vector<8x8xf32>
    %179 = arith.mulf %178, %177 : vector<8x8xf32>
    %180 = vector.extract_strided_slice %174 {offsets = [0, 1], sizes = [8, 1], strides = [1, 1]} : vector<8x2xf32> to vector<8x1xf32>
    %181 = vector.broadcast %180 : vector<8x1xf32> to vector<8x8xf32>
    %182 = arith.mulf %181, %3 : vector<8x8xf32>
    %183 = arith.addf %179, %182 : vector<8x8xf32>
    %184 = arith.addf %147, %168 : vector<8x8xf32>
    %185 = arith.addf %184, %183 : vector<8x8xf32>
    %cst_115 = arith.constant 0.353553385 : f32
    %186 = vector.broadcast %cst_115 : f32 to vector<8x8xf32>
    %187 = arith.mulf %185, %186 : vector<8x8xf32>
    %cst_116 = arith.constant 1.000000e+30 : f32
    %188 = vector.broadcast %cst_116 : f32 to vector<8x8xf32>
    %189 = arith.mulf %188, %5 : vector<8x8xf32>
    %190 = arith.subf %187, %189 : vector<8x8xf32>
    %cst_117 = arith.constant dense<0xFF800000> : vector<8xf32>
    %191 = vector.multi_reduction <maximumf>, %190, %cst_117 [1] : vector<8x8xf32> to vector<8xf32>
    %192 = vector.shape_cast %191 : vector<8xf32> to vector<8x1xf32>
    %193 = vector.broadcast %192 : vector<8x1xf32> to vector<8x8xf32>
    %194 = arith.subf %190, %193 : vector<8x8xf32>
    %195 = math.exp %194 : vector<8x8xf32>
    %cst_118 = arith.constant dense<0.000000e+00> : vector<8xf32>
    %196 = vector.multi_reduction <add>, %195, %cst_118 [1] : vector<8x8xf32> to vector<8xf32>
    %197 = vector.shape_cast %196 : vector<8xf32> to vector<8x1xf32>
    %198 = tpu.reciprocal %197 {approx = true} : vector<8x1xf32> -> vector<8x1xf32>
    %199 = vector.broadcast %198 : vector<8x1xf32> to vector<8x8xf32>
    %200 = arith.mulf %195, %199 : vector<8x8xf32>
    %cst_119 = arith.constant dense<0.000000e+00> : vector<8x8xf32>
    %201 = tpu.matmul %200, %142, %cst_119 {dimension_numbers = #tpu.dot_dimension_numbers<[1], [0], [0], [1], [0, 0, 1, 1], [], []>} : vector<8x8xf32>, vector<8x8xf32>, vector<8x8xf32> -> vector<8x8xf32>
    %c16 = arith.constant 16 : index
    %c0_120 = arith.constant 0 : index
    %202 = vector.load %arg6[%c16, %c0_120] : memref<32x32xf32, #tpu.memory_space<vmem>>, vector<8x32xf32>
    %cst_121 = arith.constant dense<0.000000e+00> : vector<8x32xf32>
    %203 = tpu.matmul %201, %202, %cst_121 {dimension_numbers = #tpu.dot_dimension_numbers<[1], [0], [0], [1], [0, 0, 1, 1], [], []>} : vector<8x8xf32>, vector<8x32xf32>, vector<8x32xf32> -> vector<8x32xf32>
    %204 = arith.addf %139, %203 : vector<8x32xf32>
    %205 = vector.extract_strided_slice %7 {offsets = [0, 24], sizes = [8, 8], strides = [1, 1]} : vector<8x128xf32> to vector<8x8xf32>
    %206 = vector.extract_strided_slice %7 {offsets = [0, 56], sizes = [8, 8], strides = [1, 1]} : vector<8x128xf32> to vector<8x8xf32>
    %207 = vector.extract_strided_slice %7 {offsets = [0, 88], sizes = [8, 8], strides = [1, 1]} : vector<8x128xf32> to vector<8x8xf32>
    %208 = vector.extract_strided_slice %10 {offsets = [0, 24], sizes = [16, 8], strides = [1, 1]} : vector<16x32xf32> to vector<16x8xf32>
    %c3_122 = arith.constant 3 : index
    %c0_123 = arith.constant 0 : index
    %209 = vector.load %arg7[%c3_122, %c0_123] : memref<4x8xf32, #tpu.memory_space<vmem>>, vector<1x8xf32>
    %210 = vector.broadcast %209 : vector<1x8xf32> to vector<8x8xf32>
    %211 = arith.addf %205, %210 : vector<8x8xf32>
    %cst_124 = arith.constant dense<0.000000e+00> : vector<8x8xf32>
    %212 = tpu.matmul %211, %206, %cst_124 {dimension_numbers = #tpu.dot_dimension_numbers<[1], [1], [0], [0], [0, 0, 1, 0], [], []>} : vector<8x8xf32>, vector<8x8xf32>, vector<8x8xf32> -> vector<8x8xf32>
    %c3_125 = arith.constant 3 : index
    %c0_126 = arith.constant 0 : index
    %213 = vector.load %arg8[%c3_125, %c0_126] : memref<4x8xf32, #tpu.memory_space<vmem>>, vector<1x8xf32>
    %214 = vector.broadcast %213 : vector<1x8xf32> to vector<8x8xf32>
    %215 = arith.addf %205, %214 : vector<8x8xf32>
    %cst_127 = arith.constant dense<0.000000e+00> : vector<8x16xf32>
    %216 = tpu.matmul %215, %208, %cst_127 {dimension_numbers = #tpu.dot_dimension_numbers<[1], [1], [0], [0], [0, 0, 1, 0], [], []>} : vector<8x8xf32>, vector<16x8xf32>, vector<8x16xf32> -> vector<8x16xf32>
    %217 = vector.extract_strided_slice %216 {offsets = [0, 8], sizes = [1, 8], strides = [1, 1]} : vector<8x16xf32> to vector<1x8xf32>
    %c0_128 = arith.constant 0 : index
    %c0_129 = arith.constant 0 : index
    %218 = vector.load %arg17[%c0_128, %c0_129] : memref<8x8xf32, #tpu.memory_space<vmem>>, vector<1x8xf32>
    tpu.vector_store %arg17[%c0_128, %c0_129], %217 {strides = array<i32>} : memref<8x8xf32, #tpu.memory_space<vmem>>, vector<1x8xf32>,
    %219 = vector.extract_strided_slice %216 {offsets = [1, 7], sizes = [1, 8], strides = [1, 1]} : vector<8x16xf32> to vector<1x8xf32>
    %c1_130 = arith.constant 1 : index
    %c0_131 = arith.constant 0 : index
    %220 = vector.load %arg17[%c1_130, %c0_131] : memref<8x8xf32, #tpu.memory_space<vmem>>, vector<1x8xf32>
    tpu.vector_store %arg17[%c1_130, %c0_131], %219 {strides = array<i32>} : memref<8x8xf32, #tpu.memory_space<vmem>>, vector<1x8xf32>,
    %221 = vector.extract_strided_slice %216 {offsets = [2, 6], sizes = [1, 8], strides = [1, 1]} : vector<8x16xf32> to vector<1x8xf32>
    %c2_132 = arith.constant 2 : index
    %c0_133 = arith.constant 0 : index
    %222 = vector.load %arg17[%c2_132, %c0_133] : memref<8x8xf32, #tpu.memory_space<vmem>>, vector<1x8xf32>
    tpu.vector_store %arg17[%c2_132, %c0_133], %221 {strides = array<i32>} : memref<8x8xf32, #tpu.memory_space<vmem>>, vector<1x8xf32>,
    %223 = vector.extract_strided_slice %216 {offsets = [3, 5], sizes = [1, 8], strides = [1, 1]} : vector<8x16xf32> to vector<1x8xf32>
    %c3_134 = arith.constant 3 : index
    %c0_135 = arith.constant 0 : index
    %224 = vector.load %arg17[%c3_134, %c0_135] : memref<8x8xf32, #tpu.memory_space<vmem>>, vector<1x8xf32>
    tpu.vector_store %arg17[%c3_134, %c0_135], %223 {strides = array<i32>} : memref<8x8xf32, #tpu.memory_space<vmem>>, vector<1x8xf32>,
    %225 = vector.extract_strided_slice %216 {offsets = [4, 4], sizes = [1, 8], strides = [1, 1]} : vector<8x16xf32> to vector<1x8xf32>
    %c4_136 = arith.constant 4 : index
    %c0_137 = arith.constant 0 : index
    %226 = vector.load %arg17[%c4_136, %c0_137] : memref<8x8xf32, #tpu.memory_space<vmem>>, vector<1x8xf32>
    tpu.vector_store %arg17[%c4_136, %c0_137], %225 {strides = array<i32>} : memref<8x8xf32, #tpu.memory_space<vmem>>, vector<1x8xf32>,
    %227 = vector.extract_strided_slice %216 {offsets = [5, 3], sizes = [1, 8], strides = [1, 1]} : vector<8x16xf32> to vector<1x8xf32>
    %c5_138 = arith.constant 5 : index
    %c0_139 = arith.constant 0 : index
    %228 = vector.load %arg17[%c5_138, %c0_139] : memref<8x8xf32, #tpu.memory_space<vmem>>, vector<1x8xf32>
    tpu.vector_store %arg17[%c5_138, %c0_139], %227 {strides = array<i32>} : memref<8x8xf32, #tpu.memory_space<vmem>>, vector<1x8xf32>,
    %229 = vector.extract_strided_slice %216 {offsets = [6, 2], sizes = [1, 8], strides = [1, 1]} : vector<8x16xf32> to vector<1x8xf32>
    %c6_140 = arith.constant 6 : index
    %c0_141 = arith.constant 0 : index
    %230 = vector.load %arg17[%c6_140, %c0_141] : memref<8x8xf32, #tpu.memory_space<vmem>>, vector<1x8xf32>
    tpu.vector_store %arg17[%c6_140, %c0_141], %229 {strides = array<i32>} : memref<8x8xf32, #tpu.memory_space<vmem>>, vector<1x8xf32>,
    %231 = vector.extract_strided_slice %216 {offsets = [7, 1], sizes = [1, 8], strides = [1, 1]} : vector<8x16xf32> to vector<1x8xf32>
    %c7_142 = arith.constant 7 : index
    %c0_143 = arith.constant 0 : index
    %232 = vector.load %arg17[%c7_142, %c0_143] : memref<8x8xf32, #tpu.memory_space<vmem>>, vector<1x8xf32>
    tpu.vector_store %arg17[%c7_142, %c0_143], %231 {strides = array<i32>} : memref<8x8xf32, #tpu.memory_space<vmem>>, vector<1x8xf32>,
    %c0_144 = arith.constant 0 : index
    %c0_145 = arith.constant 0 : index
    %233 = vector.load %arg17[%c0_144, %c0_145] : memref<8x8xf32, #tpu.memory_space<vmem>>, vector<8x8xf32>
    %c3_146 = arith.constant 3 : index
    %c0_147 = arith.constant 0 : index
    %234 = vector.load %arg9[%c3_146, %c0_147] : memref<4x8xf32, #tpu.memory_space<vmem>>, vector<1x8xf32>
    %235 = vector.broadcast %234 : vector<1x8xf32> to vector<8x8xf32>
    %236 = arith.addf %205, %235 : vector<8x8xf32>
    %c3_148 = arith.constant 3 : index
    %c0_149 = arith.constant 0 : index
    %c0_150 = arith.constant 0 : index
    %237 = vector.load %arg10[%c3_148, %c0_149, %c0_150] : memref<4x8x2xf32, #tpu.memory_space<vmem>>, vector<1x8x2xf32>
    %238 = vector.shape_cast %237 : vector<1x8x2xf32> to vector<8x2xf32>
    %cst_151 = arith.constant dense<0.000000e+00> : vector<8x2xf32>
    %239 = tpu.matmul %236, %238, %cst_151 {dimension_numbers = #tpu.dot_dimension_numbers<[1], [0], [0], [1], [0, 0, 1, 1], [], []>} : vector<8x8xf32>, vector<8x2xf32>, vector<8x2xf32> -> vector<8x2xf32>
    %240 = vector.extract_strided_slice %239 {offsets = [0, 0], sizes = [8, 1], strides = [1, 1]} : vector<8x2xf32> to vector<8x1xf32>
    %cst_152 = arith.constant 1.000000e+00 : f32
    %241 = vector.broadcast %cst_152 : f32 to vector<8x8xf32>
    %242 = arith.subf %241, %3 : vector<8x8xf32>
    %243 = vector.broadcast %240 : vector<8x1xf32> to vector<8x8xf32>
    %244 = arith.mulf %243, %242 : vector<8x8xf32>
    %245 = vector.extract_strided_slice %239 {offsets = [0, 1], sizes = [8, 1], strides = [1, 1]} : vector<8x2xf32> to vector<8x1xf32>
    %246 = vector.broadcast %245 : vector<8x1xf32> to vector<8x8xf32>
    %247 = arith.mulf %246, %3 : vector<8x8xf32>
    %248 = arith.addf %244, %247 : vector<8x8xf32>
    %249 = arith.addf %212, %233 : vector<8x8xf32>
    %250 = arith.addf %249, %248 : vector<8x8xf32>
    %cst_153 = arith.constant 0.353553385 : f32
    %251 = vector.broadcast %cst_153 : f32 to vector<8x8xf32>
    %252 = arith.mulf %250, %251 : vector<8x8xf32>
    %cst_154 = arith.constant 1.000000e+30 : f32
    %253 = vector.broadcast %cst_154 : f32 to vector<8x8xf32>
    %254 = arith.mulf %253, %5 : vector<8x8xf32>
    %255 = arith.subf %252, %254 : vector<8x8xf32>
    %cst_155 = arith.constant dense<0xFF800000> : vector<8xf32>
    %256 = vector.multi_reduction <maximumf>, %255, %cst_155 [1] : vector<8x8xf32> to vector<8xf32>
    %257 = vector.shape_cast %256 : vector<8xf32> to vector<8x1xf32>
    %258 = vector.broadcast %257 : vector<8x1xf32> to vector<8x8xf32>
    %259 = arith.subf %255, %258 : vector<8x8xf32>
    %260 = math.exp %259 : vector<8x8xf32>
    %cst_156 = arith.constant dense<0.000000e+00> : vector<8xf32>
    %261 = vector.multi_reduction <add>, %260, %cst_156 [1] : vector<8x8xf32> to vector<8xf32>
    %262 = vector.shape_cast %261 : vector<8xf32> to vector<8x1xf32>
    %263 = tpu.reciprocal %262 {approx = true} : vector<8x1xf32> -> vector<8x1xf32>
    %264 = vector.broadcast %263 : vector<8x1xf32> to vector<8x8xf32>
    %265 = arith.mulf %260, %264 : vector<8x8xf32>
    %cst_157 = arith.constant dense<0.000000e+00> : vector<8x8xf32>
    %266 = tpu.matmul %265, %207, %cst_157 {dimension_numbers = #tpu.dot_dimension_numbers<[1], [0], [0], [1], [0, 0, 1, 1], [], []>} : vector<8x8xf32>, vector<8x8xf32>, vector<8x8xf32> -> vector<8x8xf32>
    %c24 = arith.constant 24 : index
    %c0_158 = arith.constant 0 : index
    %267 = vector.load %arg6[%c24, %c0_158] : memref<32x32xf32, #tpu.memory_space<vmem>>, vector<8x32xf32>
    %cst_159 = arith.constant dense<0.000000e+00> : vector<8x32xf32>
    %268 = tpu.matmul %266, %267, %cst_159 {dimension_numbers = #tpu.dot_dimension_numbers<[1], [0], [0], [1], [0, 0, 1, 1], [], []>} : vector<8x8xf32>, vector<8x32xf32>, vector<8x32xf32> -> vector<8x32xf32>
    %269 = arith.addf %204, %268 : vector<8x32xf32>
    %270 = arith.addf %269, %1 : vector<8x32xf32>
    %c0_160 = arith.constant 0 : index
    %c0_161 = arith.constant 0 : index
    %271 = vector.load %arg11[%c0_160, %c0_161] : memref<4x32xf32, #tpu.memory_space<vmem>>, vector<1x32xf32>
    %c1_162 = arith.constant 1 : index
    %c0_163 = arith.constant 0 : index
    %272 = vector.load %arg11[%c1_162, %c0_163] : memref<4x32xf32, #tpu.memory_space<vmem>>, vector<1x32xf32>
    %cst_164 = arith.constant dense<0.000000e+00> : vector<8xf32>
    %273 = vector.multi_reduction <add>, %270, %cst_164 [1] : vector<8x32xf32> to vector<8xf32>
    %274 = vector.shape_cast %273 : vector<8xf32> to vector<8x1xf32>
    %cst_165 = arith.constant 3.200000e+01 : f32
    %275 = vector.broadcast %cst_165 : f32 to vector<8x1xf32>
    %276 = arith.divf %274, %275 : vector<8x1xf32>
    %277 = vector.broadcast %276 : vector<8x1xf32> to vector<8x32xf32>
    %278 = arith.subf %270, %277 : vector<8x32xf32>
    %279 = arith.mulf %278, %278 : vector<8x32xf32>
    %cst_166 = arith.constant dense<0.000000e+00> : vector<8xf32>
    %280 = vector.multi_reduction <add>, %279, %cst_166 [1] : vector<8x32xf32> to vector<8xf32>
    %281 = vector.shape_cast %280 : vector<8xf32> to vector<8x1xf32>
    %cst_167 = arith.constant 3.200000e+01 : f32
    %282 = vector.broadcast %cst_167 : f32 to vector<8x1xf32>
    %283 = arith.divf %281, %282 : vector<8x1xf32>
    %284 = vector.broadcast %276 : vector<8x1xf32> to vector<8x32xf32>
    %285 = arith.subf %270, %284 : vector<8x32xf32>
    %cst_168 = arith.constant 9.99999996E-13 : f32
    %286 = vector.broadcast %cst_168 : f32 to vector<8x1xf32>
    %287 = arith.addf %283, %286 : vector<8x1xf32>
    %288 = math.rsqrt %287 : vector<8x1xf32>
    %289 = vector.broadcast %288 : vector<8x1xf32> to vector<8x32xf32>
    %290 = arith.mulf %285, %289 : vector<8x32xf32>
    %291 = vector.broadcast %271 : vector<1x32xf32> to vector<8x32xf32>
    %292 = arith.mulf %290, %291 : vector<8x32xf32>
    %293 = vector.broadcast %272 : vector<1x32xf32> to vector<8x32xf32>
    %294 = arith.addf %292, %293 : vector<8x32xf32>
    %c0_169 = arith.constant 0 : index
    %c0_170 = arith.constant 0 : index
    %295 = vector.load %arg12[%c0_169, %c0_170] : memref<32x64xf32, #tpu.memory_space<vmem>>, vector<32x64xf32>
    %cst_171 = arith.constant dense<0.000000e+00> : vector<8x64xf32>
    %296 = tpu.matmul %294, %295, %cst_171 {dimension_numbers = #tpu.dot_dimension_numbers<[1], [0], [0], [1], [0, 0, 1, 1], [], []>} : vector<8x32xf32>, vector<32x64xf32>, vector<8x64xf32> -> vector<8x64xf32>
    %c0_172 = arith.constant 0 : index
    %c0_173 = arith.constant 0 : index
    %297 = vector.load %arg13[%c0_172, %c0_173] : memref<1x64xf32, #tpu.memory_space<vmem>>, vector<1x64xf32>
    %298 = vector.broadcast %297 : vector<1x64xf32> to vector<8x64xf32>
    %299 = arith.addf %296, %298 : vector<8x64xf32>
    %cst_174 = arith.constant 5.000000e-01 : f32
    %300 = vector.broadcast %cst_174 : f32 to vector<8x64xf32>
    %301 = arith.mulf %300, %299 : vector<8x64xf32>
    %cst_175 = arith.constant 4.471500e-02 : f32
    %302 = vector.broadcast %cst_175 : f32 to vector<8x64xf32>
    %303 = arith.mulf %302, %299 : vector<8x64xf32>
    %304 = arith.mulf %303, %299 : vector<8x64xf32>
    %305 = arith.mulf %304, %299 : vector<8x64xf32>
    %306 = arith.addf %299, %305 : vector<8x64xf32>
    %cst_176 = arith.constant 0.797884583 : f32
    %307 = vector.broadcast %cst_176 : f32 to vector<8x64xf32>
    %308 = arith.mulf %307, %306 : vector<8x64xf32>
    %309 = math.tanh %308 : vector<8x64xf32>
    %cst_177 = arith.constant 1.000000e+00 : f32
    %310 = vector.broadcast %cst_177 : f32 to vector<8x64xf32>
    %311 = arith.addf %310, %309 : vector<8x64xf32>
    %312 = arith.mulf %301, %311 : vector<8x64xf32>
    %c0_178 = arith.constant 0 : index
    %c0_179 = arith.constant 0 : index
    %313 = vector.load %arg14[%c0_178, %c0_179] : memref<64x32xf32, #tpu.memory_space<vmem>>, vector<64x32xf32>
    %cst_180 = arith.constant dense<0.000000e+00> : vector<8x32xf32>
    %314 = tpu.matmul %312, %313, %cst_180 {dimension_numbers = #tpu.dot_dimension_numbers<[1], [0], [0], [1], [0, 0, 1, 1], [], []>} : vector<8x64xf32>, vector<64x32xf32>, vector<8x32xf32> -> vector<8x32xf32>
    %c0_181 = arith.constant 0 : index
    %c0_182 = arith.constant 0 : index
    %315 = vector.load %arg15[%c0_181, %c0_182] : memref<1x32xf32, #tpu.memory_space<vmem>>, vector<1x32xf32>
    %316 = vector.broadcast %315 : vector<1x32xf32> to vector<8x32xf32>
    %317 = arith.addf %314, %316 : vector<8x32xf32>
    %318 = arith.addf %317, %294 : vector<8x32xf32>
    %c2_183 = arith.constant 2 : index
    %c0_184 = arith.constant 0 : index
    %319 = vector.load %arg11[%c2_183, %c0_184] : memref<4x32xf32, #tpu.memory_space<vmem>>, vector<1x32xf32>
    %c3_185 = arith.constant 3 : index
    %c0_186 = arith.constant 0 : index
    %320 = vector.load %arg11[%c3_185, %c0_186] : memref<4x32xf32, #tpu.memory_space<vmem>>, vector<1x32xf32>
    %cst_187 = arith.constant dense<0.000000e+00> : vector<8xf32>
    %321 = vector.multi_reduction <add>, %318, %cst_187 [1] : vector<8x32xf32> to vector<8xf32>
    %322 = vector.shape_cast %321 : vector<8xf32> to vector<8x1xf32>
    %cst_188 = arith.constant 3.200000e+01 : f32
    %323 = vector.broadcast %cst_188 : f32 to vector<8x1xf32>
    %324 = arith.divf %322, %323 : vector<8x1xf32>
    %325 = vector.broadcast %324 : vector<8x1xf32> to vector<8x32xf32>
    %326 = arith.subf %318, %325 : vector<8x32xf32>
    %327 = arith.mulf %326, %326 : vector<8x32xf32>
    %cst_189 = arith.constant dense<0.000000e+00> : vector<8xf32>
    %328 = vector.multi_reduction <add>, %327, %cst_189 [1] : vector<8x32xf32> to vector<8xf32>
    %329 = vector.shape_cast %328 : vector<8xf32> to vector<8x1xf32>
    %cst_190 = arith.constant 3.200000e+01 : f32
    %330 = vector.broadcast %cst_190 : f32 to vector<8x1xf32>
    %331 = arith.divf %329, %330 : vector<8x1xf32>
    %332 = vector.broadcast %324 : vector<8x1xf32> to vector<8x32xf32>
    %333 = arith.subf %318, %332 : vector<8x32xf32>
    %cst_191 = arith.constant 9.99999996E-13 : f32
    %334 = vector.broadcast %cst_191 : f32 to vector<8x1xf32>
    %335 = arith.addf %331, %334 : vector<8x1xf32>
    %336 = math.rsqrt %335 : vector<8x1xf32>
    %337 = vector.broadcast %336 : vector<8x1xf32> to vector<8x32xf32>
    %338 = arith.mulf %333, %337 : vector<8x32xf32>
    %339 = vector.broadcast %319 : vector<1x32xf32> to vector<8x32xf32>
    %340 = arith.mulf %338, %339 : vector<8x32xf32>
    %341 = vector.broadcast %320 : vector<1x32xf32> to vector<8x32xf32>
    %342 = arith.addf %340, %341 : vector<8x32xf32>
    %c0_192 = arith.constant 0 : index
    %c0_193 = arith.constant 0 : index
    %c0_194 = arith.constant 0 : index
    %343 = vector.load %arg16[%c0_192, %c0_193, %c0_194] : memref<1x8x32xf32, #tpu.memory_space<vmem>>, vector<1x8x32xf32>
    %344 = vector.shape_cast %343 : vector<1x8x32xf32> to vector<8x32xf32>
    %345 = vector.shape_cast %342 : vector<8x32xf32> to vector<1x8x32xf32>
    tpu.vector_store %arg16[%c0_192, %c0_193, %c0_194], %345 {strides = array<i32>} : memref<1x8x32xf32, #tpu.memory_space<vmem>>, vector<1x8x32xf32>,
    return
  }
  func.func @transform_0(%arg0: i32) -> (i32, i32, i32) {
    %c0_i32 = arith.constant 0 : i32
    %c0_i32_0 = arith.constant 0 : i32
    %c0_i32_1 = arith.constant 0 : i32
    return %arg0, %c0_i32, %c0_i32_0 : i32, i32, i32
  }
  func.func @transform_1(%arg0: i32) -> (i32, i32) {
    %c0_i32 = arith.constant 0 : i32
    %c0_i32_0 = arith.constant 0 : i32
    %c0_i32_1 = arith.constant 0 : i32
    return %c0_i32, %c0_i32_0 : i32, i32
  }
  func.func @transform_2(%arg0: i32) -> (i32, i32, i32) {
    %c0_i32 = arith.constant 0 : i32
    %c0_i32_0 = arith.constant 0 : i32
    %c0_i32_1 = arith.constant 0 : i32
    return %arg0, %c0_i32, %c0_i32_0 : i32, i32, i32
  }
  func.func @transform_3(%arg0: i32) -> (i32, i32, i32) {
    %c0_i32 = arith.constant 0 : i32
    %c0_i32_0 = arith.constant 0 : i32
    %c0_i32_1 = arith.constant 0 : i32
    return %arg0, %c0_i32, %c0_i32_0 : i32, i32, i32
  }
  func.func @transform_4(%arg0: i32) -> (i32, i32) {
    %c0_i32 = arith.constant 0 : i32
    %c0_i32_0 = arith.constant 0 : i32
    %c0_i32_1 = arith.constant 0 : i32
    return %c0_i32, %c0_i32_0 : i32, i32
  }
  func.func @transform_5(%arg0: i32) -> (i32, i32) {
    %c0_i32 = arith.constant 0 : i32
    %c0_i32_0 = arith.constant 0 : i32
    %c0_i32_1 = arith.constant 0 : i32
    return %c0_i32, %c0_i32_0 : i32, i32
  }
  func.func @transform_6(%arg0: i32) -> (i32, i32) {
    %c0_i32 = arith.constant 0 : i32
    %c0_i32_0 = arith.constant 0 : i32
    %c0_i32_1 = arith.constant 0 : i32
    return %c0_i32, %c0_i32_0 : i32, i32
  }
  func.func @transform_7(%arg0: i32) -> (i32, i32) {
    %c0_i32 = arith.constant 0 : i32
    %c0_i32_0 = arith.constant 0 : i32
    %c0_i32_1 = arith.constant 0 : i32
    return %c0_i32, %c0_i32_0 : i32, i32
  }
  func.func @transform_8(%arg0: i32) -> (i32, i32) {
    %c0_i32 = arith.constant 0 : i32
    %c0_i32_0 = arith.constant 0 : i32
    %c0_i32_1 = arith.constant 0 : i32
    return %c0_i32, %c0_i32_0 : i32, i32
  }
  func.func @transform_9(%arg0: i32) -> (i32, i32, i32) {
    %c0_i32 = arith.constant 0 : i32
    %c0_i32_0 = arith.constant 0 : i32
    %c0_i32_1 = arith.constant 0 : i32
    %c0_i32_2 = arith.constant 0 : i32
    return %c0_i32, %c0_i32_0, %c0_i32_1 : i32, i32, i32
  }
  func.func @transform_10(%arg0: i32) -> (i32, i32) {
    %c0_i32 = arith.constant 0 : i32
    %c0_i32_0 = arith.constant 0 : i32
    %c0_i32_1 = arith.constant 0 : i32
    return %c0_i32, %c0_i32_0 : i32, i32
  }
  func.func @transform_11(%arg0: i32) -> (i32, i32) {
    %c0_i32 = arith.constant 0 : i32
    %c0_i32_0 = arith.constant 0 : i32
    %c0_i32_1 = arith.constant 0 : i32
    return %c0_i32, %c0_i32_0 : i32, i32
  }
  func.func @transform_12(%arg0: i32) -> (i32, i32) {
    %c0_i32 = arith.constant 0 : i32
    %c0_i32_0 = arith.constant 0 : i32
    %c0_i32_1 = arith.constant 0 : i32
    return %c0_i32, %c0_i32_0 : i32, i32
  }
  func.func @transform_13(%arg0: i32) -> (i32, i32) {
    %c0_i32 = arith.constant 0 : i32
    %c0_i32_0 = arith.constant 0 : i32
    %c0_i32_1 = arith.constant 0 : i32
    return %c0_i32, %c0_i32_0 : i32, i32
  }
  func.func @transform_14(%arg0: i32) -> (i32, i32) {
    %c0_i32 = arith.constant 0 : i32
    %c0_i32_0 = arith.constant 0 : i32
    %c0_i32_1 = arith.constant 0 : i32
    return %c0_i32, %c0_i32_0 : i32, i32
  }
  func.func @transform_15(%arg0: i32) -> (i32, i32, i32) {
    %c0_i32 = arith.constant 0 : i32
    %c0_i32_0 = arith.constant 0 : i32
    %c0_i32_1 = arith.constant 0 : i32
    return %arg0, %c0_i32, %c0_i32_0 : i32, i32, i32
  }
}

module attributes {stable_mosaic.version = 11 : i64} {
  func.func @_layer_kernel(%arg0: i32, %arg1: memref<1x8x32xf32, #tpu.memory_space<vmem>>, %arg2: memref<16x32xf32, #tpu.memory_space<vmem>>, %arg3: memref<1x8x8xf32, #tpu.memory_space<vmem>>, %arg4: memref<1x8x8xf32, #tpu.memory_space<vmem>>, %arg5: memref<32x128xf32, #tpu.memory_space<vmem>>, %arg6: memref<32x32xf32, #tpu.memory_space<vmem>>, %arg7: memref<4x8xf32, #tpu.memory_space<vmem>>, %arg8: memref<4x8xf32, #tpu.memory_space<vmem>>, %arg9: memref<4x8xf32, #tpu.memory_space<vmem>>, %arg10: memref<4x8x2xf32, #tpu.memory_space<vmem>>, %arg11: memref<4x32xf32, #tpu.memory_space<vmem>>, %arg12: memref<32x64xf32, #tpu.memory_space<vmem>>, %arg13: memref<1x64xf32, #tpu.memory_space<vmem>>, %arg14: memref<64x32xf32, #tpu.memory_space<vmem>>, %arg15: memref<1x32xf32, #tpu.memory_space<vmem>>, %arg16: memref<1x8x32xf32, #tpu.memory_space<vmem>>, %arg17: memref<8x8xf32, #tpu.memory_space<vmem>>) attributes {dimension_semantics = [#tpu.dimension_semantics<parallel>], iteration_bounds = array<i64: 2>, scalar_prefetch = 0 : i64, scratch_operands = 1 : i64, tpu.core_type = #tpu.core_type<tc>, window_params = [{transform_indices = @transform_0, window_bounds = array<i64: 1, 8, 32>}, {pipeline_mode = #tpu.pipeline_mode<synchronous>, transform_indices = @transform_1, window_bounds = array<i64: 16, 32>}, {transform_indices = @transform_2, window_bounds = array<i64: 1, 8, 8>}, {transform_indices = @transform_3, window_bounds = array<i64: 1, 8, 8>}, {pipeline_mode = #tpu.pipeline_mode<synchronous>, transform_indices = @transform_4, window_bounds = array<i64: 32, 128>}, {pipeline_mode = #tpu.pipeline_mode<synchronous>, transform_indices = @transform_5, window_bounds = array<i64: 32, 32>}, {pipeline_mode = #tpu.pipeline_mode<synchronous>, transform_indices = @transform_6, window_bounds = array<i64: 4, 8>}, {pipeline_mode = #tpu.pipeline_mode<synchronous>, transform_indices = @transform_7, window_bounds = array<i64: 4, 8>}, {pipeline_mode = #tpu.pipeline_mode<synchronous>, transform_indices = @transform_8, window_bounds = array<i64: 4, 8>}, {pipeline_mode = #tpu.pipeline_mode<synchronous>, transform_indices = @transform_9, window_bounds = array<i64: 4, 8, 2>}, {pipeline_mode = #tpu.pipeline_mode<synchronous>, transform_indices = @transform_10, window_bounds = array<i64: 4, 32>}, {pipeline_mode = #tpu.pipeline_mode<synchronous>, transform_indices = @transform_11, window_bounds = array<i64: 32, 64>}, {pipeline_mode = #tpu.pipeline_mode<synchronous>, transform_indices = @transform_12, window_bounds = array<i64: 1, 64>}, {pipeline_mode = #tpu.pipeline_mode<synchronous>, transform_indices = @transform_13, window_bounds = array<i64: 64, 32>}, {pipeline_mode = #tpu.pipeline_mode<synchronous>, transform_indices = @transform_14, window_bounds = array<i64: 1, 32>}, {transform_indices = @transform_15, window_bounds = array<i64: 1, 8, 32>}]} {
    %c0 = arith.constant 0 : index
    %c0_0 = arith.constant 0 : index
    %c0_1 = arith.constant 0 : index
    %0 = vector.load %arg1[%c0, %c0_0, %c0_1] : memref<1x8x32xf32, #tpu.memory_space<vmem>>, vector<1x8x32xf32>
    %1 = vector.shape_cast %0 : vector<1x8x32xf32> to vector<8x32xf32>
    %c0_2 = arith.constant 0 : index
    %c0_3 = arith.constant 0 : index
    %c0_4 = arith.constant 0 : index
    %2 = vector.load %arg3[%c0_2, %c0_3, %c0_4] : memref<1x8x8xf32, #tpu.memory_space<vmem>>, vector<1x8x8xf32>
    %3 = vector.shape_cast %2 : vector<1x8x8xf32> to vector<8x8xf32>
    %c0_5 = arith.constant 0 : index
    %c0_6 = arith.constant 0 : index
    %c0_7 = arith.constant 0 : index
    %4 = vector.load %arg4[%c0_5, %c0_6, %c0_7] : memref<1x8x8xf32, #tpu.memory_space<vmem>>, vector<1x8x8xf32>
    %5 = vector.shape_cast %4 : vector<1x8x8xf32> to vector<8x8xf32>
    %c0_8 = arith.constant 0 : index
    %c0_9 = arith.constant 0 : index
    %6 = vector.load %arg5[%c0_8, %c0_9] : memref<32x128xf32, #tpu.memory_space<vmem>>, vector<32x128xf32>
    %cst = arith.constant dense<0.000000e+00> : vector<8x128xf32>
    %7 = tpu.matmul %1, %6, %cst {dimension_numbers = #tpu.dot_dimension_numbers<[1], [0], [0], [1], [0, 0, 1, 1], [], []>} : vector<8x32xf32>, vector<32x128xf32>, vector<8x128xf32> -> vector<8x128xf32>
    %c0_10 = arith.constant 0 : index
    %c0_11 = arith.constant 0 : index
    %8 = vector.load %arg2[%c0_10, %c0_11] : memref<16x32xf32, #tpu.memory_space<vmem>>, vector<16x32xf32>
    %c0_12 = arith.constant 0 : index
    %c96 = arith.constant 96 : index
    %9 = vector.load %arg5[%c0_12, %c96] : memref<32x128xf32, #tpu.memory_space<vmem>>, vector<32x32xf32>
    %cst_13 = arith.constant dense<0.000000e+00> : vector<16x32xf32>
    %10 = tpu.matmul %8, %9, %cst_13 {dimension_numbers = #tpu.dot_dimension_numbers<[1], [0], [0], [1], [0, 0, 1, 1], [], []>} : vector<16x32xf32>, vector<32x32xf32>, vector<16x32xf32> -> vector<16x32xf32>
    %11 = vector.extract_strided_slice %7 {offsets = [0, 0], sizes = [8, 8], strides = [1, 1]} : vector<8x128xf32> to vector<8x8xf32>
    %12 = vector.extract_strided_slice %7 {offsets = [0, 32], sizes = [8, 8], strides = [1, 1]} : vector<8x128xf32> to vector<8x8xf32>
    %13 = vector.extract_strided_slice %7 {offsets = [0, 64], sizes = [8, 8], strides = [1, 1]} : vector<8x128xf32> to vector<8x8xf32>
    %14 = vector.extract_strided_slice %10 {offsets = [0, 0], sizes = [16, 8], strides = [1, 1]} : vector<16x32xf32> to vector<16x8xf32>
    %c0_14 = arith.constant 0 : index
    %c0_15 = arith.constant 0 : index
    %15 = vector.load %arg7[%c0_14, %c0_15] : memref<4x8xf32, #tpu.memory_space<vmem>>, vector<1x8xf32>
    %16 = vector.broadcast %15 : vector<1x8xf32> to vector<8x8xf32>
    %17 = arith.addf %11, %16 : vector<8x8xf32>
    %cst_16 = arith.constant dense<0.000000e+00> : vector<8x8xf32>
    %18 = tpu.matmul %17, %12, %cst_16 {dimension_numbers = #tpu.dot_dimension_numbers<[1], [1], [0], [0], [0, 0, 1, 0], [], []>} : vector<8x8xf32>, vector<8x8xf32>, vector<8x8xf32> -> vector<8x8xf32>
    %c0_17 = arith.constant 0 : index
    %c0_18 = arith.constant 0 : index
    %19 = vector.load %arg8[%c0_17, %c0_18] : memref<4x8xf32, #tpu.memory_space<vmem>>, vector<1x8xf32>
    %20 = vector.broadcast %19 : vector<1x8xf32> to vector<8x8xf32>
    %21 = arith.addf %11, %20 : vector<8x8xf32>
    %cst_19 = arith.constant dense<0.000000e+00> : vector<8x16xf32>
    %22 = tpu.matmul %21, %14, %cst_19 {dimension_numbers = #tpu.dot_dimension_numbers<[1], [1], [0], [0], [0, 0, 1, 0], [], []>} : vector<8x8xf32>, vector<16x8xf32>, vector<8x16xf32> -> vector<8x16xf32>
    %23 = vector.extract_strided_slice %22 {offsets = [0, 8], sizes = [1, 8], strides = [1, 1]} : vector<8x16xf32> to vector<1x8xf32>
    %c0_20 = arith.constant 0 : index
    %c0_21 = arith.constant 0 : index
    %24 = vector.load %arg17[%c0_20, %c0_21] : memref<8x8xf32, #tpu.memory_space<vmem>>, vector<1x8xf32>
    tpu.vector_store %arg17[%c0_20, %c0_21], %23 {strides = array<i32>} : memref<8x8xf32, #tpu.memory_space<vmem>>, vector<1x8xf32>,
    %25 = vector.extract_strided_slice %22 {offsets = [1, 7], sizes = [1, 8], strides = [1, 1]} : vector<8x16xf32> to vector<1x8xf32>
    %c1 = arith.constant 1 : index
    %c0_22 = arith.constant 0 : index
    %26 = vector.load %arg17[%c1, %c0_22] : memref<8x8xf32, #tpu.memory_space<vmem>>, vector<1x8xf32>
    tpu.vector_store %arg17[%c1, %c0_22], %25 {strides = array<i32>} : memref<8x8xf32, #tpu.memory_space<vmem>>, vector<1x8xf32>,
    %27 = vector.extract_strided_slice %22 {offsets = [2, 6], sizes = [1, 8], strides = [1, 1]} : vector<8x16xf32> to vector<1x8xf32>
    %c2 = arith.constant 2 : index
    %c0_23 = arith.constant 0 : index
    %28 = vector.load %arg17[%c2, %c0_23] : memref<8x8xf32, #tpu.memory_space<vmem>>, vector<1x8xf32>
    tpu.vector_store %arg17[%c2, %c0_23], %27 {strides = array<i32>} : memref<8x8xf32, #tpu.memory_space<vmem>>, vector<1x8xf32>,
    %29 = vector.extract_strided_slice %22 {offsets = [3, 5], sizes = [1, 8], strides = [1, 1]} : vector<8x16xf32> to vector<1x8xf32>
    %c3 = arith.constant 3 : index
    %c0_24 = arith.constant 0 : index
    %30 = vector.load %arg17[%c3, %c0_24] : memref<8x8xf32, #tpu.memory_space<vmem>>, vector<1x8xf32>
    tpu.vector_store %arg17[%c3, %c0_24], %29 {strides = array<i32>} : memref<8x8xf32, #tpu.memory_space<vmem>>, vector<1x8xf32>,
    %31 = vector.extract_strided_slice %22 {offsets = [4, 4], sizes = [1, 8], strides = [1, 1]} : vector<8x16xf32> to vector<1x8xf32>
    %c4 = arith.constant 4 : index
    %c0_25 = arith.constant 0 : index
    %32 = vector.load %arg17[%c4, %c0_25] : memref<8x8xf32, #tpu.memory_space<vmem>>, vector<1x8xf32>
    tpu.vector_store %arg17[%c4, %c0_25], %31 {strides = array<i32>} : memref<8x8xf32, #tpu.memory_space<vmem>>, vector<1x8xf32>,
    %33 = vector.extract_strided_slice %22 {offsets = [5, 3], sizes = [1, 8], strides = [1, 1]} : vector<8x16xf32> to vector<1x8xf32>
    %c5 = arith.constant 5 : index
    %c0_26 = arith.constant 0 : index
    %34 = vector.load %arg17[%c5, %c0_26] : memref<8x8xf32, #tpu.memory_space<vmem>>, vector<1x8xf32>
    tpu.vector_store %arg17[%c5, %c0_26], %33 {strides = array<i32>} : memref<8x8xf32, #tpu.memory_space<vmem>>, vector<1x8xf32>,
    %35 = vector.extract_strided_slice %22 {offsets = [6, 2], sizes = [1, 8], strides = [1, 1]} : vector<8x16xf32> to vector<1x8xf32>
    %c6 = arith.constant 6 : index
    %c0_27 = arith.constant 0 : index
    %36 = vector.load %arg17[%c6, %c0_27] : memref<8x8xf32, #tpu.memory_space<vmem>>, vector<1x8xf32>
    tpu.vector_store %arg17[%c6, %c0_27], %35 {strides = array<i32>} : memref<8x8xf32, #tpu.memory_space<vmem>>, vector<1x8xf32>,
    %37 = vector.extract_strided_slice %22 {offsets = [7, 1], sizes = [1, 8], strides = [1, 1]} : vector<8x16xf32> to vector<1x8xf32>
    %c7 = arith.constant 7 : index
    %c0_28 = arith.constant 0 : index
    %38 = vector.load %arg17[%c7, %c0_28] : memref<8x8xf32, #tpu.memory_space<vmem>>, vector<1x8xf32>
    tpu.vector_store %arg17[%c7, %c0_28], %37 {strides = array<i32>} : memref<8x8xf32, #tpu.memory_space<vmem>>, vector<1x8xf32>,
    %c0_29 = arith.constant 0 : index
    %c0_30 = arith.constant 0 : index
    %39 = vector.load %arg17[%c0_29, %c0_30] : memref<8x8xf32, #tpu.memory_space<vmem>>, vector<8x8xf32>
    %c0_31 = arith.constant 0 : index
    %c0_32 = arith.constant 0 : index
    %40 = vector.load %arg9[%c0_31, %c0_32] : memref<4x8xf32, #tpu.memory_space<vmem>>, vector<1x8xf32>
    %41 = vector.broadcast %40 : vector<1x8xf32> to vector<8x8xf32>
    %42 = arith.addf %11, %41 : vector<8x8xf32>
    %c0_33 = arith.constant 0 : index
    %c0_34 = arith.constant 0 : index
    %c0_35 = arith.constant 0 : index
    %43 = vector.load %arg10[%c0_33, %c0_34, %c0_35] : memref<4x8x2xf32, #tpu.memory_space<vmem>>, vector<1x8x2xf32>
    %44 = vector.shape_cast %43 : vector<1x8x2xf32> to vector<8x2xf32>
    %cst_36 = arith.constant dense<0.000000e+00> : vector<8x2xf32>
    %45 = tpu.matmul %42, %44, %cst_36 {dimension_numbers = #tpu.dot_dimension_numbers<[1], [0], [0], [1], [0, 0, 1, 1], [], []>} : vector<8x8xf32>, vector<8x2xf32>, vector<8x2xf32> -> vector<8x2xf32>
    %46 = vector.extract_strided_slice %45 {offsets = [0, 0], sizes = [8, 1], strides = [1, 1]} : vector<8x2xf32> to vector<8x1xf32>
    %cst_37 = arith.constant 1.000000e+00 : f32
    %47 = vector.broadcast %cst_37 : f32 to vector<8x8xf32>
    %48 = arith.subf %47, %3 : vector<8x8xf32>
    %49 = vector.broadcast %46 : vector<8x1xf32> to vector<8x8xf32>
    %50 = arith.mulf %49, %48 : vector<8x8xf32>
    %51 = vector.extract_strided_slice %45 {offsets = [0, 1], sizes = [8, 1], strides = [1, 1]} : vector<8x2xf32> to vector<8x1xf32>
    %52 = vector.broadcast %51 : vector<8x1xf32> to vector<8x8xf32>
    %53 = arith.mulf %52, %3 : vector<8x8xf32>
    %54 = arith.addf %50, %53 : vector<8x8xf32>
    %55 = arith.addf %18, %39 : vector<8x8xf32>
    %56 = arith.addf %55, %54 : vector<8x8xf32>
    %cst_38 = arith.constant 0.353553385 : f32
    %57 = vector.broadcast %cst_38 : f32 to vector<8x8xf32>
    %58 = arith.mulf %56, %57 : vector<8x8xf32>
    %cst_39 = arith.constant 1.000000e+30 : f32
    %59 = vector.broadcast %cst_39 : f32 to vector<8x8xf32>
    %60 = arith.mulf %59, %5 : vector<8x8xf32>
    %61 = arith.subf %58, %60 : vector<8x8xf32>
    %cst_40 = arith.constant dense<0xFF800000> : vector<8xf32>
    %62 = vector.multi_reduction <maximumf>, %61, %cst_40 [1] : vector<8x8xf32> to vector<8xf32>
    %63 = vector.shape_cast %62 : vector<8xf32> to vector<8x1xf32>
    %64 = vector.broadcast %63 : vector<8x1xf32> to vector<8x8xf32>
    %65 = arith.subf %61, %64 : vector<8x8xf32>
    %66 = math.exp %65 : vector<8x8xf32>
    %cst_41 = arith.constant dense<0.000000e+00> : vector<8xf32>
    %67 = vector.multi_reduction <add>, %66, %cst_41 [1] : vector<8x8xf32> to vector<8xf32>
    %68 = vector.shape_cast %67 : vector<8xf32> to vector<8x1xf32>
    %69 = tpu.reciprocal %68 {approx = true} : vector<8x1xf32> -> vector<8x1xf32>
    %70 = vector.broadcast %69 : vector<8x1xf32> to vector<8x8xf32>
    %71 = arith.mulf %66, %70 : vector<8x8xf32>
    %cst_42 = arith.constant dense<0.000000e+00> : vector<8x8xf32>
    %72 = tpu.matmul %71, %13, %cst_42 {dimension_numbers = #tpu.dot_dimension_numbers<[1], [0], [0], [1], [0, 0, 1, 1], [], []>} : vector<8x8xf32>, vector<8x8xf32>, vector<8x8xf32> -> vector<8x8xf32>
    %c0_43 = arith.constant 0 : index
    %c0_44 = arith.constant 0 : index
    %73 = vector.load %arg6[%c0_43, %c0_44] : memref<32x32xf32, #tpu.memory_space<vmem>>, vector<8x32xf32>
    %cst_45 = arith.constant dense<0.000000e+00> : vector<8x32xf32>
    %74 = tpu.matmul %72, %73, %cst_45 {dimension_numbers = #tpu.dot_dimension_numbers<[1], [0], [0], [1], [0, 0, 1, 1], [], []>} : vector<8x8xf32>, vector<8x32xf32>, vector<8x32xf32> -> vector<8x32xf32>
    %75 = vector.extract_strided_slice %7 {offsets = [0, 8], sizes = [8, 8], strides = [1, 1]} : vector<8x128xf32> to vector<8x8xf32>
    %76 = vector.extract_strided_slice %7 {offsets = [0, 40], sizes = [8, 8], strides = [1, 1]} : vector<8x128xf32> to vector<8x8xf32>
    %77 = vector.extract_strided_slice %7 {offsets = [0, 72], sizes = [8, 8], strides = [1, 1]} : vector<8x128xf32> to vector<8x8xf32>
    %78 = vector.extract_strided_slice %10 {offsets = [0, 8], sizes = [16, 8], strides = [1, 1]} : vector<16x32xf32> to vector<16x8xf32>
    %c1_46 = arith.constant 1 : index
    %c0_47 = arith.constant 0 : index
    %79 = vector.load %arg7[%c1_46, %c0_47] : memref<4x8xf32, #tpu.memory_space<vmem>>, vector<1x8xf32>
    %80 = vector.broadcast %79 : vector<1x8xf32> to vector<8x8xf32>
    %81 = arith.addf %75, %80 : vector<8x8xf32>
    %cst_48 = arith.constant dense<0.000000e+00> : vector<8x8xf32>
    %82 = tpu.matmul %81, %76, %cst_48 {dimension_numbers = #tpu.dot_dimension_numbers<[1], [1], [0], [0], [0, 0, 1, 0], [], []>} : vector<8x8xf32>, vector<8x8xf32>, vector<8x8xf32> -> vector<8x8xf32>
    %c1_49 = arith.constant 1 : index
    %c0_50 = arith.constant 0 : index
    %83 = vector.load %arg8[%c1_49, %c0_50] : memref<4x8xf32, #tpu.memory_space<vmem>>, vector<1x8xf32>
    %84 = vector.broadcast %83 : vector<1x8xf32> to vector<8x8xf32>
    %85 = arith.addf %75, %84 : vector<8x8xf32>
    %cst_51 = arith.constant dense<0.000000e+00> : vector<8x16xf32>
    %86 = tpu.matmul %85, %78, %cst_51 {dimension_numbers = #tpu.dot_dimension_numbers<[1], [1], [0], [0], [0, 0, 1, 0], [], []>} : vector<8x8xf32>, vector<16x8xf32>, vector<8x16xf32> -> vector<8x16xf32>
    %87 = vector.extract_strided_slice %86 {offsets = [0, 8], sizes = [1, 8], strides = [1, 1]} : vector<8x16xf32> to vector<1x8xf32>
    %c0_52 = arith.constant 0 : index
    %c0_53 = arith.constant 0 : index
    %88 = vector.load %arg17[%c0_52, %c0_53] : memref<8x8xf32, #tpu.memory_space<vmem>>, vector<1x8xf32>
    tpu.vector_store %arg17[%c0_52, %c0_53], %87 {strides = array<i32>} : memref<8x8xf32, #tpu.memory_space<vmem>>, vector<1x8xf32>,
    %89 = vector.extract_strided_slice %86 {offsets = [1, 7], sizes = [1, 8], strides = [1, 1]} : vector<8x16xf32> to vector<1x8xf32>
    %c1_54 = arith.constant 1 : index
    %c0_55 = arith.constant 0 : index
    %90 = vector.load %arg17[%c1_54, %c0_55] : memref<8x8xf32, #tpu.memory_space<vmem>>, vector<1x8xf32>
    tpu.vector_store %arg17[%c1_54, %c0_55], %89 {strides = array<i32>} : memref<8x8xf32, #tpu.memory_space<vmem>>, vector<1x8xf32>,
    %91 = vector.extract_strided_slice %86 {offsets = [2, 6], sizes = [1, 8], strides = [1, 1]} : vector<8x16xf32> to vector<1x8xf32>
    %c2_56 = arith.constant 2 : index
    %c0_57 = arith.constant 0 : index
    %92 = vector.load %arg17[%c2_56, %c0_57] : memref<8x8xf32, #tpu.memory_space<vmem>>, vector<1x8xf32>
    tpu.vector_store %arg17[%c2_56, %c0_57], %91 {strides = array<i32>} : memref<8x8xf32, #tpu.memory_space<vmem>>, vector<1x8xf32>,
    %93 = vector.extract_strided_slice %86 {offsets = [3, 5], sizes = [1, 8], strides = [1, 1]} : vector<8x16xf32> to vector<1x8xf32>
    %c3_58 = arith.constant 3 : index
    %c0_59 = arith.constant 0 : index
    %94 = vector.load %arg17[%c3_58, %c0_59] : memref<8x8xf32, #tpu.memory_space<vmem>>, vector<1x8xf32>
    tpu.vector_store %arg17[%c3_58, %c0_59], %93 {strides = array<i32>} : memref<8x8xf32, #tpu.memory_space<vmem>>, vector<1x8xf32>,
    %95 = vector.extract_strided_slice %86 {offsets = [4, 4], sizes = [1, 8], strides = [1, 1]} : vector<8x16xf32> to vector<1x8xf32>
    %c4_60 = arith.constant 4 : index
    %c0_61 = arith.constant 0 : index
    %96 = vector.load %arg17[%c4_60, %c0_61] : memref<8x8xf32, #tpu.memory_space<vmem>>, vector<1x8xf32>
    tpu.vector_store %arg17[%c4_60, %c0_61], %95 {strides = array<i32>} : memref<8x8xf32, #tpu.memory_space<vmem>>, vector<1x8xf32>,
    %97 = vector.extract_strided_slice %86 {offsets = [5, 3], sizes = [1, 8], strides = [1, 1]} : vector<8x16xf32> to vector<1x8xf32>
    %c5_62 = arith.constant 5 : index
    %c0_63 = arith.constant 0 : index
    %98 = vector.load %arg17[%c5_62, %c0_63] : memref<8x8xf32, #tpu.memory_space<vmem>>, vector<1x8xf32>
    tpu.vector_store %arg17[%c5_62, %c0_63], %97 {strides = array<i32>} : memref<8x8xf32, #tpu.memory_space<vmem>>, vector<1x8xf32>,
    %99 = vector.extract_strided_slice %86 {offsets = [6, 2], sizes = [1, 8], strides = [1, 1]} : vector<8x16xf32> to vector<1x8xf32>
    %c6_64 = arith.constant 6 : index
    %c0_65 = arith.constant 0 : index
    %100 = vector.load %arg17[%c6_64, %c0_65] : memref<8x8xf32, #tpu.memory_space<vmem>>, vector<1x8xf32>
    tpu.vector_store %arg17[%c6_64, %c0_65], %99 {strides = array<i32>} : memref<8x8xf32, #tpu.memory_space<vmem>>, vector<1x8xf32>,
    %101 = vector.extract_strided_slice %86 {offsets = [7, 1], sizes = [1, 8], strides = [1, 1]} : vector<8x16xf32> to vector<1x8xf32>
    %c7_66 = arith.constant 7 : index
    %c0_67 = arith.constant 0 : index
    %102 = vector.load %arg17[%c7_66, %c0_67] : memref<8x8xf32, #tpu.memory_space<vmem>>, vector<1x8xf32>
    tpu.vector_store %arg17[%c7_66, %c0_67], %101 {strides = array<i32>} : memref<8x8xf32, #tpu.memory_space<vmem>>, vector<1x8xf32>,
    %c0_68 = arith.constant 0 : index
    %c0_69 = arith.constant 0 : index
    %103 = vector.load %arg17[%c0_68, %c0_69] : memref<8x8xf32, #tpu.memory_space<vmem>>, vector<8x8xf32>
    %c1_70 = arith.constant 1 : index
    %c0_71 = arith.constant 0 : index
    %104 = vector.load %arg9[%c1_70, %c0_71] : memref<4x8xf32, #tpu.memory_space<vmem>>, vector<1x8xf32>
    %105 = vector.broadcast %104 : vector<1x8xf32> to vector<8x8xf32>
    %106 = arith.addf %75, %105 : vector<8x8xf32>
    %c1_72 = arith.constant 1 : index
    %c0_73 = arith.constant 0 : index
    %c0_74 = arith.constant 0 : index
    %107 = vector.load %arg10[%c1_72, %c0_73, %c0_74] : memref<4x8x2xf32, #tpu.memory_space<vmem>>, vector<1x8x2xf32>
    %108 = vector.shape_cast %107 : vector<1x8x2xf32> to vector<8x2xf32>
    %cst_75 = arith.constant dense<0.000000e+00> : vector<8x2xf32>
    %109 = tpu.matmul %106, %108, %cst_75 {dimension_numbers = #tpu.dot_dimension_numbers<[1], [0], [0], [1], [0, 0, 1, 1], [], []>} : vector<8x8xf32>, vector<8x2xf32>, vector<8x2xf32> -> vector<8x2xf32>
    %110 = vector.extract_strided_slice %109 {offsets = [0, 0], sizes = [8, 1], strides = [1, 1]} : vector<8x2xf32> to vector<8x1xf32>
    %cst_76 = arith.constant 1.000000e+00 : f32
    %111 = vector.broadcast %cst_76 : f32 to vector<8x8xf32>
    %112 = arith.subf %111, %3 : vector<8x8xf32>
    %113 = vector.broadcast %110 : vector<8x1xf32> to vector<8x8xf32>
    %114 = arith.mulf %113, %112 : vector<8x8xf32>
    %115 = vector.extract_strided_slice %109 {offsets = [0, 1], sizes = [8, 1], strides = [1, 1]} : vector<8x2xf32> to vector<8x1xf32>
    %116 = vector.broadcast %115 : vector<8x1xf32> to vector<8x8xf32>
    %117 = arith.mulf %116, %3 : vector<8x8xf32>
    %118 = arith.addf %114, %117 : vector<8x8xf32>
    %119 = arith.addf %82, %103 : vector<8x8xf32>
    %120 = arith.addf %119, %118 : vector<8x8xf32>
    %cst_77 = arith.constant 0.353553385 : f32
    %121 = vector.broadcast %cst_77 : f32 to vector<8x8xf32>
    %122 = arith.mulf %120, %121 : vector<8x8xf32>
    %cst_78 = arith.constant 1.000000e+30 : f32
    %123 = vector.broadcast %cst_78 : f32 to vector<8x8xf32>
    %124 = arith.mulf %123, %5 : vector<8x8xf32>
    %125 = arith.subf %122, %124 : vector<8x8xf32>
    %cst_79 = arith.constant dense<0xFF800000> : vector<8xf32>
    %126 = vector.multi_reduction <maximumf>, %125, %cst_79 [1] : vector<8x8xf32> to vector<8xf32>
    %127 = vector.shape_cast %126 : vector<8xf32> to vector<8x1xf32>
    %128 = vector.broadcast %127 : vector<8x1xf32> to vector<8x8xf32>
    %129 = arith.subf %125, %128 : vector<8x8xf32>
    %130 = math.exp %129 : vector<8x8xf32>
    %cst_80 = arith.constant dense<0.000000e+00> : vector<8xf32>
    %131 = vector.multi_reduction <add>, %130, %cst_80 [1] : vector<8x8xf32> to vector<8xf32>
    %132 = vector.shape_cast %131 : vector<8xf32> to vector<8x1xf32>
    %133 = tpu.reciprocal %132 {approx = true} : vector<8x1xf32> -> vector<8x1xf32>
    %134 = vector.broadcast %133 : vector<8x1xf32> to vector<8x8xf32>
    %135 = arith.mulf %130, %134 : vector<8x8xf32>
    %cst_81 = arith.constant dense<0.000000e+00> : vector<8x8xf32>
    %136 = tpu.matmul %135, %77, %cst_81 {dimension_numbers = #tpu.dot_dimension_numbers<[1], [0], [0], [1], [0, 0, 1, 1], [], []>} : vector<8x8xf32>, vector<8x8xf32>, vector<8x8xf32> -> vector<8x8xf32>
    %c8 = arith.constant 8 : index
    %c0_82 = arith.constant 0 : index
    %137 = vector.load %arg6[%c8, %c0_82] : memref<32x32xf32, #tpu.memory_space<vmem>>, vector<8x32xf32>
    %cst_83 = arith.constant dense<0.000000e+00> : vector<8x32xf32>
    %138 = tpu.matmul %136, %137, %cst_83 {dimension_numbers = #tpu.dot_dimension_numbers<[1], [0], [0], [1], [0, 0, 1, 1], [], []>} : vector<8x8xf32>, vector<8x32xf32>, vector<8x32xf32> -> vector<8x32xf32>
    %139 = arith.addf %74, %138 : vector<8x32xf32>
    %140 = vector.extract_strided_slice %7 {offsets = [0, 16], sizes = [8, 8], strides = [1, 1]} : vector<8x128xf32> to vector<8x8xf32>
    %141 = vector.extract_strided_slice %7 {offsets = [0, 48], sizes = [8, 8], strides = [1, 1]} : vector<8x128xf32> to vector<8x8xf32>
    %142 = vector.extract_strided_slice %7 {offsets = [0, 80], sizes = [8, 8], strides = [1, 1]} : vector<8x128xf32> to vector<8x8xf32>
    %143 = vector.extract_strided_slice %10 {offsets = [0, 16], sizes = [16, 8], strides = [1, 1]} : vector<16x32xf32> to vector<16x8xf32>
    %c2_84 = arith.constant 2 : index
    %c0_85 = arith.constant 0 : index
    %144 = vector.load %arg7[%c2_84, %c0_85] : memref<4x8xf32, #tpu.memory_space<vmem>>, vector<1x8xf32>
    %145 = vector.broadcast %144 : vector<1x8xf32> to vector<8x8xf32>
    %146 = arith.addf %140, %145 : vector<8x8xf32>
    %cst_86 = arith.constant dense<0.000000e+00> : vector<8x8xf32>
    %147 = tpu.matmul %146, %141, %cst_86 {dimension_numbers = #tpu.dot_dimension_numbers<[1], [1], [0], [0], [0, 0, 1, 0], [], []>} : vector<8x8xf32>, vector<8x8xf32>, vector<8x8xf32> -> vector<8x8xf32>
    %c2_87 = arith.constant 2 : index
    %c0_88 = arith.constant 0 : index
    %148 = vector.load %arg8[%c2_87, %c0_88] : memref<4x8xf32, #tpu.memory_space<vmem>>, vector<1x8xf32>
    %149 = vector.broadcast %148 : vector<1x8xf32> to vector<8x8xf32>
    %150 = arith.addf %140, %149 : vector<8x8xf32>
    %cst_89 = arith.constant dense<0.000000e+00> : vector<8x16xf32>
    %151 = tpu.matmul %150, %143, %cst_89 {dimension_numbers = #tpu.dot_dimension_numbers<[1], [1], [0], [0], [0, 0, 1, 0], [], []>} : vector<8x8xf32>, vector<16x8xf32>, vector<8x16xf32> -> vector<8x16xf32>
    %152 = vector.extract_strided_slice %151 {offsets = [0, 8], sizes = [1, 8], strides = [1, 1]} : vector<8x16xf32> to vector<1x8xf32>
    %c0_90 = arith.constant 0 : index
    %c0_91 = arith.constant 0 : index
    %153 = vector.load %arg17[%c0_90, %c0_91] : memref<8x8xf32, #tpu.memory_space<vmem>>, vector<1x8xf32>
    tpu.vector_store %arg17[%c0_90, %c0_91], %152 {strides = array<i32>} : memref<8x8xf32, #tpu.memory_space<vmem>>, vector<1x8xf32>,
    %154 = vector.extract_strided_slice %151 {offsets = [1, 7], sizes = [1, 8], strides = [1, 1]} : vector<8x16xf32> to vector<1x8xf32>
    %c1_92 = arith.constant 1 : index
    %c0_93 = arith.constant 0 : index
    %155 = vector.load %arg17[%c1_92, %c0_93] : memref<8x8xf32, #tpu.memory_space<vmem>>, vector<1x8xf32>
    tpu.vector_store %arg17[%c1_92, %c0_93], %154 {strides = array<i32>} : memref<8x8xf32, #tpu.memory_space<vmem>>, vector<1x8xf32>,
    %156 = vector.extract_strided_slice %151 {offsets = [2, 6], sizes = [1, 8], strides = [1, 1]} : vector<8x16xf32> to vector<1x8xf32>
    %c2_94 = arith.constant 2 : index
    %c0_95 = arith.constant 0 : index
    %157 = vector.load %arg17[%c2_94, %c0_95] : memref<8x8xf32, #tpu.memory_space<vmem>>, vector<1x8xf32>
    tpu.vector_store %arg17[%c2_94, %c0_95], %156 {strides = array<i32>} : memref<8x8xf32, #tpu.memory_space<vmem>>, vector<1x8xf32>,
    %158 = vector.extract_strided_slice %151 {offsets = [3, 5], sizes = [1, 8], strides = [1, 1]} : vector<8x16xf32> to vector<1x8xf32>
    %c3_96 = arith.constant 3 : index
    %c0_97 = arith.constant 0 : index
    %159 = vector.load %arg17[%c3_96, %c0_97] : memref<8x8xf32, #tpu.memory_space<vmem>>, vector<1x8xf32>
    tpu.vector_store %arg17[%c3_96, %c0_97], %158 {strides = array<i32>} : memref<8x8xf32, #tpu.memory_space<vmem>>, vector<1x8xf32>,
    %160 = vector.extract_strided_slice %151 {offsets = [4, 4], sizes = [1, 8], strides = [1, 1]} : vector<8x16xf32> to vector<1x8xf32>
    %c4_98 = arith.constant 4 : index
    %c0_99 = arith.constant 0 : index
    %161 = vector.load %arg17[%c4_98, %c0_99] : memref<8x8xf32, #tpu.memory_space<vmem>>, vector<1x8xf32>
    tpu.vector_store %arg17[%c4_98, %c0_99], %160 {strides = array<i32>} : memref<8x8xf32, #tpu.memory_space<vmem>>, vector<1x8xf32>,
    %162 = vector.extract_strided_slice %151 {offsets = [5, 3], sizes = [1, 8], strides = [1, 1]} : vector<8x16xf32> to vector<1x8xf32>
    %c5_100 = arith.constant 5 : index
    %c0_101 = arith.constant 0 : index
    %163 = vector.load %arg17[%c5_100, %c0_101] : memref<8x8xf32, #tpu.memory_space<vmem>>, vector<1x8xf32>
    tpu.vector_store %arg17[%c5_100, %c0_101], %162 {strides = array<i32>} : memref<8x8xf32, #tpu.memory_space<vmem>>, vector<1x8xf32>,
    %164 = vector.extract_strided_slice %151 {offsets = [6, 2], sizes = [1, 8], strides = [1, 1]} : vector<8x16xf32> to vector<1x8xf32>
    %c6_102 = arith.constant 6 : index
    %c0_103 = arith.constant 0 : index
    %165 = vector.load %arg17[%c6_102, %c0_103] : memref<8x8xf32, #tpu.memory_space<vmem>>, vector<1x8xf32>
    tpu.vector_store %arg17[%c6_102, %c0_103], %164 {strides = array<i32>} : memref<8x8xf32, #tpu.memory_space<vmem>>, vector<1x8xf32>,
    %166 = vector.extract_strided_slice %151 {offsets = [7, 1], sizes = [1, 8], strides = [1, 1]} : vector<8x16xf32> to vector<1x8xf32>
    %c7_104 = arith.constant 7 : index
    %c0_105 = arith.constant 0 : index
    %167 = vector.load %arg17[%c7_104, %c0_105] : memref<8x8xf32, #tpu.memory_space<vmem>>, vector<1x8xf32>
    tpu.vector_store %arg17[%c7_104, %c0_105], %166 {strides = array<i32>} : memref<8x8xf32, #tpu.memory_space<vmem>>, vector<1x8xf32>,
    %c0_106 = arith.constant 0 : index
    %c0_107 = arith.constant 0 : index
    %168 = vector.load %arg17[%c0_106, %c0_107] : memref<8x8xf32, #tpu.memory_space<vmem>>, vector<8x8xf32>
    %c2_108 = arith.constant 2 : index
    %c0_109 = arith.constant 0 : index
    %169 = vector.load %arg9[%c2_108, %c0_109] : memref<4x8xf32, #tpu.memory_space<vmem>>, vector<1x8xf32>
    %170 = vector.broadcast %169 : vector<1x8xf32> to vector<8x8xf32>
    %171 = arith.addf %140, %170 : vector<8x8xf32>
    %c2_110 = arith.constant 2 : index
    %c0_111 = arith.constant 0 : index
    %c0_112 = arith.constant 0 : index
    %172 = vector.load %arg10[%c2_110, %c0_111, %c0_112] : memref<4x8x2xf32, #tpu.memory_space<vmem>>, vector<1x8x2xf32>
    %173 = vector.shape_cast %172 : vector<1x8x2xf32> to vector<8x2xf32>
    %cst_113 = arith.constant dense<0.000000e+00> : vector<8x2xf32>
    %174 = tpu.matmul %171, %173, %cst_113 {dimension_numbers = #tpu.dot_dimension_numbers<[1], [0], [0], [1], [0, 0, 1, 1], [], []>} : vector<8x8xf32>, vector<8x2xf32>, vector<8x2xf32> -> vector<8x2xf32>
    %175 = vector.extract_strided_slice %174 {offsets = [0, 0], sizes = [8, 1], strides = [1, 1]} : vector<8x2xf32> to vector<8x1xf32>
    %cst_114 = arith.constant 1.000000e+00 : f32
    %176 = vector.broadcast %cst_114 : f32 to vector<8x8xf32>
    %177 = arith.subf %176, %3 : vector<8x8xf32>
    %178 = vector.broadcast %175 : vector<8x1xf32> to vector<8x8xf32>
    %179 = arith.mulf %178, %177 : vector<8x8xf32>
    %180 = vector.extract_strided_slice %174 {offsets = [0, 1], sizes = [8, 1], strides = [1, 1]} : vector<8x2xf32> to vector<8x1xf32>
    %181 = vector.broadcast %180 : vector<8x1xf32> to vector<8x8xf32>
    %182 = arith.mulf %181, %3 : vector<8x8xf32>
    %183 = arith.addf %179, %182 : vector<8x8xf32>
    %184 = arith.addf %147, %168 : vector<8x8xf32>
    %185 = arith.addf %184, %183 : vector<8x8xf32>
    %cst_115 = arith.constant 0.353553385 : f32
    %186 = vector.broadcast %cst_115 : f32 to vector<8x8xf32>
    %187 = arith.mulf %185, %186 : vector<8x8xf32>
    %cst_116 = arith.constant 1.000000e+30 : f32
    %188 = vector.broadcast %cst_116 : f32 to vector<8x8xf32>
    %189 = arith.mulf %188, %5 : vector<8x8xf32>
    %190 = arith.subf %187, %189 : vector<8x8xf32>
    %cst_117 = arith.constant dense<0xFF800000> : vector<8xf32>
    %191 = vector.multi_reduction <maximumf>, %190, %cst_117 [1] : vector<8x8xf32> to vector<8xf32>
    %192 = vector.shape_cast %191 : vector<8xf32> to vector<8x1xf32>
    %193 = vector.broadcast %192 : vector<8x1xf32> to vector<8x8xf32>
    %194 = arith.subf %190, %193 : vector<8x8xf32>
    %195 = math.exp %194 : vector<8x8xf32>
    %cst_118 = arith.constant dense<0.000000e+00> : vector<8xf32>
    %196 = vector.multi_reduction <add>, %195, %cst_118 [1] : vector<8x8xf32> to vector<8xf32>
    %197 = vector.shape_cast %196 : vector<8xf32> to vector<8x1xf32>
    %198 = tpu.reciprocal %197 {approx = true} : vector<8x1xf32> -> vector<8x1xf32>
    %199 = vector.broadcast %198 : vector<8x1xf32> to vector<8x8xf32>
    %200 = arith.mulf %195, %199 : vector<8x8xf32>
    %cst_119 = arith.constant dense<0.000000e+00> : vector<8x8xf32>
    %201 = tpu.matmul %200, %142, %cst_119 {dimension_numbers = #tpu.dot_dimension_numbers<[1], [0], [0], [1], [0, 0, 1, 1], [], []>} : vector<8x8xf32>, vector<8x8xf32>, vector<8x8xf32> -> vector<8x8xf32>
    %c16 = arith.constant 16 : index
    %c0_120 = arith.constant 0 : index
    %202 = vector.load %arg6[%c16, %c0_120] : memref<32x32xf32, #tpu.memory_space<vmem>>, vector<8x32xf32>
    %cst_121 = arith.constant dense<0.000000e+00> : vector<8x32xf32>
    %203 = tpu.matmul %201, %202, %cst_121 {dimension_numbers = #tpu.dot_dimension_numbers<[1], [0], [0], [1], [0, 0, 1, 1], [], []>} : vector<8x8xf32>, vector<8x32xf32>, vector<8x32xf32> -> vector<8x32xf32>
    %204 = arith.addf %139, %203 : vector<8x32xf32>
    %205 = vector.extract_strided_slice %7 {offsets = [0, 24], sizes = [8, 8], strides = [1, 1]} : vector<8x128xf32> to vector<8x8xf32>
    %206 = vector.extract_strided_slice %7 {offsets = [0, 56], sizes = [8, 8], strides = [1, 1]} : vector<8x128xf32> to vector<8x8xf32>
    %207 = vector.extract_strided_slice %7 {offsets = [0, 88], sizes = [8, 8], strides = [1, 1]} : vector<8x128xf32> to vector<8x8xf32>
    %208 = vector.extract_strided_slice %10 {offsets = [0, 24], sizes = [16, 8], strides = [1, 1]} : vector<16x32xf32> to vector<16x8xf32>
    %c3_122 = arith.constant 3 : index
    %c0_123 = arith.constant 0 : index
    %209 = vector.load %arg7[%c3_122, %c0_123] : memref<4x8xf32, #tpu.memory_space<vmem>>, vector<1x8xf32>
    %210 = vector.broadcast %209 : vector<1x8xf32> to vector<8x8xf32>
    %211 = arith.addf %205, %210 : vector<8x8xf32>
    %cst_124 = arith.constant dense<0.000000e+00> : vector<8x8xf32>
    %212 = tpu.matmul %211, %206, %cst_124 {dimension_numbers = #tpu.dot_dimension_numbers<[1], [1], [0], [0], [0, 0, 1, 0], [], []>} : vector<8x8xf32>, vector<8x8xf32>, vector<8x8xf32> -> vector<8x8xf32>
    %c3_125 = arith.constant 3 : index
    %c0_126 = arith.constant 0 : index
    %213 = vector.load %arg8[%c3_125, %c0_126] : memref<4x8xf32, #tpu.memory_space<vmem>>, vector<1x8xf32>
    %214 = vector.broadcast %213 : vector<1x8xf32> to vector<8x8xf32>
    %215 = arith.addf %205, %214 : vector<8x8xf32>
    %cst_127 = arith.constant dense<0.000000e+00> : vector<8x16xf32>
    %216 = tpu.matmul %215, %208, %cst_127 {dimension_numbers = #tpu.dot_dimension_numbers<[1], [1], [0], [0], [0, 0, 1, 0], [], []>} : vector<8x8xf32>, vector<16x8xf32>, vector<8x16xf32> -> vector<8x16xf32>
    %217 = vector.extract_strided_slice %216 {offsets = [0, 8], sizes = [1, 8], strides = [1, 1]} : vector<8x16xf32> to vector<1x8xf32>
    %c0_128 = arith.constant 0 : index
    %c0_129 = arith.constant 0 : index
    %218 = vector.load %arg17[%c0_128, %c0_129] : memref<8x8xf32, #tpu.memory_space<vmem>>, vector<1x8xf32>
    tpu.vector_store %arg17[%c0_128, %c0_129], %217 {strides = array<i32>} : memref<8x8xf32, #tpu.memory_space<vmem>>, vector<1x8xf32>,
    %219 = vector.extract_strided_slice %216 {offsets = [1, 7], sizes = [1, 8], strides = [1, 1]} : vector<8x16xf32> to vector<1x8xf32>
    %c1_130 = arith.constant 1 : index
    %c0_131 = arith.constant 0 : index
    %220 = vector.load %arg17[%c1_130, %c0_131] : memref<8x8xf32, #tpu.memory_space<vmem>>, vector<1x8xf32>
    tpu.vector_store %arg17[%c1_130, %c0_131], %219 {strides = array<i32>} : memref<8x8xf32, #tpu.memory_space<vmem>>, vector<1x8xf32>,
    %221 = vector.extract_strided_slice %216 {offsets = [2, 6], sizes = [1, 8], strides = [1, 1]} : vector<8x16xf32> to vector<1x8xf32>
    %c2_132 = arith.constant 2 : index
    %c0_133 = arith.constant 0 : index
    %222 = vector.load %arg17[%c2_132, %c0_133] : memref<8x8xf32, #tpu.memory_space<vmem>>, vector<1x8xf32>
    tpu.vector_store %arg17[%c2_132, %c0_133], %221 {strides = array<i32>} : memref<8x8xf32, #tpu.memory_space<vmem>>, vector<1x8xf32>,
    %223 = vector.extract_strided_slice %216 {offsets = [3, 5], sizes = [1, 8], strides = [1, 1]} : vector<8x16xf32> to vector<1x8xf32>
    %c3_134 = arith.constant 3 : index
    %c0_135 = arith.constant 0 : index
    %224 = vector.load %arg17[%c3_134, %c0_135] : memref<8x8xf32, #tpu.memory_space<vmem>>, vector<1x8xf32>
    tpu.vector_store %arg17[%c3_134, %c0_135], %223 {strides = array<i32>} : memref<8x8xf32, #tpu.memory_space<vmem>>, vector<1x8xf32>,
    %225 = vector.extract_strided_slice %216 {offsets = [4, 4], sizes = [1, 8], strides = [1, 1]} : vector<8x16xf32> to vector<1x8xf32>
    %c4_136 = arith.constant 4 : index
    %c0_137 = arith.constant 0 : index
    %226 = vector.load %arg17[%c4_136, %c0_137] : memref<8x8xf32, #tpu.memory_space<vmem>>, vector<1x8xf32>
    tpu.vector_store %arg17[%c4_136, %c0_137], %225 {strides = array<i32>} : memref<8x8xf32, #tpu.memory_space<vmem>>, vector<1x8xf32>,
    %227 = vector.extract_strided_slice %216 {offsets = [5, 3], sizes = [1, 8], strides = [1, 1]} : vector<8x16xf32> to vector<1x8xf32>
    %c5_138 = arith.constant 5 : index
    %c0_139 = arith.constant 0 : index
    %228 = vector.load %arg17[%c5_138, %c0_139] : memref<8x8xf32, #tpu.memory_space<vmem>>, vector<1x8xf32>
    tpu.vector_store %arg17[%c5_138, %c0_139], %227 {strides = array<i32>} : memref<8x8xf32, #tpu.memory_space<vmem>>, vector<1x8xf32>,
    %229 = vector.extract_strided_slice %216 {offsets = [6, 2], sizes = [1, 8], strides = [1, 1]} : vector<8x16xf32> to vector<1x8xf32>
    %c6_140 = arith.constant 6 : index
    %c0_141 = arith.constant 0 : index
    %230 = vector.load %arg17[%c6_140, %c0_141] : memref<8x8xf32, #tpu.memory_space<vmem>>, vector<1x8xf32>
    tpu.vector_store %arg17[%c6_140, %c0_141], %229 {strides = array<i32>} : memref<8x8xf32, #tpu.memory_space<vmem>>, vector<1x8xf32>,
    %231 = vector.extract_strided_slice %216 {offsets = [7, 1], sizes = [1, 8], strides = [1, 1]} : vector<8x16xf32> to vector<1x8xf32>
    %c7_142 = arith.constant 7 : index
    %c0_143 = arith.constant 0 : index
    %232 = vector.load %arg17[%c7_142, %c0_143] : memref<8x8xf32, #tpu.memory_space<vmem>>, vector<1x8xf32>
    tpu.vector_store %arg17[%c7_142, %c0_143], %231 {strides = array<i32>} : memref<8x8xf32, #tpu.memory_space<vmem>>, vector<1x8xf32>,
    %c0_144 = arith.constant 0 : index
    %c0_145 = arith.constant 0 : index
    %233 = vector.load %arg17[%c0_144, %c0_145] : memref<8x8xf32, #tpu.memory_space<vmem>>, vector<8x8xf32>
    %c3_146 = arith.constant 3 : index
    %c0_147 = arith.constant 0 : index
    %234 = vector.load %arg9[%c3_146, %c0_147] : memref<4x8xf32, #tpu.memory_space<vmem>>, vector<1x8xf32>
    %235 = vector.broadcast %234 : vector<1x8xf32> to vector<8x8xf32>
    %236 = arith.addf %205, %235 : vector<8x8xf32>
    %c3_148 = arith.constant 3 : index
    %c0_149 = arith.constant 0 : index
    %c0_150 = arith.constant 0 : index
    %237 = vector.load %arg10[%c3_148, %c0_149, %c0_150] : memref<4x8x2xf32, #tpu.memory_space<vmem>>, vector<1x8x2xf32>
    %238 = vector.shape_cast %237 : vector<1x8x2xf32> to vector<8x2xf32>
    %cst_151 = arith.constant dense<0.000000e+00> : vector<8x2xf32>
    %239 = tpu.matmul %236, %238, %cst_151 {dimension_numbers = #tpu.dot_dimension_numbers<[1], [0], [0], [1], [0, 0, 1, 1], [], []>} : vector<8x8xf32>, vector<8x2xf32>, vector<8x2xf32> -> vector<8x2xf32>
    %240 = vector.extract_strided_slice %239 {offsets = [0, 0], sizes = [8, 1], strides = [1, 1]} : vector<8x2xf32> to vector<8x1xf32>
    %cst_152 = arith.constant 1.000000e+00 : f32
    %241 = vector.broadcast %cst_152 : f32 to vector<8x8xf32>
    %242 = arith.subf %241, %3 : vector<8x8xf32>
    %243 = vector.broadcast %240 : vector<8x1xf32> to vector<8x8xf32>
    %244 = arith.mulf %243, %242 : vector<8x8xf32>
    %245 = vector.extract_strided_slice %239 {offsets = [0, 1], sizes = [8, 1], strides = [1, 1]} : vector<8x2xf32> to vector<8x1xf32>
    %246 = vector.broadcast %245 : vector<8x1xf32> to vector<8x8xf32>
    %247 = arith.mulf %246, %3 : vector<8x8xf32>
    %248 = arith.addf %244, %247 : vector<8x8xf32>
    %249 = arith.addf %212, %233 : vector<8x8xf32>
    %250 = arith.addf %249, %248 : vector<8x8xf32>
    %cst_153 = arith.constant 0.353553385 : f32
    %251 = vector.broadcast %cst_153 : f32 to vector<8x8xf32>
    %252 = arith.mulf %250, %251 : vector<8x8xf32>
    %cst_154 = arith.constant 1.000000e+30 : f32
    %253 = vector.broadcast %cst_154 : f32 to vector<8x8xf32>
    %254 = arith.mulf %253, %5 : vector<8x8xf32>
    %255 = arith.subf %252, %254 : vector<8x8xf32>
    %cst_155 = arith.constant dense<0xFF800000> : vector<8xf32>
    %256 = vector.multi_reduction <maximumf>, %255, %cst_155 [1] : vector<8x8xf32> to vector<8xf32>
    %257 = vector.shape_cast %256 : vector<8xf32> to vector<8x1xf32>
    %258 = vector.broadcast %257 : vector<8x1xf32> to vector<8x8xf32>
    %259 = arith.subf %255, %258 : vector<8x8xf32>
    %260 = math.exp %259 : vector<8x8xf32>
    %cst_156 = arith.constant dense<0.000000e+00> : vector<8xf32>
    %261 = vector.multi_reduction <add>, %260, %cst_156 [1] : vector<8x8xf32> to vector<8xf32>
    %262 = vector.shape_cast %261 : vector<8xf32> to vector<8x1xf32>
    %263 = tpu.reciprocal %262 {approx = true} : vector<8x1xf32> -> vector<8x1xf32>
    %264 = vector.broadcast %263 : vector<8x1xf32> to vector<8x8xf32>
    %265 = arith.mulf %260, %264 : vector<8x8xf32>
    %cst_157 = arith.constant dense<0.000000e+00> : vector<8x8xf32>
    %266 = tpu.matmul %265, %207, %cst_157 {dimension_numbers = #tpu.dot_dimension_numbers<[1], [0], [0], [1], [0, 0, 1, 1], [], []>} : vector<8x8xf32>, vector<8x8xf32>, vector<8x8xf32> -> vector<8x8xf32>
    %c24 = arith.constant 24 : index
    %c0_158 = arith.constant 0 : index
    %267 = vector.load %arg6[%c24, %c0_158] : memref<32x32xf32, #tpu.memory_space<vmem>>, vector<8x32xf32>
    %cst_159 = arith.constant dense<0.000000e+00> : vector<8x32xf32>
    %268 = tpu.matmul %266, %267, %cst_159 {dimension_numbers = #tpu.dot_dimension_numbers<[1], [0], [0], [1], [0, 0, 1, 1], [], []>} : vector<8x8xf32>, vector<8x32xf32>, vector<8x32xf32> -> vector<8x32xf32>
    %269 = arith.addf %204, %268 : vector<8x32xf32>
    %270 = arith.addf %269, %1 : vector<8x32xf32>
    %c0_160 = arith.constant 0 : index
    %c0_161 = arith.constant 0 : index
    %271 = vector.load %arg11[%c0_160, %c0_161] : memref<4x32xf32, #tpu.memory_space<vmem>>, vector<1x32xf32>
    %c1_162 = arith.constant 1 : index
    %c0_163 = arith.constant 0 : index
    %272 = vector.load %arg11[%c1_162, %c0_163] : memref<4x32xf32, #tpu.memory_space<vmem>>, vector<1x32xf32>
    %cst_164 = arith.constant dense<0.000000e+00> : vector<8xf32>
    %273 = vector.multi_reduction <add>, %270, %cst_164 [1] : vector<8x32xf32> to vector<8xf32>
    %274 = vector.shape_cast %273 : vector<8xf32> to vector<8x1xf32>
    %cst_165 = arith.constant 3.200000e+01 : f32
    %275 = vector.broadcast %cst_165 : f32 to vector<8x1xf32>
    %276 = arith.divf %274, %275 : vector<8x1xf32>
    %277 = vector.broadcast %276 : vector<8x1xf32> to vector<8x32xf32>
    %278 = arith.subf %270, %277 : vector<8x32xf32>
    %279 = arith.mulf %278, %278 : vector<8x32xf32>
    %cst_166 = arith.constant dense<0.000000e+00> : vector<8xf32>
    %280 = vector.multi_reduction <add>, %279, %cst_166 [1] : vector<8x32xf32> to vector<8xf32>
    %281 = vector.shape_cast %280 : vector<8xf32> to vector<8x1xf32>
    %cst_167 = arith.constant 3.200000e+01 : f32
    %282 = vector.broadcast %cst_167 : f32 to vector<8x1xf32>
    %283 = arith.divf %281, %282 : vector<8x1xf32>
    %284 = vector.broadcast %276 : vector<8x1xf32> to vector<8x32xf32>
    %285 = arith.subf %270, %284 : vector<8x32xf32>
    %cst_168 = arith.constant 9.99999996E-13 : f32
    %286 = vector.broadcast %cst_168 : f32 to vector<8x1xf32>
    %287 = arith.addf %283, %286 : vector<8x1xf32>
    %288 = math.rsqrt %287 : vector<8x1xf32>
    %289 = vector.broadcast %288 : vector<8x1xf32> to vector<8x32xf32>
    %290 = arith.mulf %285, %289 : vector<8x32xf32>
    %291 = vector.broadcast %271 : vector<1x32xf32> to vector<8x32xf32>
    %292 = arith.mulf %290, %291 : vector<8x32xf32>
    %293 = vector.broadcast %272 : vector<1x32xf32> to vector<8x32xf32>
    %294 = arith.addf %292, %293 : vector<8x32xf32>
    %c0_169 = arith.constant 0 : index
    %c0_170 = arith.constant 0 : index
    %295 = vector.load %arg12[%c0_169, %c0_170] : memref<32x64xf32, #tpu.memory_space<vmem>>, vector<32x64xf32>
    %cst_171 = arith.constant dense<0.000000e+00> : vector<8x64xf32>
    %296 = tpu.matmul %294, %295, %cst_171 {dimension_numbers = #tpu.dot_dimension_numbers<[1], [0], [0], [1], [0, 0, 1, 1], [], []>} : vector<8x32xf32>, vector<32x64xf32>, vector<8x64xf32> -> vector<8x64xf32>
    %c0_172 = arith.constant 0 : index
    %c0_173 = arith.constant 0 : index
    %297 = vector.load %arg13[%c0_172, %c0_173] : memref<1x64xf32, #tpu.memory_space<vmem>>, vector<1x64xf32>
    %298 = vector.broadcast %297 : vector<1x64xf32> to vector<8x64xf32>
    %299 = arith.addf %296, %298 : vector<8x64xf32>
    %cst_174 = arith.constant 5.000000e-01 : f32
    %300 = vector.broadcast %cst_174 : f32 to vector<8x64xf32>
    %301 = arith.mulf %300, %299 : vector<8x64xf32>
    %cst_175 = arith.constant 4.471500e-02 : f32
    %302 = vector.broadcast %cst_175 : f32 to vector<8x64xf32>
    %303 = arith.mulf %302, %299 : vector<8x64xf32>
    %304 = arith.mulf %303, %299 : vector<8x64xf32>
    %305 = arith.mulf %304, %299 : vector<8x64xf32>
    %306 = arith.addf %299, %305 : vector<8x64xf32>
    %cst_176 = arith.constant 0.797884583 : f32
    %307 = vector.broadcast %cst_176 : f32 to vector<8x64xf32>
    %308 = arith.mulf %307, %306 : vector<8x64xf32>
    %309 = math.tanh %308 : vector<8x64xf32>
    %cst_177 = arith.constant 1.000000e+00 : f32
    %310 = vector.broadcast %cst_177 : f32 to vector<8x64xf32>
    %311 = arith.addf %310, %309 : vector<8x64xf32>
    %312 = arith.mulf %301, %311 : vector<8x64xf32>
    %c0_178 = arith.constant 0 : index
    %c0_179 = arith.constant 0 : index
    %313 = vector.load %arg14[%c0_178, %c0_179] : memref<64x32xf32, #tpu.memory_space<vmem>>, vector<64x32xf32>
    %cst_180 = arith.constant dense<0.000000e+00> : vector<8x32xf32>
    %314 = tpu.matmul %312, %313, %cst_180 {dimension_numbers = #tpu.dot_dimension_numbers<[1], [0], [0], [1], [0, 0, 1, 1], [], []>} : vector<8x64xf32>, vector<64x32xf32>, vector<8x32xf32> -> vector<8x32xf32>
    %c0_181 = arith.constant 0 : index
    %c0_182 = arith.constant 0 : index
    %315 = vector.load %arg15[%c0_181, %c0_182] : memref<1x32xf32, #tpu.memory_space<vmem>>, vector<1x32xf32>
    %316 = vector.broadcast %315 : vector<1x32xf32> to vector<8x32xf32>
    %317 = arith.addf %314, %316 : vector<8x32xf32>
    %318 = arith.addf %317, %294 : vector<8x32xf32>
    %c2_183 = arith.constant 2 : index
    %c0_184 = arith.constant 0 : index
    %319 = vector.load %arg11[%c2_183, %c0_184] : memref<4x32xf32, #tpu.memory_space<vmem>>, vector<1x32xf32>
    %c3_185 = arith.constant 3 : index
    %c0_186 = arith.constant 0 : index
    %320 = vector.load %arg11[%c3_185, %c0_186] : memref<4x32xf32, #tpu.memory_space<vmem>>, vector<1x32xf32>
    %cst_187 = arith.constant dense<0.000000e+00> : vector<8xf32>
    %321 = vector.multi_reduction <add>, %318, %cst_187 [1] : vector<8x32xf32> to vector<8xf32>
    %322 = vector.shape_cast %321 : vector<8xf32> to vector<8x1xf32>
    %cst_188 = arith.constant 3.200000e+01 : f32
    %323 = vector.broadcast %cst_188 : f32 to vector<8x1xf32>
    %324 = arith.divf %322, %323 : vector<8x1xf32>
    %325 = vector.broadcast %324 : vector<8x1xf32> to vector<8x32xf32>
    %326 = arith.subf %318, %325 : vector<8x32xf32>
    %327 = arith.mulf %326, %326 : vector<8x32xf32>
    %cst_189 = arith.constant dense<0.000000e+00> : vector<8xf32>
    %328 = vector.multi_reduction <add>, %327, %cst_189 [1] : vector<8x32xf32> to vector<8xf32>
    %329 = vector.shape_cast %328 : vector<8xf32> to vector<8x1xf32>
    %cst_190 = arith.constant 3.200000e+01 : f32
    %330 = vector.broadcast %cst_190 : f32 to vector<8x1xf32>
    %331 = arith.divf %329, %330 : vector<8x1xf32>
    %332 = vector.broadcast %324 : vector<8x1xf32> to vector<8x32xf32>
    %333 = arith.subf %318, %332 : vector<8x32xf32>
    %cst_191 = arith.constant 9.99999996E-13 : f32
    %334 = vector.broadcast %cst_191 : f32 to vector<8x1xf32>
    %335 = arith.addf %331, %334 : vector<8x1xf32>
    %336 = math.rsqrt %335 : vector<8x1xf32>
    %337 = vector.broadcast %336 : vector<8x1xf32> to vector<8x32xf32>
    %338 = arith.mulf %333, %337 : vector<8x32xf32>
    %339 = vector.broadcast %319 : vector<1x32xf32> to vector<8x32xf32>
    %340 = arith.mulf %338, %339 : vector<8x32xf32>
    %341 = vector.broadcast %320 : vector<1x32xf32> to vector<8x32xf32>
    %342 = arith.addf %340, %341 : vector<8x32xf32>
    %c0_192 = arith.constant 0 : index
    %c0_193 = arith.constant 0 : index
    %c0_194 = arith.constant 0 : index
    %343 = vector.load %arg16[%c0_192, %c0_193, %c0_194] : memref<1x8x32xf32, #tpu.memory_space<vmem>>, vector<1x8x32xf32>
    %344 = vector.shape_cast %343 : vector<1x8x32xf32> to vector<8x32xf32>
    %345 = vector.shape_cast %342 : vector<8x32xf32> to vector<1x8x32xf32>
    tpu.vector_store %arg16[%c0_192, %c0_193, %c0_194], %345 {strides = array<i32>} : memref<1x8x32xf32, #tpu.memory_space<vmem>>, vector<1x8x32xf32>,
    return
  }
  func.func @transform_0(%arg0: i32) -> (i32, i32, i32) {
    %c0_i32 = arith.constant 0 : i32
    %c0_i32_0 = arith.constant 0 : i32
    %c0_i32_1 = arith.constant 0 : i32
    return %arg0, %c0_i32, %c0_i32_0 : i32, i32, i32
  }
  func.func @transform_1(%arg0: i32) -> (i32, i32) {
    %c0_i32 = arith.constant 0 : i32
    %c0_i32_0 = arith.constant 0 : i32
    %c0_i32_1 = arith.constant 0 : i32
    return %c0_i32, %c0_i32_0 : i32, i32
  }
  func.func @transform_2(%arg0: i32) -> (i32, i32, i32) {
    %c0_i32 = arith.constant 0 : i32
    %c0_i32_0 = arith.constant 0 : i32
    %c0_i32_1 = arith.constant 0 : i32
    return %arg0, %c0_i32, %c0_i32_0 : i32, i32, i32
  }
  func.func @transform_3(%arg0: i32) -> (i32, i32, i32) {
    %c0_i32 = arith.constant 0 : i32
    %c0_i32_0 = arith.constant 0 : i32
    %c0_i32_1 = arith.constant 0 : i32
    return %arg0, %c0_i32, %c0_i32_0 : i32, i32, i32
  }
  func.func @transform_4(%arg0: i32) -> (i32, i32) {
    %c0_i32 = arith.constant 0 : i32
    %c0_i32_0 = arith.constant 0 : i32
    %c0_i32_1 = arith.constant 0 : i32
    return %c0_i32, %c0_i32_0 : i32, i32
  }
  func.func @transform_5(%arg0: i32) -> (i32, i32) {
    %c0_i32 = arith.constant 0 : i32
    %c0_i32_0 = arith.constant 0 : i32
    %c0_i32_1 = arith.constant 0 : i32
    return %c0_i32, %c0_i32_0 : i32, i32
  }
  func.func @transform_6(%arg0: i32) -> (i32, i32) {
    %c0_i32 = arith.constant 0 : i32
    %c0_i32_0 = arith.constant 0 : i32
    %c0_i32_1 = arith.constant 0 : i32
    return %c0_i32, %c0_i32_0 : i32, i32
  }
  func.func @transform_7(%arg0: i32) -> (i32, i32) {
    %c0_i32 = arith.constant 0 : i32
    %c0_i32_0 = arith.constant 0 : i32
    %c0_i32_1 = arith.constant 0 : i32
    return %c0_i32, %c0_i32_0 : i32, i32
  }
  func.func @transform_8(%arg0: i32) -> (i32, i32) {
    %c0_i32 = arith.constant 0 : i32
    %c0_i32_0 = arith.constant 0 : i32
    %c0_i32_1 = arith.constant 0 : i32
    return %c0_i32, %c0_i32_0 : i32, i32
  }
  func.func @transform_9(%arg0: i32) -> (i32, i32, i32) {
    %c0_i32 = arith.constant 0 : i32
    %c0_i32_0 = arith.constant 0 : i32
    %c0_i32_1 = arith.constant 0 : i32
    %c0_i32_2 = arith.constant 0 : i32
    return %c0_i32, %c0_i32_0, %c0_i32_1 : i32, i32, i32
  }
  func.func @transform_10(%arg0: i32) -> (i32, i32) {
    %c0_i32 = arith.constant 0 : i32
    %c0_i32_0 = arith.constant 0 : i32
    %c0_i32_1 = arith.constant 0 : i32
    return %c0_i32, %c0_i32_0 : i32, i32
  }
  func.func @transform_11(%arg0: i32) -> (i32, i32) {
    %c0_i32 = arith.constant 0 : i32
    %c0_i32_0 = arith.constant 0 : i32
    %c0_i32_1 = arith.constant 0 : i32
    return %c0_i32, %c0_i32_0 : i32, i32
  }
  func.func @transform_12(%arg0: i32) -> (i32, i32) {
    %c0_i32 = arith.constant 0 : i32
    %c0_i32_0 = arith.constant 0 : i32
    %c0_i32_1 = arith.constant 0 : i32
    return %c0_i32, %c0_i32_0 : i32, i32
  }
  func.func @transform_13(%arg0: i32) -> (i32, i32) {
    %c0_i32 = arith.constant 0 : i32
    %c0_i32_0 = arith.constant 0 : i32
    %c0_i32_1 = arith.constant 0 : i32
    return %c0_i32, %c0_i32_0 : i32, i32
  }
  func.func @transform_14(%arg0: i32) -> (i32, i32) {
    %c0_i32 = arith.constant 0 : i32
    %c0_i32_0 = arith.constant 0 : i32
    %c0_i32_1 = arith.constant 0 : i32
    return %c0_i32, %c0_i32_0 : i32, i32
  }
  func.func @transform_15(%arg0: i32) -> (i32, i32, i32) {
    %c0_i32 = arith.constant 0 : i32
    %c0_i32_0 = arith.constant 0 : i32
    %c0_i32_1 = arith.constant 0 : i32
    return %arg0, %c0_i32, %c0_i32_0 : i32, i32, i32
  }
}

</mosaic_0001>

<bundles_post_ra>
// kernel: xlnet_embedder_forward.2
= control target key start
LH: loop header
LB: loop body
LE: loop exit
PB: predicated region body
PF: predicated region fallthrough
CT: control target
= control target key end

     0   :  { %s3474_s18 = smov 0   ;;  %s3899_s0 = inlined_call_operand.vmem [shape: f32[2,8,32], index: 0, kind: input, shape index: {}]   ;;  %s3900_s1 = inlined_call_operand.vmem [shape: f32[16,32], index: 1, kind: input, shape index: {}]   ;;  %s3901_s2 = inlined_call_operand.vmem [shape: f32[2,8,8], index: 2, kind: input, shape index: {}]   ;;  %s3902_s3 = inlined_call_operand.vmem [shape: f32[2,8,8], index: 3, kind: input, shape index: {}]   ;;  %s3903_s4 = inlined_call_operand.vmem [shape: f32[32,128], index: 4, kind: input, shape index: {}]   ;;  %s3904_s5 = inlined_call_operand.vmem [shape: f32[32,32], index: 5, kind: input, shape index: {}]   ;;  %s3905_s6 = inlined_call_operand.vmem [shape: f32[4,8], index: 6, kind: input, shape index: {}]   ;;  %s3906_s7 = inlined_call_operand.vmem [shape: f32[4,8], index: 7, kind: input, shape index: {}]   ;;  %s3907_s8 = inlined_call_operand.vmem [shape: f32[4,8], index: 8, kind: input, shape index: {}]   ;;  %s3908_s9 = inlined_call_operand.vmem [shape: f32[4,8,2], index: 9, kind: input, shape index: {}]   ;;  %s3909_s10 = inlined_call_operand.vmem [shape: f32[4,32], index: 10, kind: input, shape index: {}]   ;;  %s3910_s11 = inlined_call_operand.vmem [shape: f32[32,64], index: 11, kind: input, shape index: {}]   ;;  %s3911_s12 = inlined_call_operand.vmem [shape: f32[1,64], index: 12, kind: input, shape index: {}]   ;;  %s3912_s13 = inlined_call_operand.vmem [shape: f32[64,32], index: 13, kind: input, shape index: {}]   ;;  %s3913_s14 = inlined_call_operand.vmem [shape: f32[1,32], index: 14, kind: input, shape index: {}]   ;;  %s3914_s15 = inlined_call_operand.vmem [shape: f32[2,8,32], index: 15, kind: output, shape index: {}]  }
   0x1 LB: > { %s2926_s19 = sadd.s32 4294967295, %s3365_s18   ;;  %p2930_p0 = scmp.ge.s32.totalorder %s3365_s18, 1  ;;  %s3365_s18 = sphi %s3474_s18, %s25_s18  }
   0x2   : > { %p454_p1 = scmp.lt.s32.totalorder %s3365_s18, 3 }
   0x4   : > { %p455_p2 = pnand %p2930_p0, %p454_p1 }
   0x5   : > { %v527_v0 = vld [vmem:[%s3903_s4] sm:$0xff] (!%p455_p2)  ;;  %v528_v1 = vld [vmem:[%s3903_s4 + $0x8] sm:$0xff] (!%p455_p2)  ;;  %v529_v2 = vld [vmem:[%s3903_s4 + $0x10] sm:$0xff] (!%p455_p2)  ;;  %v3367_v5 = vmov (!%p455_p2), 0.0|0.0   ;;  %p508_p3 = scmp.lt.s32.totalorder (!%p455_p2), %s2926_s19, 1  ;;  %vm531_vm0 = vcmask (!%p455_p2), 261120  }
   0x6   : > { %458 = sbr.rel (%p455_p2) target bundleno = 5017 (0x1399), region = 80  ;;  %v3307_v3 = vpack.i.bf16 (!%p455_p2), %v528_v1, %v527_v0  ;;  %v530_v4 = vld [vmem:[%s3903_s4 + $0x18] sm:$0xff] (!%p455_p2)  ;;  %3224 = vmatprep.subr.bf16.mxu0 (!%p455_p2), %v3367_v5  ;;  %v3225_v6 = vpack.c.bf16 (!%p455_p2), %v528_v1, %v527_v0  ;;  %v605_v7 = vld [vmem:[%s3900_s1] sm:$0xff] (!%p455_p2)  ;;  %vm3368_vm1 = vmmov (!%p455_p2), 0   ;;  %v3369_v8 = vmov (!%p455_p2), 0.0   ;;  %s3370_s30 = smov (!%p455_p2), 32  }
   0x7   : > { %3072 = vmatprep.mubr.msk.f32.mxu0 (!%p455_p2), %vm3368_vm1, %v3369_v8  ;;  %3083 = vmatprep.mubr.msk.f32.mxu1 (!%p455_p2), %vm531_vm0, %v605_v7  ;;  %v3312_v9 = vpack.i.bf16 (!%p455_p2), %v530_v4, %v529_v2  ;;  %v3228_v10 = vpack.c.bf16 (!%p455_p2), %v530_v4, %v529_v2  ;;  %v606_v20 = vld [vmem:[%s3900_s1 + $0x8] sm:$0xff] (!%p455_p2)  ;;  %s3371_s23 = smov (!%p455_p2), 96   ;;  %v2938_v23 = vld [vmem:[%s3905_s6] ss:$0 sm:$0xff] (!%p455_p2)  ;;  %vm716_vm2 = vcmask (!%p455_p2), 64512   ;;  %v3372_v36 = vmov (!%p455_p2), 1  }
   0x8   : > { %3308 = vrot.lane.b32.xlu0 (!%p455_p2), %v3307_v3, %s3370_s30  ;;  %3226 = vmatpush3.bf16.msra.mxu0 (!%p455_p2), %v3225_v6  ;;  %vm3536_vm3 = vmpackc.low (!%p455_p2), %vm716_vm2, %vm716_vm2  ;;  %v2939_v31 = vld [vmem:[%s3906_s7] ss:$0 sm:$0xff] (!%p455_p2)  ;;  %v3373_v37 = vmov (!%p455_p2), 0   ;;  %s3923_s20 = smov (!%p455_p2), 122   ;;  %s3927_s22 = smov (!%p455_p2), 121   ;;  %vm810_vm4 = vcmask (!%p455_p2), 59394  }
   0x9   : > { %3227 = vmatprep.subr.bf16.mxu0 (!%p455_p2), %v3367_v5  ;;  %v844_v33 = vld [vmem:[%s3908_s9] sm:$0xff] (!%p455_p2)  ;;  %3318 = vset.pattern.permute.xlu0 (!%p455_p2), %v3372_v36  ;;  %s3921_s24 = smov (!%p455_p2), 125   ;;  %s3915_s25 = smov (!%p455_p2), 126   ;;  %vm800_vm5 = vcmask (!%p455_p2), 57344   ;;  %vm820_vm6 = vcmask (!%p455_p2), 61444   ;;  %vm805_vm7 = vcmask (!%p455_p2), 58369  }
   0xa   : > { %v2943_v34 = vld [vmem:[%s3907_s8] ss:$0 sm:$0xff] (!%p455_p2)  ;;  %3317 = vset.pattern.permute.xlu1 (!%p455_p2), %v3373_v37  ;;  %s3917_s26 = smov (!%p455_p2), 127   ;;  %v2953_v44 = vld [vmem:[%s3907_s8 + $0x1] ss:$0 sm:$0xff] (!%p455_p2)  ;;  %s3382_s29 = smov (!%p455_p2), 8  }
   0xb   : > { %v2949_v45 = vld [vmem:[%s3906_s7 + $0x1] ss:$0 sm:$0xff] (!%p455_p2)  ;;  %vm815_vm8 = vcmask (!%p455_p2), 60419   ;;  %vm825_vm9 = vcmask (!%p455_p2), 62469   ;;  %vm830_vm10 = vcmask (!%p455_p2), 63494   ;;  %vm835_vm11 = vcmask (!%p455_p2), 64519  }
   0xc   : > { %3313 = vrot.lane.b32.xlu0 (!%p455_p2), %v3312_v9, %s3370_s30  ;;  %3229 = vmatpush3.bf16.msra.mxu0 (!%p455_p2), %v3228_v10  ;;  %s3384_s27 = smov (!%p455_p2), 88   ;;  %s3930_s17 = smov (!%p455_p2), 127   ;;  %vm2748_vm12 = vcmask (!%p455_p2), 523264  }
   0xd   : > { %s3939_s19 = smov (!%p508_p3, %s2926_s19), 1  ;;  %3238 = vmatprep.subr.bf16.mxu0 %v3367_v5  ;;  %s3934_s28 = smov 124  }
   0xe   : > { %s3502_s16 = sshll.u32 %s3939_s19, 3  ;;  %s3919_s19 = smov 124  }
   0xf   : > { %s511_s21 = scalar_lea.vmem %s3899_s0, %s3502_s16  ;;  %s515_s30 = scalar_lea.vmem %s3901_s2, %s3502_s16 }
  0x10   : > { %v3508_v11 = vld [vmem:[%s511_s21] sm:$0xff]  ;;  %s3926_s21 = smov 120  }
  0x11   : > { %3073 = vmatmul.mubr.msk.f32.vlgmr.msra.gmra.mrb[0].mxu0 %vm531_vm0, %v3508_v11  ;;  %v3594_v55 = vld [vmem:[%s515_s30] sm:$0xff]  ;;  %s3936_s30 = smov 120  }
  0x12   : > { %3090 = vmatprep.mubr.msk.f32.mxu0 %vm3368_vm1, %v3369_v8  ;;  %v3597_v57 = vsub.f32 1.0, %v3594_v55 }
  0x7a   : > { %v3309_v12 = vpop.permute.xlu0 %3308 }
  0x7b   : > { %v3311_v13 = vunpack.i.h.bf16 %v3309_v12  ;;  %v3310_v14 = vunpack.i.l.bf16 %v3309_v12  ;;  %v2948_v12 = vld [vmem:[%s3905_s6 + $0x1] ss:$0 sm:$0xff] }
  0x7d   : > { %v3230_v15 = vpack.c.bf16 %v3311_v13, %v3310_v14 }
  0x7e   : > { %v3314_v16 = vpop.permute.xlu0 %3313 }
  0x7f   : > { %v3316_v17 = vunpack.i.h.bf16 %v3314_v16  ;;  %v3315_v18 = vunpack.i.l.bf16 %v3314_v16  ;;  %3231 = vmatprep.subr.bf16.mxu1 %v3230_v15 }
  0x80   : > { %3233 = vmatpush3.bf16.msra.mxu1 %v3230_v15 }
  0x81   : > { %v3234_v19 = vpack.c.bf16 %v3316_v17, %v3315_v18 }
  0x83   : > { %3235 = vmatprep.subr.bf16.mxu1 %v3234_v19 }
  0x84   : > { %3237 = vmatpush3.bf16.msra.mxu1 %v3234_v19 }
  0x85   : > { %3098 = vmatprep.subr.mxu1 %v3369_v8 }
  0x87   : > { %3084 = vmatmul.mubr.msk.f32.vlgmr.msra.gmra.mrb[0].mxu1 %vm531_vm0, %v606_v20 }
  0x88   : > { %3100 = vmatprep.mubr.msk.f32.mxu1 %vm3368_vm1, %v3369_v8 }
  0xe4   : > { %v3522_v21 = vpop.f32.mrb[0].mxu0 }
  0xe5   : > { %932 = vrot.lane.b32.xlu1 %v3522_v21, %s3371_s23  ;;  %v3074_v22 = vpop.f32.mrb[1].mxu0  ;;  %v709_v25 = vadd.f32 %v2938_v23, %v3522_v21  ;;  %v715_v32 = vadd.f32 %v2939_v31, %v3522_v21  ;;  %v843_v35 = vadd.f32 %v2943_v34, %v3522_v21  ;;  %s3925_s23 = smov 123  }
 0x157   : > { %v933_v24 = vpop.permute.xlu1 %932 }
 0x158   : > { %3099 = vmatpush3.xpose.msk.msra.mxu1 %vm716_vm2, %v933_v24 }
 0x159   : > { %3242 = vmatprep.subr.bf16.mxu1 %v3367_v5 }
 0x15a   : > { %v3085_v26 = vpop.f32.mrb[0].mxu1 }
 0x15b   : > { %3101 = vmatmul.mubr.msk.f32.vlgmr.msra.gmra.mrb[2].mxu1 %vm716_vm2, %v709_v25  ;;  %v695_v27 = vpop.f32.mrb[1].mxu1 }
 0x15c   : > { %3112 = vmatprep.mubr.msk.f32.mxu1 %vm3368_vm1, %v3369_v8  ;;  %v3239_v29 = vpack.c.bf16 %v3085_v26, %v695_v27  ;;  %v3540_v30 = vpack.i.bf16 %v3085_v26, %v695_v27 }
 0x15e   : > { %3241 = vmatpush3.bf16.xpose.msk.msra.mxu0 %vm3536_vm3, %v3239_v29 }
 0x15f   : > { %3093 = vmatprep.subr.mxu0 %v3369_v8 }
 0x165   : > { %3091 = vmatmul.mubr.msk.f32.vlgmr.msra.gmra.mrb[2].mxu0 %vm716_vm2, %v715_v32 }
 0x166   : > { %3094 = vmatpush3.msra.mxu0 %v844_v33  ;;  %3095 = vmatprep.mubr.msk.f32.mxu0 %vm3368_vm1, %v3369_v8  ;;  %v2954_v33 = vld [vmem:[%s3908_s9 + $0x8] sm:$0xff] }
 0x167   : > { %3103 = vmatprep.subr.mxu0 %v3369_v8 }
 0x169   : > { %3096 = vmatmul.mubr.msk.f32.vlgmr.msra.gmra.mrb[4].mxu0 %vm716_vm2, %v843_v35 }
 0x16a   : > { %3105 = vmatprep.mubr.msk.f32.mxu0 %vm3368_vm1, %v3369_v8 }
 0x22e   : > { %v3565_v38 = vpop.f32.mrb[2].mxu1 }
 0x22f   : > { %v3102_v39 = vpop.f32.mrb[3].mxu1 }
 0x238   : > { %v792_v40 = vpop.f32.mrb[2].mxu0 }
 0x239   : > { %807 = vrot.lane.b32.xlu0 %v792_v40, %s3923_s20  ;;  %797 = vrot.lane.b32.xlu1 %v792_v40, %s3926_s21  ;;  %v3092_v41 = vpop.f32.mrb[3].mxu0 }
 0x23c   : > { %v914_v42 = vpop.f32.mrb[4].mxu0 }
 0x23d   : > { %817 = vrot.lane.b32.xlu0 %v792_v40, %s3919_s19  ;;  %802 = vrot.lane.b32.xlu1 %v792_v40, %s3927_s22  ;;  %v3097_v43 = vpop.f32.mrb[5].mxu0 }
 0x241   : > { %812 = vrot.lane.b32.xlu1 %v792_v40, %s3925_s23  ;;  %926 = vperm.xlu0 %3318, %v914_v42  }
 0x245   : > { %822 = vrot.lane.b32.xlu1 %v792_v40, %s3921_s24  ;;  %827 = vrot.lane.b32.xlu0 %v792_v40, %s3915_s25  ;;  %s3931_s25 = smov 126  }
 0x249   : > { %921 = vperm.xlu1 %3317, %v914_v42  }
 0x24d   : > { %832 = vrot.lane.b32.xlu1 %v792_v40, %s3917_s26  ;;  %s519_s26 = scalar_lea.vmem %s3902_s3, %s3502_s16 }
 0x24e   : > { %v526_v61 = vld [vmem:[%s519_s26] sm:$0xff]  ;;  %s3387_s26 = smov 56  }
 0x24f   : > { %v3607_v1 = vmul.f32 1e+30, %v526_v61 }
 0x251   : > { %1244 = vrot.lane.b32.xlu1 %v2953_v44, %s3382_s29 }
 0x255   : > { %1117 = vrot.lane.b32.xlu1 %v2949_v45, %s3382_s29 }
 0x2ab   : > { %v808_v46 = vpop.permute.xlu0 %807  ;;  %v798_v47 = vpop.permute.xlu1 %797 }
 0x2ac   : > { %811 = vst.msk [vmem:[#allocation2] sm:$0x4] %vm810_vm4, %v808_v46 }
 0x2ad   : > { %801 = vst.msk [vmem:[#allocation2] sm:$0x1] %vm800_vm5, %v798_v47 }
 0x2af   : > { %v818_v48 = vpop.permute.xlu0 %817  ;;  %v803_v49 = vpop.permute.xlu1 %802 }
 0x2b0   : > { %821 = vst.msk [vmem:[#allocation2] sm:$0x10] %vm820_vm6, %v818_v48 }
 0x2b1   : > { %806 = vst.msk [vmem:[#allocation2] sm:$0x2] %vm805_vm7, %v803_v49 }
 0x2b3   : > { %v813_v50 = vpop.permute.xlu1 %812 }
 0x2b4   : > { %816 = vst.msk [vmem:[#allocation2] sm:$0x8] %vm815_vm8, %v813_v50 }
 0x2b7   : > { %v823_v51 = vpop.permute.xlu1 %822 }
 0x2b8   : > { %826 = vst.msk [vmem:[#allocation2] sm:$0x20] %vm825_vm9, %v823_v51 }
 0x2c0   : > { %v927_v52 = vpop.permute.xlu0 %926 }
 0x2c1   : > { %v929_v59 = vmul.f32 %v927_v52, %v3594_v55 }
 0x2c4   : > { %v828_v53 = vpop.permute.xlu0 %827 }
 0x2c5   : > { %831 = vst.msk [vmem:[#allocation2] sm:$0x40] %vm830_vm10, %v828_v53 }
 0x2c8   : > { %v922_v54 = vpop.permute.xlu1 %921 }
 0x2c9   : > { %v924_v58 = vmul.f32 %v922_v54, %v3597_v57 }
 0x2cb   : > { %v930_v62 = vadd.f32 %v929_v59, %v924_v58 }
 0x2cc   : > { %v833_v56 = vpop.permute.xlu1 %832 }
 0x2cd   : > { %836 = vst.msk [vmem:[#allocation2] sm:$0x80] %vm835_vm11, %v833_v56 }
 0x2d0   : > { %v1245_v6 = vpop.permute.xlu1 %1244 }
 0x2d1   : > { %v1247_v7 = vadd.f32 %v1245_v6, %v3522_v21 }
 0x2d4   : > { %v837_v60 = vld [vmem:[#allocation2] sm:$0xff]  ;;  %v1118_v9 = vpop.permute.xlu1 %1117 }
 0x2d5   : > { %v1006_v63 = vadd.f32 %v3565_v38, %v837_v60  ;;  %v1120_v10 = vadd.f32 %v1118_v9, %v3522_v21 }
 0x2d7   : > { %v1009_v0 = vadd.f32 %v1006_v63, %v930_v62 }
 0x2d9   : > { %v1010_v2 = vmul.f32 0.35355338, %v1009_v0 }
 0x2db   : > { %v1012_v3 = vsub.f32 %v1010_v2, %v3607_v1 }
 0x2dd   : > { %v1013_v4 = vsel %vm716_vm2, %v1012_v3, -inf }
 0x2de   : > { %1014 = vmax.xlane.f32.xlu0 %v1013_v4  ;;  %v2962_v4 = vld [vmem:[%s3906_s7 + $0x2] ss:$0 sm:$0xff] }
 0x2f4   : > { %3320 = vrot.lane.b32.xlu0 %v3540_v30, %s3926_s21 }
 0x2f8   : > { %1251 = vrot.lane.b32.xlu0 %v1247_v7, %s3926_s21 }
 0x2fc   : > { %1122 = vrot.lane.b32.xlu0 %v1120_v10, %s3926_s21 }
 0x300   : > { %1107 = vrot.lane.b32.xlu0 %v2948_v12, %s3382_s29  ;;  %s3383_s29 = smov 64  }
 0x36b   : > { %v1015_v13 = vpop.xlane.xlu0 %1014 }
 0x36c   : > { %v1016_v14 = vsub.f32 %v1012_v3, %v1015_v13  ;;  %v2966_v3 = vld [vmem:[%s3907_s8 + $0x2] ss:$0 sm:$0xff] }
 0x36d   : > { %v2961_v13 = vld [vmem:[%s3905_s6 + $0x2] ss:$0 sm:$0xff] }
 0x36e   : > { %v1017_v15 = vmul.f32 1.442695, %v1016_v14 }
 0x36f   : > { %v3321_v16 = vpop.permute.xlu0 %3320 }
 0x370   : > { %3337 = vpow2.f32 %v1017_v15  ;;  %v3323_v17 = vunpack.i.h.bf16 %v3321_v16  ;;  %v3322_v18 = vunpack.i.l.bf16 %v3321_v16 }
 0x372   : > { %v3243_v19 = vpack.c.bf16 %v3323_v17, %v3322_v18  ;;  %v1506_v18 = vld [vmem:[%s3904_s5 + $0x8] sm:$0xff] }
 0x373   : > { %v1252_v20 = vpop.permute.xlu0 %1251 }
 0x374   : > { %3245 = vmatpush3.bf16.xpose.msk.msra.mxu1 %vm3536_vm3, %v3243_v19 }
 0x375   : > { %3125 = vmatprep.subr.mxu1 %v3369_v8 }
 0x377   : > { %v1123_v22 = vpop.permute.xlu0 %1122 }
 0x37a   : > { %v3338_v23 = vpop.eup %3337 }
 0x37b   : > { %3113 = vmatmul.mubr.msk.f32.vlgmr.msra.gmra.mrb[4].mxu1 %vm716_vm2, %v1123_v22  ;;  %v1108_v24 = vpop.permute.xlu0 %1107  ;;  %v1019_v25 = vsel %vm716_vm2, %v3338_v23, 0.0 }
 0x37c   : > { %v1110_v26 = vadd.f32 %v1108_v24, %v3522_v21  ;;  %1020 = vadd.xlane.f32.xlu1 %v1019_v25  ;;  %3127 = vmatprep.mubr.msk.f32.mxu1 %vm3368_vm1, %v3369_v8 }
 0x37e   : > { %1338 = vrot.lane.b32.xlu0 %v1110_v26, %s3926_s21 }
 0x38d   : > { %1024 = vrot.lane.b32.xlu1 %v3522_v21, %s3383_s29  ;;  %s3388_s29 = smov 80  }
 0x391   : > { %1340 = vrot.lane.b32.xlu1 %v3522_v21, %s3384_s27  ;;  %s3385_s27 = smov 16  }
 0x3f0   : > { %v1339_v35 = vpop.permute.xlu0 %1338 }
 0x409   : > { %v1021_v27 = vpop.xlane.xlu1 %1020 }
 0x40a   : > { %3339 = vrcp.f32 %v1021_v27  ;;  %v1100_v27 = vld [vmem:[%s3904_s5] sm:$0xff] }
 0x40d   : > { %v1025_v29 = vpop.permute.xlu1 %1024 }
 0x40e   : > { %3104 = vmatpush3.msra.mxu0 %v1025_v29 }
 0x40f   : > { %3115 = vmatprep.subr.mxu0 %v3369_v8 }
 0x411   : > { %v1341_v34 = vpop.permute.xlu1 %1340 }
 0x414   : > { %v3340_v31 = vpop.eup %3339 }
 0x415   : > { %v1023_v32 = vmul.f32 %v3340_v31, %v3338_v23  ;;  %v2967_v31 = vld [vmem:[%s3908_s9 + $0x10] sm:$0xff] }
 0x417   : > { %3106 = vmatmul.mubr.msk.f32.vlgmr.msra.gmra.mrb[6].mxu0 %vm716_vm2, %v1023_v32 }
 0x418   : > { %3116 = vmatpush3.msra.mxu0 %v2954_v33  ;;  %3117 = vmatprep.mubr.msk.f32.mxu0 %vm3368_vm1, %v3369_v8 }
 0x419   : > { %3120 = vmatprep.subr.mxu0 %v3369_v8 }
 0x41b   : > { %3118 = vmatmul.mubr.msk.f32.vlgmr.msra.gmra.mrb[8].mxu0 %vm716_vm2, %v1252_v20 }
 0x41c   : > { %3122 = vmatprep.mubr.msk.f32.mxu0 %vm3368_vm1, %v3369_v8 }
 0x41f   : > { %3121 = vmatpush3.xpose.msk.msra.mxu0 %vm716_vm2, %v1341_v34 }
 0x420   : > { %3130 = vmatprep.subr.mxu0 %v3369_v8 }
 0x422   : > { %3123 = vmatmul.mubr.msk.f32.vlgmr.msra.gmra.mrb[10].mxu0 %vm716_vm2, %v1339_v35 }
 0x423   : > { %3132 = vmatprep.mubr.msk.f32.mxu0 %vm3368_vm1, %v3369_v8  ;;  %3131 = vmatpush3.msra.mxu0 %v1506_v18 }
 0x424   : > { %3246 = vmatprep.subr.bf16.mxu0 %v3367_v5 }
 0x44e   : > { %v1200_v38 = vpop.f32.mrb[4].mxu1 }
 0x44f   : > { %1205 = vrot.lane.b32.xlu1 %v1200_v38, %s3926_s21  ;;  %v3114_v39 = vpop.f32.mrb[5].mxu1  ;;  %1209 = vrot.lane.b32.xlu0 %v1200_v38, %s3927_s22 }
 0x453   : > { %1213 = vrot.lane.b32.xlu1 %v1200_v38, %s3923_s20  ;;  %1217 = vrot.lane.b32.xlu0 %v1200_v38, %s3925_s23  ;;  %s3391_s20 = smov 48  }
 0x457   : > { %1221 = vrot.lane.b32.xlu1 %v1200_v38, %s3919_s19  ;;  %1225 = vrot.lane.b32.xlu0 %v1200_v38, %s3921_s24  ;;  %s3386_s19 = smov 112   ;;  %s3392_s24 = smov 72  }
 0x4c1   : > { %v1210_v40 = vpop.permute.xlu0 %1209  ;;  %v1206_v41 = vpop.permute.xlu1 %1205 }
 0x4c2   : > { %1212 = vst.msk [vmem:[#allocation2] sm:$0x2] %vm805_vm7, %v1210_v40 }
 0x4c3   : > { %1208 = vst.msk [vmem:[#allocation2] sm:$0x1] %vm800_vm5, %v1206_v41 }
 0x4c5   : > { %v1218_v42 = vpop.permute.xlu0 %1217  ;;  %v1214_v43 = vpop.permute.xlu1 %1213 }
 0x4c6   : > { %1220 = vst.msk [vmem:[#allocation2] sm:$0x8] %vm815_vm8, %v1218_v42 }
 0x4c7   : > { %1216 = vst.msk [vmem:[#allocation2] sm:$0x4] %vm810_vm4, %v1214_v43 }
 0x4c9   : > { %v1226_v44 = vpop.permute.xlu0 %1225  ;;  %v1222_v45 = vpop.permute.xlu1 %1221 }
 0x4ca   : > { %1228 = vst.msk [vmem:[#allocation2] sm:$0x20] %vm825_vm9, %v1226_v44 }
 0x4cb   : > { %1224 = vst.msk [vmem:[#allocation2] sm:$0x10] %vm820_vm6, %v1222_v45 }
 0x4ea   : > { %v3660_v46 = vpop.f32.mrb[6].mxu0 }
 0x4eb   : > { %v3107_v47 = vpop.f32.mrb[7].mxu0 }
 0x4ee   : > { %v1321_v48 = vpop.f32.mrb[8].mxu0 }
 0x4ef   : > { %1332 = vperm.xlu0 %3318, %v1321_v48   ;;  %1327 = vperm.xlu1 %3317, %v1321_v48   ;;  %v3119_v49 = vpop.f32.mrb[9].mxu0 }
 0x4f3   : > { %1233 = vrot.lane.b32.xlu0 %v1200_v38, %s3930_s17  ;;  %1229 = vrot.lane.b32.xlu1 %v1200_v38, %s3931_s25 }
 0x4f4   : > { %3329 = vset.pattern.permute.xlu0 %v3373_v37  ;;  %3330 = vset.pattern.permute.xlu1 %v3372_v36 }
 0x4f5   : > { %v1412_v50 = vpop.f32.mrb[10].mxu0 }
 0x4f6   : > { %v3124_v51 = vpop.f32.mrb[11].mxu0 }
 0x56e   : > { %v1333_v52 = vpop.permute.xlu0 %1332  ;;  %v1328_v53 = vpop.permute.xlu1 %1327 }
 0x56f   : > { %v1335_v58 = vmul.f32 %v1333_v52, %v3594_v55  ;;  %v1330_v59 = vmul.f32 %v1328_v53, %v3597_v57 }
 0x571   : > { %v1336_v61 = vadd.f32 %v1335_v58, %v1330_v59 }
 0x572   : > { %v1234_v54 = vpop.permute.xlu0 %1233  ;;  %v1230_v56 = vpop.permute.xlu1 %1229 }
 0x573   : > { %1236 = vst.msk [vmem:[#allocation2] sm:$0x80] %vm835_vm11, %v1234_v54 }
 0x574   : > { %1232 = vst.msk [vmem:[#allocation2] sm:$0x40] %vm830_vm10, %v1230_v56 }
 0x57b   : > { %v1237_v60 = vld [vmem:[#allocation2] sm:$0xff] }
 0x57c   : > { %v1413_v62 = vadd.f32 %v1412_v50, %v1237_v60 }
 0x57e   : > { %v1416_v37 = vadd.f32 %v1413_v62, %v1336_v61 }
 0x580   : > { %v1417_v63 = vmul.f32 0.35355338, %v1416_v37 }
 0x582   : > { %v1418_v0 = vsub.f32 %v1417_v63, %v3607_v1 }
 0x584   : > { %v1419_v2 = vsel %vm716_vm2, %v1418_v0, -inf }
 0x585   : > { %1420 = vmax.xlane.f32.xlu1 %v1419_v2 }
 0x596   : > { %1796 = vrot.lane.b32.xlu1 %v2966_v3, %s3385_s27 }
 0x59a   : > { %1669 = vrot.lane.b32.xlu1 %v2962_v4, %s3385_s27 }
 0x612   : > { %v1421_v6 = vpop.xlane.xlu1 %1420 }
 0x613   : > { %v1422_v7 = vsub.f32 %v1418_v0, %v1421_v6 }
 0x615   : > { %v1423_v9 = vmul.f32 1.442695, %v1422_v7 }
 0x616   : > { %v1797_v10 = vpop.permute.xlu1 %1796 }
 0x617   : > { %3341 = vpow2.f32 %v1423_v9  ;;  %v1799_v12 = vadd.f32 %v1797_v10, %v3522_v21 }
 0x619   : > { %1803 = vrot.lane.b32.xlu1 %v1799_v12, %s3386_s19 }
 0x61a   : > { %v1670_v16 = vpop.permute.xlu1 %1669 }
 0x61b   : > { %v1672_v17 = vadd.f32 %v1670_v16, %v3522_v21 }
 0x61d   : > { %1659 = vrot.lane.b32.xlu1 %v2961_v13, %s3385_s27  ;;  %v2978_v13 = vld [vmem:[%s3907_s8 + $0x3] ss:$0 sm:$0xff]  ;;  %s3389_s27 = smov 24  }
 0x621   : > { %v3342_v14 = vpop.eup %3341 }
 0x622   : > { %v1425_v15 = vsel %vm716_vm2, %v3342_v14, 0.0 }
 0x623   : > { %1426 = vadd.xlane.f32.xlu0 %v1425_v15 }
 0x639   : > { %1430 = vrot.lane.b32.xlu0 %v3522_v21, %s3387_s26  ;;  %s3932_s26 = smov 122  }
 0x63d   : > { %3325 = vrot.lane.b32.xlu0 %v3540_v30, %s3386_s19 }
 0x641   : > { %1674 = vrot.lane.b32.xlu0 %v1672_v17, %s3386_s19 }
 0x645   : > { %1892 = vrot.lane.b32.xlu0 %v3522_v21, %s3388_s29  ;;  %s3933_s29 = smov 125  }
 0x68b   : > { %v1804_v19 = vpop.permute.xlu1 %1803 }
 0x68f   : > { %v1660_v20 = vpop.permute.xlu1 %1659 }
 0x690   : > { %v1662_v22 = vadd.f32 %v1660_v20, %v3522_v21  ;;  %v2973_v20 = vld [vmem:[%s3905_s6 + $0x3] ss:$0 sm:$0xff] }
 0x692   : > { %1890 = vrot.lane.b32.xlu1 %v1662_v22, %s3386_s19 }
 0x6b0   : > { %v1427_v23 = vpop.xlane.xlu0 %1426 }
 0x6b1   : > { %3343 = vrcp.f32 %v1427_v23 }
 0x6b4   : > { %v1431_v24 = vpop.permute.xlu0 %1430 }
 0x6b5   : > { %3126 = vmatpush3.msra.mxu1 %v1431_v24 }
 0x6b6   : > { %3135 = vmatprep.subr.mxu1 %v3369_v8 }
 0x6b8   : > { %v3326_v29 = vpop.permute.xlu0 %3325 }
 0x6b9   : > { %v3328_v35 = vunpack.i.h.bf16 %v3326_v29  ;;  %v3327_v38 = vunpack.i.l.bf16 %v3326_v29 }
 0x6bb   : > { %v3344_v25 = vpop.eup %3343  ;;  %v3247_v39 = vpack.c.bf16 %v3328_v35, %v3327_v38 }
 0x6bc   : > { %v1429_v26 = vmul.f32 %v3344_v25, %v3342_v14  ;;  %v1675_v32 = vpop.permute.xlu0 %1674  ;;  %v2974_v14 = vld [vmem:[%s3906_s7 + $0x3] ss:$0 sm:$0xff] }
 0x6be   : > { %3128 = vmatmul.mubr.msk.f32.vlgmr.msra.gmra.mrb[6].mxu1 %vm716_vm2, %v1429_v26  ;;  %v2058_v26 = vld [vmem:[%s3904_s5 + $0x10] sm:$0xff] }
 0x6bf   : > { %3136 = vmatpush3.msra.mxu1 %v1100_v27  ;;  %3137 = vmatprep.mubr.msk.f32.mxu1 %vm3368_vm1, %v3369_v8 }
 0x6c0   : > { %3147 = vmatprep.subr.mxu1 %v3369_v8  ;;  %v1893_v33 = vpop.permute.xlu0 %1892 }
 0x6c2   : > { %3138 = vmatmul.mubr.msk.f32.vlgmr.msra.gmra.mrb[8].mxu1 %vm716_vm2, %v3660_v46 }
 0x6c3   : > { %3148 = vmatpush3.msra.mxu1 %v2967_v31  ;;  %3149 = vmatprep.mubr.msk.f32.mxu1 %vm3368_vm1, %v3369_v8 }
 0x6c4   : > { %3152 = vmatprep.subr.mxu1 %v3369_v8 }
 0x6c6   : > { %3150 = vmatmul.mubr.msk.f32.vlgmr.msra.gmra.mrb[10].mxu1 %vm716_vm2, %v1804_v19 }
 0x6c7   : > { %3154 = vmatprep.mubr.msk.f32.mxu1 %vm3368_vm1, %v3369_v8 }
 0x6ca   : > { %3153 = vmatpush3.xpose.msk.msra.mxu1 %vm716_vm2, %v1893_v33 }
 0x6cb   : > { %3162 = vmatprep.subr.mxu1 %v3369_v8 }
 0x704   : > { %v1891_v34 = vpop.permute.xlu1 %1890 }
 0x705   : > { %3155 = vmatmul.mubr.msk.f32.vlgmr.msra.gmra.mrb[12].mxu1 %vm716_vm2, %v1891_v34 }
 0x706   : > { %3164 = vmatprep.mubr.msk.f32.mxu1 %vm3368_vm1, %v3369_v8  ;;  %3163 = vmatpush3.msra.mxu1 %v2058_v26 }
 0x707   : > { %3174 = vmatprep.subr.mxu1 %v3369_v8 }
 0x791   : > { %v1502_v40 = vpop.f32.mrb[6].mxu1 }
 0x792   : > { %v3129_v41 = vpop.f32.mrb[7].mxu1  ;;  %3133 = vmatmul.mubr.msk.f32.vlgmr.msra.gmra.mrb[12].mxu0 %vm716_vm2, %v1502_v40 }
 0x793   : > { %3249 = vmatpush3.bf16.xpose.msk.msra.mxu0 %vm3536_vm3, %v3247_v39  ;;  %3144 = vmatprep.mubr.msk.f32.mxu0 %vm3368_vm1, %v3369_v8 }
 0x794   : > { %3157 = vmatprep.subr.mxu0 %v3369_v8 }
 0x795   : > { %v1649_v42 = vpop.f32.mrb[8].mxu1 }
 0x796   : > { %v3139_v43 = vpop.f32.mrb[9].mxu1 }
 0x799   : > { %v1873_v44 = vpop.f32.mrb[10].mxu1 }
 0x79a   : > { %3145 = vmatmul.mubr.msk.f32.vlgmr.msra.gmra.mrb[14].mxu0 %vm716_vm2, %v1675_v32  ;;  %1879 = vperm.xlu0 %3329, %v1873_v44   ;;  %v3151_v45 = vpop.f32.mrb[11].mxu1 }
 0x79b   : > { %1884 = vperm.xlu1 %3330, %v1873_v44   ;;  %3159 = vmatprep.mubr.msk.f32.mxu0 %vm3368_vm1, %v3369_v8 }
 0x7d8   : > { %v1964_v46 = vpop.f32.mrb[12].mxu1 }
 0x7d9   : > { %v3156_v47 = vpop.f32.mrb[13].mxu1 }
 0x819   : > { %v1880_v53 = vpop.permute.xlu0 %1879 }
 0x81a   : > { %v1885_v54 = vpop.permute.xlu1 %1884  ;;  %v1882_v0 = vmul.f32 %v1880_v53, %v3597_v57 }
 0x81b   : > { %v1887_v2 = vmul.f32 %v1885_v54, %v3594_v55 }
 0x81d   : > { %v1888_v4 = vadd.f32 %v1887_v2, %v1882_v0 }
 0x865   : > { %v1576_v48 = vpop.f32.mrb[12].mxu0 }
 0x866   : > { %v3725_v49 = vadd.f32 %v1649_v42, %v1576_v48  ;;  %v3134_v50 = vpop.f32.mrb[13].mxu0  ;;  %v2979_v42 = vld [vmem:[%s3908_s9 + $0x18] sm:$0xff] }
 0x86d   : > { %v1752_v51 = vpop.f32.mrb[14].mxu0 }
 0x86e   : > { %1761 = vrot.lane.b32.xlu0 %v1752_v51, %s3927_s22  ;;  %1757 = vrot.lane.b32.xlu1 %v1752_v51, %s3926_s21  ;;  %v3146_v52 = vpop.f32.mrb[15].mxu0 }
 0x872   : > { %1769 = vrot.lane.b32.xlu0 %v1752_v51, %s3925_s23  ;;  %1765 = vrot.lane.b32.xlu1 %v1752_v51, %s3932_s26  ;;  %s3390_s23 = smov 104  }
 0x876   : > { %1777 = vrot.lane.b32.xlu0 %v1752_v51, %s3933_s29  ;;  %1773 = vrot.lane.b32.xlu1 %v1752_v51, %s3934_s28 }
 0x87a   : > { %1785 = vrot.lane.b32.xlu0 %v1752_v51, %s3930_s17  ;;  %1781 = vrot.lane.b32.xlu1 %v1752_v51, %s3931_s25 }
 0x8e0   : > { %v1762_v56 = vpop.permute.xlu0 %1761  ;;  %v1758_v58 = vpop.permute.xlu1 %1757 }
 0x8e1   : > { %1764 = vst.msk [vmem:[#allocation2] sm:$0x2] %vm805_vm7, %v1762_v56 }
 0x8e2   : > { %1760 = vst.msk [vmem:[#allocation2] sm:$0x1] %vm800_vm5, %v1758_v58 }
 0x8e4   : > { %v1770_v59 = vpop.permute.xlu0 %1769  ;;  %v1766_v60 = vpop.permute.xlu1 %1765 }
 0x8e5   : > { %1772 = vst.msk [vmem:[#allocation2] sm:$0x8] %vm815_vm8, %v1770_v59 }
 0x8e6   : > { %1768 = vst.msk [vmem:[#allocation2] sm:$0x4] %vm810_vm4, %v1766_v60 }
 0x8e8   : > { %v1778_v61 = vpop.permute.xlu0 %1777  ;;  %v1774_v62 = vpop.permute.xlu1 %1773 }
 0x8e9   : > { %1780 = vst.msk [vmem:[#allocation2] sm:$0x20] %vm825_vm9, %v1778_v61 }
 0x8ea   : > { %1776 = vst.msk [vmem:[#allocation2] sm:$0x10] %vm820_vm6, %v1774_v62 }
 0x8ec   : > { %v1786_v37 = vpop.permute.xlu0 %1785  ;;  %v1782_v63 = vpop.permute.xlu1 %1781 }
 0x8ed   : > { %1788 = vst.msk [vmem:[#allocation2] sm:$0x80] %vm835_vm11, %v1786_v37 }
 0x8ee   : > { %1784 = vst.msk [vmem:[#allocation2] sm:$0x40] %vm830_vm10, %v1782_v63 }
 0x8f5   : > { %v1789_v3 = vld [vmem:[#allocation2] sm:$0xff] }
 0x8f6   : > { %v1965_v6 = vadd.f32 %v1964_v46, %v1789_v3 }
 0x8f8   : > { %v1968_v7 = vadd.f32 %v1965_v6, %v1888_v4 }
 0x8fa   : > { %v1969_v9 = vmul.f32 0.35355338, %v1968_v7 }
 0x8fc   : > { %v1970_v10 = vsub.f32 %v1969_v9, %v3607_v1 }
 0x8fe   : > { %v1971_v12 = vsel %vm716_vm2, %v1970_v10, -inf }
 0x8ff   : > { %1972 = vmax.xlane.f32.xlu1 %v1971_v12 }
 0x910   : > { %2276 = vrot.lane.b32.xlu1 %v2978_v13, %s3389_s27 }
 0x914   : > { %2149 = vrot.lane.b32.xlu1 %v2974_v14, %s3389_s27 }
 0x98c   : > { %v1973_v15 = vpop.xlane.xlu1 %1972 }
 0x98d   : > { %v1974_v16 = vsub.f32 %v1970_v10, %v1973_v15 }
 0x98f   : > { %v1975_v17 = vmul.f32 1.442695, %v1974_v16 }
 0x990   : > { %v2277_v18 = vpop.permute.xlu1 %2276 }
 0x991   : > { %3345 = vpow2.f32 %v1975_v17  ;;  %v2279_v19 = vadd.f32 %v2277_v18, %v3522_v21 }
 0x993   : > { %2283 = vrot.lane.b32.xlu1 %v2279_v19, %s3390_s23 }
 0x994   : > { %v2150_v24 = vpop.permute.xlu1 %2149 }
 0x995   : > { %v2152_v25 = vadd.f32 %v2150_v24, %v3522_v21 }
 0x997   : > { %2139 = vrot.lane.b32.xlu1 %v2973_v20, %s3389_s27  ;;  %s3935_s27 = smov 121  }
 0x99b   : > { %v3346_v22 = vpop.eup %3345 }
 0x99c   : > { %v1977_v23 = vsel %vm716_vm2, %v3346_v22, 0.0 }
 0x99d   : > { %1978 = vadd.xlane.f32.xlu0 %v1977_v23 }
 0x9b3   : > { %1982 = vrot.lane.b32.xlu0 %v3522_v21, %s3391_s20  ;;  %s3937_s20 = smov 123  }
 0x9b7   : > { %3332 = vrot.lane.b32.xlu0 %v3540_v30, %s3390_s23 }
 0x9bb   : > { %2154 = vrot.lane.b32.xlu0 %v2152_v25, %s3390_s23 }
 0x9bf   : > { %2372 = vrot.lane.b32.xlu0 %v3522_v21, %s3392_s24 }
 0xa05   : > { %v2284_v27 = vpop.permute.xlu1 %2283 }
 0xa09   : > { %v2140_v29 = vpop.permute.xlu1 %2139 }
 0xa0a   : > { %v2142_v31 = vadd.f32 %v2140_v29, %v3522_v21 }
 0xa0c   : > { %2370 = vrot.lane.b32.xlu1 %v2142_v31, %s3390_s23 }
 0xa2a   : > { %v1979_v32 = vpop.xlane.xlu0 %1978 }
 0xa2b   : > { %3347 = vrcp.f32 %v1979_v32 }
 0xa2e   : > { %v1983_v30 = vpop.permute.xlu0 %1982 }
 0xa2f   : > { %3158 = vmatpush3.msra.mxu0 %v1983_v30 }
 0xa30   : > { %3250 = vmatprep.subr.bf16.mxu0 %v3367_v5 }
 0xa32   : > { %v3333_v33 = vpop.permute.xlu0 %3332 }
 0xa33   : > { %v3335_v34 = vunpack.i.h.bf16 %v3333_v33  ;;  %v3334_v35 = vunpack.i.l.bf16 %v3333_v33 }
 0xa35   : > { %v3348_v38 = vpop.eup %3347  ;;  %v3251_v39 = vpack.c.bf16 %v3335_v34, %v3334_v35  ;;  %v2640_v34 = vld [vmem:[%s3910_s11] sm:$0xff] }
 0xa36   : > { %v1981_v40 = vmul.f32 %v3348_v38, %v3346_v22  ;;  %v2155_v41 = vpop.permute.xlu0 %2154  ;;  %v2643_v38 = vld [vmem:[%s3910_s11 + $0x18] sm:$0xff] }
 0xa38   : > { %3160 = vmatmul.mubr.msk.f32.vlgmr.msra.gmra.mrb[16].mxu0 %vm716_vm2, %v1981_v40 }
 0xa39   : > { %3253 = vmatpush3.bf16.xpose.msk.msra.mxu0 %vm3536_vm3, %v3251_v39  ;;  %3171 = vmatprep.mubr.msk.f32.mxu0 %vm3368_vm1, %v3369_v8 }
 0xa3a   : > { %3184 = vmatprep.subr.mxu0 %v3369_v8  ;;  %v2373_v28 = vpop.permute.xlu0 %2372 }
 0xa40   : > { %3172 = vmatmul.mubr.msk.f32.vlgmr.msra.gmra.mrb[18].mxu0 %vm716_vm2, %v2155_v41 }
 0xa41   : > { %3186 = vmatprep.mubr.msk.f32.mxu0 %vm3368_vm1, %v3369_v8 }
 0xa7e   : > { %v2371_v47 = vpop.permute.xlu1 %2370 }
 0xb0b   : > { %v2054_v43 = vpop.f32.mrb[16].mxu0 }
 0xb0c   : > { %v3161_v44 = vpop.f32.mrb[17].mxu0  ;;  %3165 = vmatmul.mubr.msk.f32.vlgmr.msra.gmra.mrb[14].mxu1 %vm716_vm2, %v2054_v43 }
 0xb0d   : > { %3175 = vmatpush3.msra.mxu1 %v2979_v42  ;;  %3176 = vmatprep.mubr.msk.f32.mxu1 %vm3368_vm1, %v3369_v8  ;;  %v2985_v44 = vld [vmem:[%s3909_s10] ss:$0 sm:$0xff] }
 0xb0e   : > { %3179 = vmatprep.subr.mxu1 %v3369_v8 }
 0xb10   : > { %3177 = vmatmul.mubr.msk.f32.vlgmr.msra.gmra.mrb[16].mxu1 %vm716_vm2, %v2284_v27 }
 0xb11   : > { %3181 = vmatprep.mubr.msk.f32.mxu1 %vm3368_vm1, %v3369_v8 }
 0xb13   : > { %v2232_v45 = vpop.f32.mrb[18].mxu0 }
 0xb14   : > { %3180 = vmatpush3.xpose.msk.msra.mxu1 %vm716_vm2, %v2373_v28  ;;  %2241 = vrot.lane.b32.xlu1 %v2232_v45, %s3935_s27  ;;  %v3173_v46 = vpop.f32.mrb[19].mxu0 }
 0xb15   : > { %2237 = vrot.lane.b32.xlu0 %v2232_v45, %s3936_s30  ;;  %3189 = vmatprep.subr.mxu1 %v3369_v8 }
 0xb17   : > { %3182 = vmatmul.mubr.msk.f32.vlgmr.msra.gmra.mrb[18].mxu1 %vm716_vm2, %v2371_v47 }
 0xb18   : > { %2249 = vrot.lane.b32.xlu1 %v2232_v45, %s3937_s20  ;;  %3191 = vmatprep.mubr.msk.f32.mxu1 %vm3368_vm1, %v3369_v8 }
 0xb19   : > { %2245 = vrot.lane.b32.xlu0 %v2232_v45, %s3932_s26  ;;  %s523_s26 = scalar_lea.vmem %s3914_s15, %s3502_s16 }
 0xb1c   : > { %2257 = vrot.lane.b32.xlu1 %v2232_v45, %s3933_s29 }
 0xb1d   : > { %2253 = vrot.lane.b32.xlu0 %v2232_v45, %s3934_s28 }
 0xb86   : > { %v2242_v48 = vpop.permute.xlu1 %2241 }
 0xb87   : > { %2244 = vst.msk [vmem:[#allocation2] sm:$0x2] %vm805_vm7, %v2242_v48  ;;  %v2238_v50 = vpop.permute.xlu0 %2237  ;;  %v2733_v48 = vld [vmem:[%s3912_s13] sm:$0xff] }
 0xb88   : > { %2240 = vst.msk [vmem:[#allocation2] sm:$0x1] %vm800_vm5, %v2238_v50  ;;  %v2734_v50 = vld [vmem:[%s3912_s13 + $0x8] sm:$0xff] }
 0xb8a   : > { %v2250_v51 = vpop.permute.xlu1 %2249 }
 0xb8b   : > { %2252 = vst.msk [vmem:[#allocation2] sm:$0x8] %vm815_vm8, %v2250_v51  ;;  %v2246_v52 = vpop.permute.xlu0 %2245  ;;  %v3261_v51 = vpack.c.bf16 %v2734_v50, %v2733_v48 }
 0xb8c   : > { %2248 = vst.msk [vmem:[#allocation2] sm:$0x4] %vm810_vm4, %v2246_v52  ;;  %v2735_v52 = vld [vmem:[%s3912_s13 + $0x10] sm:$0xff] }
 0xb8e   : > { %v2258_v53 = vpop.permute.xlu1 %2257 }
 0xb8f   : > { %2260 = vst.msk [vmem:[#allocation2] sm:$0x20] %vm825_vm9, %v2258_v53  ;;  %v2254_v54 = vpop.permute.xlu0 %2253  ;;  %v2736_v53 = vld [vmem:[%s3912_s13 + $0x18] sm:$0xff] }
 0xb90   : > { %2256 = vst.msk [vmem:[#allocation2] sm:$0x10] %vm820_vm6, %v2254_v54  ;;  %v3264_v54 = vpack.c.bf16 %v2736_v53, %v2735_v52 }
 0xbdf   : > { %v2128_v56 = vpop.f32.mrb[14].mxu1 }
 0xbe0   : > { %v2132_v58 = vadd.f32 %v2128_v56, %v3725_v49  ;;  %v3166_v59 = vpop.f32.mrb[15].mxu1  ;;  %v2737_v56 = vld [vmem:[%s3912_s13 + $0x20] sm:$0xff] }
 0xbe3   : > { %v2353_v60 = vpop.f32.mrb[16].mxu1 }
 0xbe4   : > { %v3178_v61 = vpop.f32.mrb[17].mxu1  ;;  %2364 = vperm.xlu1 %3330, %v2353_v60   ;;  %2359 = vperm.xlu0 %3329, %v2353_v60   ;;  %v2739_v60 = vld [vmem:[%s3912_s13 + $0x30] sm:$0xff] }
 0xbe5   : > { %v2740_v61 = vld [vmem:[%s3912_s13 + $0x38] sm:$0xff] }
 0xbe8   : > { %2265 = vrot.lane.b32.xlu1 %v2232_v45, %s3930_s17  ;;  %2261 = vrot.lane.b32.xlu0 %v2232_v45, %s3931_s25  ;;  %s3393_s17 = smov 40   ;;  %v2986_v45 = vld [vmem:[%s3909_s10 + $0x1] ss:$0 sm:$0xff] }
 0xbe9   : > { %3336 = vset.pattern.permute.xlu0 %v3372_v36 }
 0xbea   : > { %v2444_v62 = vpop.f32.mrb[18].mxu1 }
 0xbeb   : > { %v3183_v37 = vpop.f32.mrb[19].mxu1 }
 0xbec   : > { %v2987_v37 = vld [vmem:[%s3911_s12] ss:$0 sm:$0xff] }
 0xc63   : > { %v2365_v63 = vpop.permute.xlu1 %2364  ;;  %v2360_v0 = vpop.permute.xlu0 %2359 }
 0xc64   : > { %v2367_v49 = vmul.f32 %v2365_v63, %v3594_v55  ;;  %v2362_v4 = vmul.f32 %v2360_v0, %v3597_v57 }
 0xc66   : > { %v2368_v7 = vadd.f32 %v2367_v49, %v2362_v4 }
 0xc67   : > { %v2266_v2 = vpop.permute.xlu1 %2265  ;;  %v2262_v3 = vpop.permute.xlu0 %2261 }
 0xc68   : > { %2268 = vst.msk [vmem:[#allocation2] sm:$0x80] %vm835_vm11, %v2266_v2 }
 0xc69   : > { %2264 = vst.msk [vmem:[#allocation2] sm:$0x40] %vm830_vm10, %v2262_v3 }
 0xc70   : > { %v2269_v6 = vld [vmem:[#allocation2] sm:$0xff] }
 0xc71   : > { %v2445_v9 = vadd.f32 %v2444_v62, %v2269_v6  ;;  %v3270_v62 = vpack.c.bf16 %v2740_v61, %v2739_v60 }
 0xc73   : > { %v2448_v10 = vadd.f32 %v2445_v9, %v2368_v7 }
 0xc75   : > { %v2449_v12 = vmul.f32 0.35355338, %v2448_v10 }
 0xc77   : > { %v2450_v36 = vsub.f32 %v2449_v12, %v3607_v1  ;;  %v2538_v1 = vld [vmem:[%s3904_s5 + $0x18] sm:$0xff] }
 0xc78   : > { %3190 = vmatpush3.msra.mxu1 %v2538_v1 }
 0xc79   : > { %v2451_v13 = vsel %vm716_vm2, %v2450_v36, -inf  ;;  %3260 = vmatprep.subr.bf16.mxu1 %v3367_v5 }
 0xc7a   : > { %2452 = vmax.xlane.f32.xlu0 %v2451_v13 }
 0xc90   : > { %2462 = vrot.lane.b32.xlu0 %v3522_v21, %s3393_s17 }
 0xd07   : > { %v2453_v14 = vpop.xlane.xlu0 %2452 }
 0xd08   : > { %v2454_v15 = vsub.f32 %v2450_v36, %v2453_v14 }
 0xd0a   : > { %v2455_v16 = vmul.f32 1.442695, %v2454_v15 }
 0xd0b   : > { %v2463_v17 = vpop.permute.xlu0 %2462 }
 0xd0c   : > { %3349 = vpow2.f32 %v2455_v16  ;;  %3185 = vmatpush3.msra.mxu0 %v2463_v17 }
 0xd0d   : > { %3254 = vmatprep.subr.bf16.mxu0 %v3367_v5 }
 0xd16   : > { %v3350_v55 = vpop.eup %3349 }
 0xd17   : > { %v2457_v57 = vsel %vm716_vm2, %v3350_v55, 0.0 }
 0xd18   : > { %2458 = vadd.xlane.f32.xlu1 %v2457_v57 }
 0xda5   : > { %v2459_v21 = vpop.xlane.xlu1 %2458 }
 0xda6   : > { %3351 = vrcp.f32 %v2459_v21 }
 0xdb0   : > { %v3352_v18 = vpop.eup %3351 }
 0xdb1   : > { %v2461_v19 = vmul.f32 %v3352_v18, %v3350_v55 }
 0xdb3   : > { %3187 = vmatmul.mubr.msk.f32.vlgmr.msra.gmra.mrb[20].mxu0 %vm716_vm2, %v2461_v19 }
 0xdb4   : > { %3202 = vmatprep.mubr.msk.f32.mxu0 %vm3368_vm1, %v3369_v8 }
 0xe86   : > { %v2534_v20 = vpop.f32.mrb[20].mxu0 }
 0xe87   : > { %v3188_v22 = vpop.f32.mrb[21].mxu0  ;;  %3192 = vmatmul.mubr.msk.f32.vlgmr.msra.gmra.mrb[20].mxu1 %vm716_vm2, %v2534_v20 }
 0xe88   : > { %3221 = vmatprep.mubr.msk.f32.mxu1 %vm3368_vm1, %v3369_v8  ;;  %v2641_v8 = vld [vmem:[%s3910_s11 + $0x8] sm:$0xff]  ;;  %3262 = vmatpush3.bf16.msra.mxu1 %v3261_v51 }
 0xe89   : > { %v3255_v35 = vpack.c.bf16 %v2641_v8, %v2640_v34  ;;  %3263 = vmatprep.subr.bf16.mxu1 %v3367_v5 }
 0xe8b   : > { %3256 = vmatpush3.bf16.msra.mxu0 %v3255_v35 }
 0xe8c   : > { %3257 = vmatprep.subr.bf16.mxu0 %v3367_v5  ;;  %3265 = vmatpush3.bf16.msra.mxu1 %v3264_v54 }
 0xe8d   : > { %3266 = vmatprep.subr.bf16.mxu1 %v3367_v5 }
 0xf5a   : > { %v2608_v23 = vpop.f32.mrb[20].mxu1 }
 0xf5b   : > { %v2612_v24 = vadd.f32 %v2608_v23, %v2132_v58  ;;  %v3193_v25 = vpop.f32.mrb[21].mxu1  ;;  %v2738_v58 = vld [vmem:[%s3912_s13 + $0x28] sm:$0xff] }
 0xf5c   : > { %v3267_v59 = vpack.c.bf16 %v2738_v58, %v2737_v56 }
 0xf5d   : > { %v2613_v26 = vadd.f32 %v2612_v24, %v3508_v11  ;;  %v2642_v11 = vld [vmem:[%s3910_s11 + $0x10] sm:$0xff]  ;;  %v2991_v24 = vld [vmem:[%s3909_s10 + $0x2] ss:$0 sm:$0xff] }
 0xf5e   : > { %v3258_v39 = vpack.c.bf16 %v2643_v38, %v2642_v11  ;;  %3268 = vmatpush3.bf16.msra.mxu1 %v3267_v59 }
 0xf5f   : > { %v2616_v27 = vsel %vm531_vm0, %v2613_v26, 0.0  ;;  %3269 = vmatprep.subr.bf16.mxu1 %v3367_v5  ;;  %v2989_v5 = vld [vmem:[%s3913_s14] ss:$0 sm:$0xff] }
 0xf60   : > { %2617 = vadd.xlane.f32.xlu1 %v2616_v27  ;;  %3259 = vmatpush3.bf16.msra.mxu0 %v3258_v39 }
 0xf62   : > { %3271 = vmatpush3.bf16.msra.mxu1 %v3270_v62 }
 0xfed   : > { %v2618_v29 = vpop.xlane.xlu1 %2617 }
 0xfee   : > { %v2620_v31 = vmul.f32 0.03125, %v2618_v29 }
 0xff0   : > { %v2621_v32 = vsub.f32 %v2613_v26, %v2620_v31  ;;  %v2992_v26 = vld [vmem:[%s3909_s10 + $0x3] ss:$0 sm:$0xff] }
 0xff2   : > { %v2622_v30 = vmul.f32 %v2621_v32, %v2621_v32 }
 0xff4   : > { %v2623_v33 = vsel %vm531_vm0, %v2622_v30, 0.0 }
 0xff5   : > { %2624 = vadd.xlane.f32.xlu1 %v2623_v33 }
0x1082   : > { %v2625_v40 = vpop.xlane.xlu1 %2624 }
0x1083   : > { %v2626_v41 = vmul.f32 0.03125, %v2625_v40 }
0x1085   : > { %v2627_v42 = vadd.f32 1e-12, %v2626_v41 }
0x1087   : > { %3353 = vrsqrt.f32 %v2627_v42 }
0x1091   : > { %v3354_v43 = vpop.eup %3353 }
0x1092   : > { %v2629_v28 = vmul.f32 %v3354_v43, %v2621_v32 }
0x1094   : > { %v2634_v46 = vmul.f32 %v2985_v44, %v2629_v28 }
0x1096   : > { %v2639_v47 = vadd.f32 %v2986_v45, %v2634_v46 }
0x1098   : > { %3203 = vmatmul.mubr.msk.f32.vlgmr.msra.gmra.mrb[22].mxu0 %vm531_vm0, %v2639_v47 }
0x116b   : > { %v2720_v63 = vpop.f32.mrb[22].mxu0 }
0x116c   : > { %v2721_v0 = vadd.f32 %v2987_v37, %v2720_v63  ;;  %v3204_v2 = vpop.f32.mrb[23].mxu0 }
0x116e   : > { %v2725_v3 = vmul.f32 0.044715, %v2721_v0  ;;  %v2724_v10 = vmul.f32 0.5, %v2721_v0 }
0x1170   : > { %v2726_v49 = vmul.f32 %v2725_v3, %v2721_v0 }
0x1172   : > { %v2727_v4 = vmul.f32 %v2726_v49, %v2721_v0 }
0x1174   : > { %v2728_v6 = vadd.f32 %v2727_v4, %v2721_v0 }
0x1176   : > { %v2729_v7 = vmul.f32 0.7978846, %v2728_v6 }
0x1178   : > { %3355 = vtanh.f32 %v2729_v7 }
0x1182   : > { %v3356_v9 = vpop.eup %3355 }
0x1183   : > { %v2731_v12 = vadd.f32 1.0, %v3356_v9 }
0x1185   : > { %v2732_v36 = vmul.f32 %v2731_v12, %v2724_v10 }
0x1187   : > { %3222 = vmatmul.mubr.msk.f32.vlgmr.msra.gmra.mrb[22].mxu1 %vm2748_vm12, %v2732_v36 }
0x125a   : > { %v2818_v13 = vpop.f32.mrb[22].mxu1 }
0x125b   : > { %v2819_v14 = vadd.f32 %v2989_v5, %v2818_v13  ;;  %v3223_v15 = vpop.f32.mrb[23].mxu1 }
0x125d   : > { %v2822_v16 = vadd.f32 %v2819_v14, %v2639_v47 }
0x125f   : > { %v2825_v17 = vsel %vm531_vm0, %v2822_v16, 0.0 }
0x1260   : > { %2826 = vadd.xlane.f32.xlu1 %v2825_v17 }
0x12ed   : > { %v2827_v55 = vpop.xlane.xlu1 %2826 }
0x12ee   : > { %v2828_v57 = vmul.f32 0.03125, %v2827_v55 }
0x12f0   : > { %v2829_v1 = vsub.f32 %v2822_v16, %v2828_v57 }
0x12f2   : > { %v2830_v21 = vmul.f32 %v2829_v1, %v2829_v1 }
0x12f4   : > { %v2831_v18 = vsel %vm531_vm0, %v2830_v21, 0.0 }
0x12f5   : > { %2832 = vadd.xlane.f32.xlu1 %v2831_v18 }
0x1382   : > { %v2833_v19 = vpop.xlane.xlu1 %2832 }
0x1383   : > { %v2834_v20 = vmul.f32 0.03125, %v2833_v19 }
0x1385   : > { %v2835_v22 = vadd.f32 1e-12, %v2834_v20 }
0x1387   : > { %3357 = vrsqrt.f32 %v2835_v22 }
0x1391   : > { %v3358_v23 = vpop.eup %3357 }
0x1392   : > { %v2837_v25 = vmul.f32 %v3358_v23, %v2829_v1 }
0x1394   : > { %v2842_v27 = vmul.f32 %v2991_v24, %v2837_v25 }
0x1396   : > { %v2847_v29 = vadd.f32 %v2992_v26, %v2842_v27 }
0x1398   : > { %2848 = vst.msk [vmem:[%s523_s26] sm:$0xff] %vm531_vm0, %v2847_v29 }
0x1399 PF: > { %s25_s18 = sadd.s32 1, %s3365_s18  }
0x139a   : > { %p22_p4 = scmp.ge.s32.totalorder %s25_s18, 4  }
0x139c   :  { %24 = sbr.rel (!%p22_p4) target bundleno = 1 (0x1), region = 119 }

// kernel: xlnet_embedder_forward.3
= control target key start
LH: loop header
LB: loop body
LE: loop exit
PB: predicated region body
PF: predicated region fallthrough
CT: control target
= control target key end

     0   :  { %s4090_s0 = inlined_call_operand.vmem [shape: f32[2,8,32], index: 0, kind: input, shape index: {}]   ;;  %s4091_s1 = inlined_call_operand.vmem [shape: f32[16,32], index: 1, kind: input, shape index: {}]   ;;  %s4092_s2 = inlined_call_operand.vmem [shape: f32[2,8,8], index: 2, kind: input, shape index: {}]   ;;  %s4093_s3 = inlined_call_operand.vmem [shape: f32[2,8,8], index: 3, kind: input, shape index: {}]   ;;  %s4094_s4 = inlined_call_operand.vmem [shape: f32[32,128], index: 4, kind: input, shape index: {}]   ;;  %s4095_s5 = inlined_call_operand.vmem [shape: f32[32,32], index: 5, kind: input, shape index: {}]   ;;  %s4096_s6 = inlined_call_operand.vmem [shape: f32[4,8], index: 6, kind: input, shape index: {}]   ;;  %s4097_s7 = inlined_call_operand.vmem [shape: f32[4,8], index: 7, kind: input, shape index: {}]   ;;  %s4098_s8 = inlined_call_operand.vmem [shape: f32[4,8], index: 8, kind: input, shape index: {}]   ;;  %s4099_s9 = inlined_call_operand.vmem [shape: f32[4,8,2], index: 9, kind: input, shape index: {}]   ;;  %s4100_s10 = inlined_call_operand.vmem [shape: f32[4,32], index: 10, kind: input, shape index: {}]   ;;  %s4101_s11 = inlined_call_operand.vmem [shape: f32[32,64], index: 11, kind: input, shape index: {}]   ;;  %s4102_s12 = inlined_call_operand.vmem [shape: f32[1,64], index: 12, kind: input, shape index: {}]   ;;  %s4103_s13 = inlined_call_operand.vmem [shape: f32[64,32], index: 13, kind: input, shape index: {}]   ;;  %s4104_s14 = inlined_call_operand.vmem [shape: f32[1,32], index: 14, kind: input, shape index: {}]   ;;  %s4105_s15 = inlined_call_operand.hbm [shape: f32[2,8,32], index: 15, kind: output, shape index: {}]  }
   0x1   :  { %4127 = sst [smem:[#allocation11_spill]] %s4090_s0 }
   0x2   :  { %4128 = sst [smem:[#allocation12_spill]] %s4091_s1 }
   0x3   :  { %4129 = sst [smem:[#allocation13_spill]] %s4092_s2 }
   0x4   :  { %4130 = sst [smem:[#allocation14_spill]] %s4093_s3 }
   0x5   :  { %4131 = sst [smem:[#allocation15_spill]] %s4094_s4 }
   0x6   :  { %20 = vsyncpa [#allocation4], 0 }
   0x7   :  { %22 = vsyncpa [#allocation4 + $0x1], 0  ;;  %s3583_s18 = smov 0   ;;  %s3585_s19 = smov 0  }
   0x8   :  { %s3587_s20 = smov 0   ;;  %s3589_s21 = smov 0  }
   0x9 LB: > { %4132 = sst [smem:[#allocation6_spill]] %s3461_s18  ;;  %s3604_s22 = sadd.s32 4294967295, %s3473_s21   ;;  %s3473_s21 = sphi %s3589_s21, %s4156_s21   ;;  %s3469_s20 = sphi %s3587_s20, %s4158_s20   ;;  %s3465_s19 = sphi %s3585_s19, %s4160_s19   ;;  %s3461_s18 = sphi %s3583_s18, %s4159_s18  }
   0xa   : > { %4133 = sst [smem:[#allocation7_spill]] %s3469_s20  ;;  %s2946_s23 = sadd.s32 4294967294, %s3473_s21  }
   0xb   : > { %s3608_s24 = sadd.s32 1, %s3473_s21   ;;  %s365_s25 = sadd.s32 1, %s3469_s20 }
   0xc   : > { %4134 = sst [smem:[#allocation8_spill]] %s3608_s24  ;;  %s362_s26 = ssub.s32 %s3473_s21, %s3608_s24 }
   0xd   : > { %p375_p0 = scmp.ne.s32.totalorder %s3469_s20, %s3465_s19  ;;  %p363_p1 = scmp.eq.s32.totalorder %s362_s26, 0 }
   0xe   : > { %p376_p2 = scmp.eq.s32.totalorder %s3604_s22, 1  ;;  %p381_p3 = scmp.ne.s32.totalorder %s3465_s19, %s3461_s18 }
   0xf   : > { %p382_p4 = scmp.eq.s32.totalorder %s2946_s23, 1  ;;  %p2949_p7 = scmp.ge.s32.totalorder %s3473_s21, 1 }
  0x10   : > { %s3619_s27 = scalar_select %p363_p1, %s3469_s20, %s365_s25  }
  0x11   : > { %p3621_p5 = por %p376_p2, %p375_p0  ;;  %p3625_p6 = por %p382_p4, %p381_p3 }
  0x12   : > { %4135 = sst [smem:[#allocation9_spill]] %s3619_s27  ;;  %p457_p8 = scmp.lt.s32.totalorder %s3473_s21, 3 }
  0x13   : > { %s4137_s29 = scalar_select %p3625_p6, 1, 0 }
  0x14   : > { %p458_p9 = pnand %p2949_p7, %p457_p8 }
  0x15   : > { %4138 = sst [smem:[#allocation10_spill]] %s4137_s29  ;;  %s4139_s4 = sld [smem:[#allocation15_spill]] (!%p458_p9)  ;;  %v3475_v5 = vmov (!%p458_p9), 0.0|0.0   ;;  %vm531_vm0 = vcmask (!%p458_p9), 261120   ;;  %vm3476_vm1 = vmmov (!%p458_p9), 0   ;;  %v3477_v8 = vmov (!%p458_p9), 0.0  }
  0x16   : > { %461 = sbr.rel (%p458_p9) target bundleno = 5052 (0x13bc), region = 80  ;;  %3245 = vmatprep.subr.bf16.mxu0 (!%p458_p9), %v3475_v5  ;;  %p512_p10 = scmp.lt.s32.totalorder (!%p458_p9), %s3604_s22, 1  ;;  %3093 = vmatprep.mubr.msk.f32.mxu0 (!%p458_p9), %vm3476_vm1, %v3477_v8  ;;  %v2957_v23 = vld [vmem:[%s4096_s6] ss:$0 sm:$0xff] (!%p458_p9)  ;;  %vm716_vm2 = vcmask (!%p458_p9), 64512   ;;  %v3480_v36 = vmov (!%p458_p9), 1  }
  0x17   : > { %s4140_s1 = sld [smem:[#allocation12_spill]] (!%p458_p9)  ;;  %s3478_s20 = smov (!%p458_p9), 32   ;;  %vm3687_vm3 = vmpackc.low (!%p458_p9), %vm716_vm2, %vm716_vm2  ;;  %v2958_v31 = vld [vmem:[%s4097_s7] ss:$0 sm:$0xff] (!%p458_p9)  ;;  %3370 = vset.pattern.permute.xlu0 (!%p458_p9), %v3480_v36  ;;  %v3481_v37 = vmov (!%p458_p9), 0   ;;  %vm810_vm4 = vcmask (!%p458_p9), 59394  }
  0x18   : > { %s4141_s0 = sld [smem:[#allocation11_spill]] (!%p458_p9)  ;;  %v844_v33 = vld [vmem:[%s4099_s9] sm:$0xff] (!%p458_p9)  ;;  %3369 = vset.pattern.permute.xlu1 (!%p458_p9), %v3481_v37  ;;  %s4107_s23 = smov (!%p458_p9), 122   ;;  %vm800_vm5 = vcmask (!%p458_p9), 57344   ;;  %vm820_vm6 = vcmask (!%p458_p9), 61444   ;;  %vm805_vm7 = vcmask (!%p458_p9), 58369  }
  0x19   : > { %v2962_v34 = vld [vmem:[%s4098_s8] ss:$0 sm:$0xff] (!%p458_p9)  ;;  %s4109_s25 = smov (!%p458_p9), 120   ;;  %s4113_s30 = smov (!%p458_p9), 121   ;;  %v2972_v44 = vld [vmem:[%s4098_s8 + $0x1] ss:$0 sm:$0xff] (!%p458_p9) }
  0x1a   : > { %s4115_s16 = smov (!%p458_p9), 123   ;;  %v2968_v45 = vld [vmem:[%s4097_s7 + $0x1] ss:$0 sm:$0xff] (!%p458_p9)  ;;  %vm815_vm8 = vcmask (!%p458_p9), 60419   ;;  %vm825_vm9 = vcmask (!%p458_p9), 62469   ;;  %vm830_vm10 = vcmask (!%p458_p9), 63494  }
  0x1b   : > { %v527_v0 = vld [vmem:[%s4139_s4] sm:$0xff] (!%p458_p9)  ;;  %v528_v1 = vld [vmem:[%s4139_s4 + $0x8] sm:$0xff] (!%p458_p9)  ;;  %v529_v2 = vld [vmem:[%s4139_s4 + $0x10] sm:$0xff] (!%p458_p9)  ;;  %s4144_s2 = sld [smem:[#allocation13_spill]] (!%p458_p9)  ;;  %vm835_vm11 = vcmask (!%p458_p9), 64519   ;;  %s4145_s3 = sld [smem:[#allocation14_spill]] (!%p458_p9) }
  0x1c   : > { %v3359_v3 = vpack.i.bf16 (!%p458_p9), %v528_v1, %v527_v0  ;;  %v530_v4 = vld [vmem:[%s4139_s4 + $0x18] sm:$0xff] (!%p458_p9)  ;;  %v3246_v6 = vpack.c.bf16 (!%p458_p9), %v528_v1, %v527_v0  ;;  %s3494_s4 = smov (!%p458_p9), 112   ;;  %s3497_s24 = smov (!%p458_p9), 24   ;;  %vm2748_vm12 = vcmask (!%p458_p9), 523264  }
  0x1d   : > { %v605_v7 = vld [vmem:[%s4140_s1] sm:$0xff]  ;;  %v3364_v9 = vpack.i.bf16 %v530_v4, %v529_v2  ;;  %v3249_v10 = vpack.c.bf16 %v530_v4, %v529_v2  ;;  %s513_s27 = scalar_select %p512_p10, %s3604_s22, 1  ;;  %v606_v20 = vld [vmem:[%s4140_s1 + $0x8] sm:$0xff] }
  0x1e   : > { %3104 = vmatprep.mubr.msk.f32.mxu1 %vm531_vm0, %v605_v7  ;;  %3360 = vrot.lane.b32.xlu0 %v3359_v3, %s3478_s20  ;;  %s3493_s1 = smov 16  }
  0x1f   : > { %3247 = vmatpush3.bf16.msra.mxu0 %v3246_v6  ;;  %s3653_s17 = sshll.u32 %s513_s27, 3  ;;  %s4117_s27 = smov 126  }
  0x20   : > { %3248 = vmatprep.subr.bf16.mxu0 %v3475_v5  ;;  %s515_s26 = scalar_lea.vmem %s4141_s0, %s3653_s17  ;;  %s3492_s0 = smov 88  }
  0x21   : > { %v3659_v11 = vld [vmem:[%s515_s26] sm:$0xff]  ;;  %s4111_s26 = smov 124  }
  0x22   : > { %3365 = vrot.lane.b32.xlu0 %v3364_v9, %s3478_s20  ;;  %s3479_s20 = smov 96  }
  0x23   : > { %3250 = vmatpush3.bf16.msra.mxu0 %v3249_v10 }
  0x24   : > { %3259 = vmatprep.subr.bf16.mxu0 %v3475_v5 }
  0x26   : > { %3094 = vmatmul.mubr.msk.f32.vlgmr.msra.gmra.mrb[0].mxu0 %vm531_vm0, %v3659_v11 }
  0x27   : > { %3111 = vmatprep.mubr.msk.f32.mxu0 %vm3476_vm1, %v3477_v8 }
  0x90   : > { %v3361_v12 = vpop.permute.xlu0 %3360 }
  0x91   : > { %v3363_v13 = vunpack.i.h.bf16 %v3361_v12  ;;  %v3362_v14 = vunpack.i.l.bf16 %v3361_v12  ;;  %v2967_v12 = vld [vmem:[%s4096_s6 + $0x1] ss:$0 sm:$0xff] }
  0x93   : > { %v3251_v15 = vpack.c.bf16 %v3363_v13, %v3362_v14 }
  0x94   : > { %v3366_v16 = vpop.permute.xlu0 %3365 }
  0x95   : > { %v3368_v17 = vunpack.i.h.bf16 %v3366_v16  ;;  %v3367_v18 = vunpack.i.l.bf16 %v3366_v16  ;;  %3252 = vmatprep.subr.bf16.mxu1 %v3251_v15 }
  0x96   : > { %3254 = vmatpush3.bf16.msra.mxu1 %v3251_v15 }
  0x97   : > { %v3255_v19 = vpack.c.bf16 %v3368_v17, %v3367_v18 }
  0x99   : > { %3256 = vmatprep.subr.bf16.mxu1 %v3255_v19 }
  0x9a   : > { %3258 = vmatpush3.bf16.msra.mxu1 %v3255_v19 }
  0x9b   : > { %3119 = vmatprep.subr.mxu1 %v3477_v8 }
  0x9d   : > { %3105 = vmatmul.mubr.msk.f32.vlgmr.msra.gmra.mrb[0].mxu1 %vm531_vm0, %v606_v20 }
  0x9e   : > { %3121 = vmatprep.mubr.msk.f32.mxu1 %vm3476_vm1, %v3477_v8 }
  0xf9   : > { %v3673_v21 = vpop.f32.mrb[0].mxu0 }
  0xfa   : > { %932 = vrot.lane.b32.xlu1 %v3673_v21, %s3479_s20  ;;  %v3095_v22 = vpop.f32.mrb[1].mxu0  ;;  %v709_v25 = vadd.f32 %v2957_v23, %v3673_v21  ;;  %v715_v32 = vadd.f32 %v2958_v31, %v3673_v21  ;;  %v843_v35 = vadd.f32 %v2962_v34, %v3673_v21  ;;  %s4121_s20 = smov 125  }
 0x16c   : > { %v933_v24 = vpop.permute.xlu1 %932 }
 0x16d   : > { %3120 = vmatpush3.xpose.msk.msra.mxu1 %vm716_vm2, %v933_v24 }
 0x16e   : > { %3263 = vmatprep.subr.bf16.mxu1 %v3475_v5 }
 0x170   : > { %3122 = vmatmul.mubr.msk.f32.vlgmr.msra.gmra.mrb[2].mxu1 %vm716_vm2, %v709_v25  ;;  %v3106_v26 = vpop.f32.mrb[0].mxu1 }
 0x171   : > { %3133 = vmatprep.mubr.msk.f32.mxu1 %vm3476_vm1, %v3477_v8  ;;  %v695_v27 = vpop.f32.mrb[1].mxu1 }
 0x172   : > { %v3260_v29 = vpack.c.bf16 %v3106_v26, %v695_v27  ;;  %v3691_v30 = vpack.i.bf16 %v3106_v26, %v695_v27 }
 0x174   : > { %3262 = vmatpush3.bf16.xpose.msk.msra.mxu0 %vm3687_vm3, %v3260_v29 }
 0x175   : > { %3114 = vmatprep.subr.mxu0 %v3477_v8 }
 0x17b   : > { %3112 = vmatmul.mubr.msk.f32.vlgmr.msra.gmra.mrb[2].mxu0 %vm716_vm2, %v715_v32 }
 0x17c   : > { %3115 = vmatpush3.msra.mxu0 %v844_v33  ;;  %3116 = vmatprep.mubr.msk.f32.mxu0 %vm3476_vm1, %v3477_v8  ;;  %v2973_v33 = vld [vmem:[%s4099_s9 + $0x8] sm:$0xff] }
 0x17d   : > { %3124 = vmatprep.subr.mxu0 %v3477_v8 }
 0x17f   : > { %3117 = vmatmul.mubr.msk.f32.vlgmr.msra.gmra.mrb[4].mxu0 %vm716_vm2, %v843_v35 }
 0x180   : > { %3126 = vmatprep.mubr.msk.f32.mxu0 %vm3476_vm1, %v3477_v8 }
 0x243   : > { %v3716_v38 = vpop.f32.mrb[2].mxu1 }
 0x244   : > { %v3123_v39 = vpop.f32.mrb[3].mxu1 }
 0x24e   : > { %v792_v40 = vpop.f32.mrb[2].mxu0 }
 0x24f   : > { %807 = vrot.lane.b32.xlu0 %v792_v40, %s4107_s23  ;;  %797 = vrot.lane.b32.xlu1 %v792_v40, %s4109_s25  ;;  %v3113_v41 = vpop.f32.mrb[3].mxu0  ;;  %s4119_s23 = smov 127   ;;  %s4152_s25 = smov 126  }
 0x252   : > { %v914_v42 = vpop.f32.mrb[4].mxu0 }
 0x253   : > { %817 = vrot.lane.b32.xlu0 %v792_v40, %s4111_s26  ;;  %802 = vrot.lane.b32.xlu1 %v792_v40, %s4113_s30  ;;  %v3118_v43 = vpop.f32.mrb[5].mxu0  ;;  %s3490_s30 = smov 8   ;;  %s519_s26 = scalar_lea.vmem %s4144_s2, %s3653_s17 }
 0x254   : > { %v3745_v55 = vld [vmem:[%s519_s26] sm:$0xff]  ;;  %s3495_s2 = smov 56   ;;  %s3013_s26 = sshll.u32 %s3604_s22, 7 }
 0x255   : > { %v3748_v57 = vsub.f32 1.0, %v3745_v55  ;;  %s3502_s22 = smov [#allocation3]  }
 0x257   : > { %812 = vrot.lane.b32.xlu1 %v792_v40, %s4115_s16  ;;  %926 = vperm.xlu0 %3370, %v914_v42   ;;  %s4147_s16 = smov 121  }
 0x25b   : > { %822 = vrot.lane.b32.xlu1 %v792_v40, %s4121_s20  ;;  %827 = vrot.lane.b32.xlu0 %v792_v40, %s4117_s27  ;;  %s4149_s27 = smov 123  }
 0x25f   : > { %921 = vperm.xlu1 %3369, %v914_v42  }
 0x263   : > { %832 = vrot.lane.b32.xlu1 %v792_v40, %s4119_s23  ;;  %s523_s23 = scalar_lea.vmem %s4145_s3, %s3653_s17  ;;  %s4146_s17 = smov 120  }
 0x264   : > { %v526_v60 = vld [vmem:[%s523_s23] sm:$0xff]  ;;  %s4148_s23 = smov 122   ;;  %s3496_s3 = smov 80  }
 0x265   : > { %v3758_v0 = vmul.f32 1e+30, %v526_v60 }
 0x267   : > { %1244 = vrot.lane.b32.xlu1 %v2972_v44, %s3490_s30 }
 0x26b   : > { %1117 = vrot.lane.b32.xlu1 %v2968_v45, %s3490_s30 }
 0x2c1   : > { %v808_v46 = vpop.permute.xlu0 %807  ;;  %v798_v47 = vpop.permute.xlu1 %797 }
 0x2c2   : > { %811 = vst.msk [vmem:[#allocation2] sm:$0x4] %vm810_vm4, %v808_v46 }
 0x2c3   : > { %801 = vst.msk [vmem:[#allocation2] sm:$0x1] %vm800_vm5, %v798_v47 }
 0x2c5   : > { %v818_v48 = vpop.permute.xlu0 %817  ;;  %v803_v49 = vpop.permute.xlu1 %802 }
 0x2c6   : > { %821 = vst.msk [vmem:[#allocation2] sm:$0x10] %vm820_vm6, %v818_v48 }
 0x2c7   : > { %806 = vst.msk [vmem:[#allocation2] sm:$0x2] %vm805_vm7, %v803_v49 }
 0x2c9   : > { %v813_v50 = vpop.permute.xlu1 %812 }
 0x2ca   : > { %816 = vst.msk [vmem:[#allocation2] sm:$0x8] %vm815_vm8, %v813_v50 }
 0x2cd   : > { %v823_v51 = vpop.permute.xlu1 %822 }
 0x2ce   : > { %826 = vst.msk [vmem:[#allocation2] sm:$0x20] %vm825_vm9, %v823_v51 }
 0x2d6   : > { %v927_v52 = vpop.permute.xlu0 %926 }
 0x2d7   : > { %v929_v59 = vmul.f32 %v927_v52, %v3745_v55 }
 0x2da   : > { %v828_v53 = vpop.permute.xlu0 %827 }
 0x2db   : > { %831 = vst.msk [vmem:[#allocation2] sm:$0x40] %vm830_vm10, %v828_v53 }
 0x2de   : > { %v922_v54 = vpop.permute.xlu1 %921 }
 0x2df   : > { %v924_v58 = vmul.f32 %v922_v54, %v3748_v57 }
 0x2e1   : > { %v930_v62 = vadd.f32 %v929_v59, %v924_v58 }
 0x2e2   : > { %v833_v56 = vpop.permute.xlu1 %832 }
 0x2e3   : > { %836 = vst.msk [vmem:[#allocation2] sm:$0x80] %vm835_vm11, %v833_v56 }
 0x2e6   : > { %v1245_v6 = vpop.permute.xlu1 %1244 }
 0x2e7   : > { %v1247_v7 = vadd.f32 %v1245_v6, %v3673_v21 }
 0x2ea   : > { %v837_v61 = vld [vmem:[#allocation2] sm:$0xff]  ;;  %v1118_v9 = vpop.permute.xlu1 %1117 }
 0x2eb   : > { %v1006_v63 = vadd.f32 %v3716_v38, %v837_v61  ;;  %v1120_v10 = vadd.f32 %v1118_v9, %v3673_v21 }
 0x2ed   : > { %v1009_v1 = vadd.f32 %v1006_v63, %v930_v62 }
 0x2ef   : > { %v1010_v2 = vmul.f32 0.35355338, %v1009_v1 }
 0x2f1   : > { %v1012_v3 = vsub.f32 %v1010_v2, %v3758_v0 }
 0x2f3   : > { %v1013_v4 = vsel %vm716_vm2, %v1012_v3, -inf }
 0x2f4   : > { %1014 = vmax.xlane.f32.xlu0 %v1013_v4  ;;  %v2981_v4 = vld [vmem:[%s4097_s7 + $0x2] ss:$0 sm:$0xff] }
 0x30a   : > { %3372 = vrot.lane.b32.xlu0 %v3691_v30, %s4146_s17 }
 0x30e   : > { %1251 = vrot.lane.b32.xlu0 %v1247_v7, %s4146_s17 }
 0x312   : > { %1122 = vrot.lane.b32.xlu0 %v1120_v10, %s4146_s17 }
 0x316   : > { %1107 = vrot.lane.b32.xlu0 %v2967_v12, %s3490_s30  ;;  %s3491_s30 = smov 64  }
 0x381   : > { %v1015_v13 = vpop.xlane.xlu0 %1014 }
 0x382   : > { %v1016_v14 = vsub.f32 %v1012_v3, %v1015_v13  ;;  %v2985_v3 = vld [vmem:[%s4098_s8 + $0x2] ss:$0 sm:$0xff] }
 0x383   : > { %v2980_v13 = vld [vmem:[%s4096_s6 + $0x2] ss:$0 sm:$0xff] }
 0x384   : > { %v1017_v15 = vmul.f32 1.442695, %v1016_v14 }
 0x385   : > { %v3373_v16 = vpop.permute.xlu0 %3372 }
 0x386   : > { %3389 = vpow2.f32 %v1017_v15  ;;  %v3375_v17 = vunpack.i.h.bf16 %v3373_v16  ;;  %v3374_v18 = vunpack.i.l.bf16 %v3373_v16 }
 0x388   : > { %v3264_v19 = vpack.c.bf16 %v3375_v17, %v3374_v18  ;;  %v1506_v18 = vld [vmem:[%s4095_s5 + $0x8] sm:$0xff] }
 0x389   : > { %v1252_v20 = vpop.permute.xlu0 %1251 }
 0x38a   : > { %3266 = vmatpush3.bf16.xpose.msk.msra.mxu1 %vm3687_vm3, %v3264_v19 }
 0x38b   : > { %3146 = vmatprep.subr.mxu1 %v3477_v8 }
 0x38d   : > { %v1123_v22 = vpop.permute.xlu0 %1122 }
 0x390   : > { %v3390_v23 = vpop.eup %3389 }
 0x391   : > { %3134 = vmatmul.mubr.msk.f32.vlgmr.msra.gmra.mrb[4].mxu1 %vm716_vm2, %v1123_v22  ;;  %v1108_v24 = vpop.permute.xlu0 %1107  ;;  %v1019_v25 = vsel %vm716_vm2, %v3390_v23, 0.0 }
 0x392   : > { %v1110_v26 = vadd.f32 %v1108_v24, %v3673_v21  ;;  %1020 = vadd.xlane.f32.xlu1 %v1019_v25  ;;  %3148 = vmatprep.mubr.msk.f32.mxu1 %vm3476_vm1, %v3477_v8 }
 0x394   : > { %1338 = vrot.lane.b32.xlu0 %v1110_v26, %s4146_s17 }
 0x3a3   : > { %1024 = vrot.lane.b32.xlu1 %v3673_v21, %s3491_s30  ;;  %s4150_s30 = smov 124  }
 0x3a7   : > { %1340 = vrot.lane.b32.xlu1 %v3673_v21, %s3492_s0  ;;  %s4151_s0 = smov 127  }
 0x406   : > { %v1339_v35 = vpop.permute.xlu0 %1338 }
 0x41f   : > { %v1021_v27 = vpop.xlane.xlu1 %1020 }
 0x420   : > { %3391 = vrcp.f32 %v1021_v27  ;;  %v1100_v27 = vld [vmem:[%s4095_s5] sm:$0xff] }
 0x423   : > { %v1025_v29 = vpop.permute.xlu1 %1024 }
 0x424   : > { %3125 = vmatpush3.msra.mxu0 %v1025_v29 }
 0x425   : > { %3136 = vmatprep.subr.mxu0 %v3477_v8 }
 0x427   : > { %v1341_v34 = vpop.permute.xlu1 %1340 }
 0x42a   : > { %v3392_v31 = vpop.eup %3391 }
 0x42b   : > { %v1023_v32 = vmul.f32 %v3392_v31, %v3390_v23  ;;  %v2986_v31 = vld [vmem:[%s4099_s9 + $0x10] sm:$0xff] }
 0x42d   : > { %3127 = vmatmul.mubr.msk.f32.vlgmr.msra.gmra.mrb[6].mxu0 %vm716_vm2, %v1023_v32 }
 0x42e   : > { %3137 = vmatpush3.msra.mxu0 %v2973_v33  ;;  %3138 = vmatprep.mubr.msk.f32.mxu0 %vm3476_vm1, %v3477_v8 }
 0x42f   : > { %3141 = vmatprep.subr.mxu0 %v3477_v8 }
 0x431   : > { %3139 = vmatmul.mubr.msk.f32.vlgmr.msra.gmra.mrb[8].mxu0 %vm716_vm2, %v1252_v20 }
 0x432   : > { %3143 = vmatprep.mubr.msk.f32.mxu0 %vm3476_vm1, %v3477_v8 }
 0x435   : > { %3142 = vmatpush3.xpose.msk.msra.mxu0 %vm716_vm2, %v1341_v34 }
 0x436   : > { %3151 = vmatprep.subr.mxu0 %v3477_v8 }
 0x438   : > { %3144 = vmatmul.mubr.msk.f32.vlgmr.msra.gmra.mrb[10].mxu0 %vm716_vm2, %v1339_v35 }
 0x439   : > { %3153 = vmatprep.mubr.msk.f32.mxu0 %vm3476_vm1, %v3477_v8  ;;  %3152 = vmatpush3.msra.mxu0 %v1506_v18 }
 0x43a   : > { %3267 = vmatprep.subr.bf16.mxu0 %v3475_v5 }
 0x464   : > { %v1200_v38 = vpop.f32.mrb[4].mxu1 }
 0x465   : > { %1205 = vrot.lane.b32.xlu1 %v1200_v38, %s4146_s17  ;;  %v3135_v39 = vpop.f32.mrb[5].mxu1  ;;  %1209 = vrot.lane.b32.xlu0 %v1200_v38, %s4147_s16 }
 0x469   : > { %1213 = vrot.lane.b32.xlu1 %v1200_v38, %s4148_s23  ;;  %1217 = vrot.lane.b32.xlu0 %v1200_v38, %s4149_s27 }
 0x46d   : > { %1221 = vrot.lane.b32.xlu1 %v1200_v38, %s4150_s30  ;;  %1225 = vrot.lane.b32.xlu0 %v1200_v38, %s4121_s20  ;;  %s3500_s20 = smov 72  }
 0x4d7   : > { %v1210_v40 = vpop.permute.xlu0 %1209  ;;  %v1206_v41 = vpop.permute.xlu1 %1205 }
 0x4d8   : > { %1212 = vst.msk [vmem:[#allocation2] sm:$0x2] %vm805_vm7, %v1210_v40 }
 0x4d9   : > { %1208 = vst.msk [vmem:[#allocation2] sm:$0x1] %vm800_vm5, %v1206_v41 }
 0x4db   : > { %v1218_v42 = vpop.permute.xlu0 %1217  ;;  %v1214_v43 = vpop.permute.xlu1 %1213 }
 0x4dc   : > { %1220 = vst.msk [vmem:[#allocation2] sm:$0x8] %vm815_vm8, %v1218_v42 }
 0x4dd   : > { %1216 = vst.msk [vmem:[#allocation2] sm:$0x4] %vm810_vm4, %v1214_v43 }
 0x4df   : > { %v1226_v44 = vpop.permute.xlu0 %1225  ;;  %v1222_v45 = vpop.permute.xlu1 %1221 }
 0x4e0   : > { %1228 = vst.msk [vmem:[#allocation2] sm:$0x20] %vm825_vm9, %v1226_v44 }
 0x4e1   : > { %1224 = vst.msk [vmem:[#allocation2] sm:$0x10] %vm820_vm6, %v1222_v45 }
 0x500   : > { %v3811_v46 = vpop.f32.mrb[6].mxu0 }
 0x501   : > { %v3128_v47 = vpop.f32.mrb[7].mxu0 }
 0x504   : > { %v1321_v48 = vpop.f32.mrb[8].mxu0 }
 0x505   : > { %1332 = vperm.xlu0 %3370, %v1321_v48   ;;  %1327 = vperm.xlu1 %3369, %v1321_v48   ;;  %v3140_v49 = vpop.f32.mrb[9].mxu0 }
 0x509   : > { %1233 = vrot.lane.b32.xlu0 %v1200_v38, %s4151_s0  ;;  %1229 = vrot.lane.b32.xlu1 %v1200_v38, %s4152_s25 }
 0x50a   : > { %3381 = vset.pattern.permute.xlu0 %v3481_v37  ;;  %3382 = vset.pattern.permute.xlu1 %v3480_v36 }
 0x50b   : > { %v1412_v50 = vpop.f32.mrb[10].mxu0 }
 0x50c   : > { %v3145_v51 = vpop.f32.mrb[11].mxu0 }
 0x584   : > { %v1333_v52 = vpop.permute.xlu0 %1332  ;;  %v1328_v53 = vpop.permute.xlu1 %1327 }
 0x585   : > { %v1335_v58 = vmul.f32 %v1333_v52, %v3745_v55  ;;  %v1330_v59 = vmul.f32 %v1328_v53, %v3748_v57 }
 0x587   : > { %v1336_v61 = vadd.f32 %v1335_v58, %v1330_v59 }
 0x588   : > { %v1234_v54 = vpop.permute.xlu0 %1233  ;;  %v1230_v56 = vpop.permute.xlu1 %1229 }
 0x589   : > { %1236 = vst.msk [vmem:[#allocation2] sm:$0x80] %vm835_vm11, %v1234_v54 }
 0x58a   : > { %1232 = vst.msk [vmem:[#allocation2] sm:$0x40] %vm830_vm10, %v1230_v56 }
 0x591   : > { %v1237_v60 = vld [vmem:[#allocation2] sm:$0xff] }
 0x592   : > { %v1413_v62 = vadd.f32 %v1412_v50, %v1237_v60 }
 0x594   : > { %v1416_v37 = vadd.f32 %v1413_v62, %v1336_v61 }
 0x596   : > { %v1417_v63 = vmul.f32 0.35355338, %v1416_v37 }
 0x598   : > { %v1418_v1 = vsub.f32 %v1417_v63, %v3758_v0 }
 0x59a   : > { %v1419_v2 = vsel %vm716_vm2, %v1418_v1, -inf }
 0x59b   : > { %1420 = vmax.xlane.f32.xlu1 %v1419_v2 }
 0x5ac   : > { %1796 = vrot.lane.b32.xlu1 %v2985_v3, %s3493_s1 }
 0x5b0   : > { %1669 = vrot.lane.b32.xlu1 %v2981_v4, %s3493_s1 }
 0x628   : > { %v1421_v6 = vpop.xlane.xlu1 %1420 }
 0x629   : > { %v1422_v7 = vsub.f32 %v1418_v1, %v1421_v6 }
 0x62b   : > { %v1423_v9 = vmul.f32 1.442695, %v1422_v7 }
 0x62c   : > { %v1797_v10 = vpop.permute.xlu1 %1796 }
 0x62d   : > { %3393 = vpow2.f32 %v1423_v9  ;;  %v1799_v12 = vadd.f32 %v1797_v10, %v3673_v21 }
 0x62f   : > { %1803 = vrot.lane.b32.xlu1 %v1799_v12, %s3494_s4 }
 0x630   : > { %v1670_v16 = vpop.permute.xlu1 %1669 }
 0x631   : > { %v1672_v17 = vadd.f32 %v1670_v16, %v3673_v21 }
 0x633   : > { %1659 = vrot.lane.b32.xlu1 %v2980_v13, %s3493_s1  ;;  %v2997_v13 = vld [vmem:[%s4098_s8 + $0x3] ss:$0 sm:$0xff] }
 0x637   : > { %v3394_v14 = vpop.eup %3393 }
 0x638   : > { %v1425_v15 = vsel %vm716_vm2, %v3394_v14, 0.0 }
 0x639   : > { %1426 = vadd.xlane.f32.xlu0 %v1425_v15 }
 0x64f   : > { %1430 = vrot.lane.b32.xlu0 %v3673_v21, %s3495_s2  ;;  %s4153_s2 = smov 125  }
 0x653   : > { %3377 = vrot.lane.b32.xlu0 %v3691_v30, %s3494_s4 }
 0x657   : > { %1674 = vrot.lane.b32.xlu0 %v1672_v17, %s3494_s4 }
 0x65b   : > { %1892 = vrot.lane.b32.xlu0 %v3673_v21, %s3496_s3  ;;  %s3499_s3 = smov 48  }
 0x6a1   : > { %v1804_v19 = vpop.permute.xlu1 %1803 }
 0x6a5   : > { %v1660_v20 = vpop.permute.xlu1 %1659 }
 0x6a6   : > { %v1662_v22 = vadd.f32 %v1660_v20, %v3673_v21  ;;  %v2992_v20 = vld [vmem:[%s4096_s6 + $0x3] ss:$0 sm:$0xff] }
 0x6a8   : > { %1890 = vrot.lane.b32.xlu1 %v1662_v22, %s3494_s4  ;;  %s3498_s4 = smov 104  }
 0x6c6   : > { %v1427_v23 = vpop.xlane.xlu0 %1426 }
 0x6c7   : > { %3395 = vrcp.f32 %v1427_v23 }
 0x6ca   : > { %v1431_v24 = vpop.permute.xlu0 %1430 }
 0x6cb   : > { %3147 = vmatpush3.msra.mxu1 %v1431_v24 }
 0x6cc   : > { %3156 = vmatprep.subr.mxu1 %v3477_v8 }
 0x6ce   : > { %v3378_v29 = vpop.permute.xlu0 %3377 }
 0x6cf   : > { %v3380_v35 = vunpack.i.h.bf16 %v3378_v29  ;;  %v3379_v38 = vunpack.i.l.bf16 %v3378_v29 }
 0x6d1   : > { %v3396_v25 = vpop.eup %3395  ;;  %v3268_v39 = vpack.c.bf16 %v3380_v35, %v3379_v38 }
 0x6d2   : > { %v1429_v26 = vmul.f32 %v3396_v25, %v3394_v14  ;;  %v1675_v32 = vpop.permute.xlu0 %1674  ;;  %v2993_v14 = vld [vmem:[%s4097_s7 + $0x3] ss:$0 sm:$0xff] }
 0x6d4   : > { %3149 = vmatmul.mubr.msk.f32.vlgmr.msra.gmra.mrb[6].mxu1 %vm716_vm2, %v1429_v26  ;;  %v2058_v26 = vld [vmem:[%s4095_s5 + $0x10] sm:$0xff] }
 0x6d5   : > { %3157 = vmatpush3.msra.mxu1 %v1100_v27  ;;  %3158 = vmatprep.mubr.msk.f32.mxu1 %vm3476_vm1, %v3477_v8 }
 0x6d6   : > { %3168 = vmatprep.subr.mxu1 %v3477_v8  ;;  %v1893_v33 = vpop.permute.xlu0 %1892 }
 0x6d8   : > { %3159 = vmatmul.mubr.msk.f32.vlgmr.msra.gmra.mrb[8].mxu1 %vm716_vm2, %v3811_v46 }
 0x6d9   : > { %3169 = vmatpush3.msra.mxu1 %v2986_v31  ;;  %3170 = vmatprep.mubr.msk.f32.mxu1 %vm3476_vm1, %v3477_v8 }
 0x6da   : > { %3173 = vmatprep.subr.mxu1 %v3477_v8 }
 0x6dc   : > { %3171 = vmatmul.mubr.msk.f32.vlgmr.msra.gmra.mrb[10].mxu1 %vm716_vm2, %v1804_v19 }
 0x6dd   : > { %3175 = vmatprep.mubr.msk.f32.mxu1 %vm3476_vm1, %v3477_v8 }
 0x6e0   : > { %3174 = vmatpush3.xpose.msk.msra.mxu1 %vm716_vm2, %v1893_v33 }
 0x6e1   : > { %3183 = vmatprep.subr.mxu1 %v3477_v8 }
 0x71a   : > { %v1891_v34 = vpop.permute.xlu1 %1890 }
 0x71b   : > { %3176 = vmatmul.mubr.msk.f32.vlgmr.msra.gmra.mrb[12].mxu1 %vm716_vm2, %v1891_v34 }
 0x71c   : > { %3185 = vmatprep.mubr.msk.f32.mxu1 %vm3476_vm1, %v3477_v8  ;;  %3184 = vmatpush3.msra.mxu1 %v2058_v26 }
 0x71d   : > { %3195 = vmatprep.subr.mxu1 %v3477_v8 }
 0x7a7   : > { %v1502_v40 = vpop.f32.mrb[6].mxu1 }
 0x7a8   : > { %v3150_v41 = vpop.f32.mrb[7].mxu1  ;;  %3154 = vmatmul.mubr.msk.f32.vlgmr.msra.gmra.mrb[12].mxu0 %vm716_vm2, %v1502_v40 }
 0x7a9   : > { %3270 = vmatpush3.bf16.xpose.msk.msra.mxu0 %vm3687_vm3, %v3268_v39  ;;  %3165 = vmatprep.mubr.msk.f32.mxu0 %vm3476_vm1, %v3477_v8 }
 0x7aa   : > { %3178 = vmatprep.subr.mxu0 %v3477_v8 }
 0x7ab   : > { %v1649_v42 = vpop.f32.mrb[8].mxu1 }
 0x7ac   : > { %v3160_v43 = vpop.f32.mrb[9].mxu1 }
 0x7af   : > { %v1873_v44 = vpop.f32.mrb[10].mxu1 }
 0x7b0   : > { %3166 = vmatmul.mubr.msk.f32.vlgmr.msra.gmra.mrb[14].mxu0 %vm716_vm2, %v1675_v32  ;;  %1879 = vperm.xlu0 %3381, %v1873_v44   ;;  %v3172_v45 = vpop.f32.mrb[11].mxu1 }
 0x7b1   : > { %1884 = vperm.xlu1 %3382, %v1873_v44   ;;  %3180 = vmatprep.mubr.msk.f32.mxu0 %vm3476_vm1, %v3477_v8 }
 0x7ee   : > { %v1964_v46 = vpop.f32.mrb[12].mxu1 }
 0x7ef   : > { %v3177_v47 = vpop.f32.mrb[13].mxu1 }
 0x82f   : > { %v1880_v53 = vpop.permute.xlu0 %1879 }
 0x830   : > { %v1885_v54 = vpop.permute.xlu1 %1884  ;;  %v1882_v1 = vmul.f32 %v1880_v53, %v3748_v57 }
 0x831   : > { %v1887_v2 = vmul.f32 %v1885_v54, %v3745_v55 }
 0x833   : > { %v1888_v4 = vadd.f32 %v1887_v2, %v1882_v1 }
 0x87b   : > { %v1576_v48 = vpop.f32.mrb[12].mxu0 }
 0x87c   : > { %v3876_v49 = vadd.f32 %v1649_v42, %v1576_v48  ;;  %v3155_v50 = vpop.f32.mrb[13].mxu0  ;;  %v2998_v42 = vld [vmem:[%s4099_s9 + $0x18] sm:$0xff] }
 0x883   : > { %v1752_v51 = vpop.f32.mrb[14].mxu0 }
 0x884   : > { %1761 = vrot.lane.b32.xlu0 %v1752_v51, %s4147_s16  ;;  %1757 = vrot.lane.b32.xlu1 %v1752_v51, %s4146_s17  ;;  %v3167_v52 = vpop.f32.mrb[15].mxu0 }
 0x888   : > { %1769 = vrot.lane.b32.xlu0 %v1752_v51, %s4149_s27  ;;  %1765 = vrot.lane.b32.xlu1 %v1752_v51, %s4148_s23 }
 0x88c   : > { %1777 = vrot.lane.b32.xlu0 %v1752_v51, %s4153_s2  ;;  %1773 = vrot.lane.b32.xlu1 %v1752_v51, %s4150_s30 }
 0x890   : > { %1785 = vrot.lane.b32.xlu0 %v1752_v51, %s4151_s0  ;;  %1781 = vrot.lane.b32.xlu1 %v1752_v51, %s4152_s25 }
 0x8f6   : > { %v1762_v56 = vpop.permute.xlu0 %1761  ;;  %v1758_v58 = vpop.permute.xlu1 %1757 }
 0x8f7   : > { %1764 = vst.msk [vmem:[#allocation2] sm:$0x2] %vm805_vm7, %v1762_v56 }
 0x8f8   : > { %1760 = vst.msk [vmem:[#allocation2] sm:$0x1] %vm800_vm5, %v1758_v58 }
 0x8fa   : > { %v1770_v59 = vpop.permute.xlu0 %1769  ;;  %v1766_v60 = vpop.permute.xlu1 %1765 }
 0x8fb   : > { %1772 = vst.msk [vmem:[#allocation2] sm:$0x8] %vm815_vm8, %v1770_v59 }
 0x8fc   : > { %1768 = vst.msk [vmem:[#allocation2] sm:$0x4] %vm810_vm4, %v1766_v60 }
 0x8fe   : > { %v1778_v61 = vpop.permute.xlu0 %1777  ;;  %v1774_v62 = vpop.permute.xlu1 %1773 }
 0x8ff   : > { %1780 = vst.msk [vmem:[#allocation2] sm:$0x20] %vm825_vm9, %v1778_v61 }
 0x900   : > { %1776 = vst.msk [vmem:[#allocation2] sm:$0x10] %vm820_vm6, %v1774_v62 }
 0x902   : > { %v1786_v37 = vpop.permute.xlu0 %1785  ;;  %v1782_v63 = vpop.permute.xlu1 %1781 }
 0x903   : > { %1788 = vst.msk [vmem:[#allocation2] sm:$0x80] %vm835_vm11, %v1786_v37 }
 0x904   : > { %1784 = vst.msk [vmem:[#allocation2] sm:$0x40] %vm830_vm10, %v1782_v63 }
 0x90b   : > { %v1789_v3 = vld [vmem:[#allocation2] sm:$0xff] }
 0x90c   : > { %v1965_v6 = vadd.f32 %v1964_v46, %v1789_v3 }
 0x90e   : > { %v1968_v7 = vadd.f32 %v1965_v6, %v1888_v4 }
 0x910   : > { %v1969_v9 = vmul.f32 0.35355338, %v1968_v7 }
 0x912   : > { %v1970_v10 = vsub.f32 %v1969_v9, %v3758_v0 }
 0x914   : > { %v1971_v12 = vsel %vm716_vm2, %v1970_v10, -inf }
 0x915   : > { %1972 = vmax.xlane.f32.xlu1 %v1971_v12 }
 0x926   : > { %2276 = vrot.lane.b32.xlu1 %v2997_v13, %s3497_s24 }
 0x92a   : > { %2149 = vrot.lane.b32.xlu1 %v2993_v14, %s3497_s24 }
 0x9a2   : > { %v1973_v15 = vpop.xlane.xlu1 %1972 }
 0x9a3   : > { %v1974_v16 = vsub.f32 %v1970_v10, %v1973_v15 }
 0x9a5   : > { %v1975_v17 = vmul.f32 1.442695, %v1974_v16 }
 0x9a6   : > { %v2277_v18 = vpop.permute.xlu1 %2276 }
 0x9a7   : > { %3397 = vpow2.f32 %v1975_v17  ;;  %v2279_v19 = vadd.f32 %v2277_v18, %v3673_v21 }
 0x9a9   : > { %2283 = vrot.lane.b32.xlu1 %v2279_v19, %s3498_s4 }
 0x9aa   : > { %v2150_v24 = vpop.permute.xlu1 %2149 }
 0x9ab   : > { %v2152_v25 = vadd.f32 %v2150_v24, %v3673_v21 }
 0x9ad   : > { %2139 = vrot.lane.b32.xlu1 %v2992_v20, %s3497_s24  ;;  %s4047_s24 = scalar_lea.hbm %s4105_s15, %s3013_s26 }
 0x9b1   : > { %v3398_v22 = vpop.eup %3397 }
 0x9b2   : > { %v1977_v23 = vsel %vm716_vm2, %v3398_v22, 0.0 }
 0x9b3   : > { %1978 = vadd.xlane.f32.xlu0 %v1977_v23 }
 0x9c9   : > { %1982 = vrot.lane.b32.xlu0 %v3673_v21, %s3499_s3 }
 0x9cd   : > { %3384 = vrot.lane.b32.xlu0 %v3691_v30, %s3498_s4 }
 0x9d1   : > { %2154 = vrot.lane.b32.xlu0 %v2152_v25, %s3498_s4 }
 0x9d5   : > { %2372 = vrot.lane.b32.xlu0 %v3673_v21, %s3500_s20 }
 0xa1b   : > { %v2284_v27 = vpop.permute.xlu1 %2283 }
 0xa1f   : > { %v2140_v29 = vpop.permute.xlu1 %2139 }
 0xa20   : > { %v2142_v31 = vadd.f32 %v2140_v29, %v3673_v21 }
 0xa22   : > { %2370 = vrot.lane.b32.xlu1 %v2142_v31, %s3498_s4 }
 0xa40   : > { %v1979_v32 = vpop.xlane.xlu0 %1978 }
 0xa41   : > { %3399 = vrcp.f32 %v1979_v32 }
 0xa44   : > { %v1983_v30 = vpop.permute.xlu0 %1982 }
 0xa45   : > { %3179 = vmatpush3.msra.mxu0 %v1983_v30 }
 0xa46   : > { %3271 = vmatprep.subr.bf16.mxu0 %v3475_v5 }
 0xa48   : > { %v3385_v33 = vpop.permute.xlu0 %3384 }
 0xa49   : > { %v3387_v34 = vunpack.i.h.bf16 %v3385_v33  ;;  %v3386_v35 = vunpack.i.l.bf16 %v3385_v33 }
 0xa4b   : > { %v3400_v38 = vpop.eup %3399  ;;  %v3272_v39 = vpack.c.bf16 %v3387_v34, %v3386_v35  ;;  %v2640_v34 = vld [vmem:[%s4101_s11] sm:$0xff] }
 0xa4c   : > { %v1981_v40 = vmul.f32 %v3400_v38, %v3398_v22  ;;  %v2155_v41 = vpop.permute.xlu0 %2154  ;;  %v2643_v38 = vld [vmem:[%s4101_s11 + $0x18] sm:$0xff] }
 0xa4e   : > { %3181 = vmatmul.mubr.msk.f32.vlgmr.msra.gmra.mrb[16].mxu0 %vm716_vm2, %v1981_v40 }
 0xa4f   : > { %3274 = vmatpush3.bf16.xpose.msk.msra.mxu0 %vm3687_vm3, %v3272_v39  ;;  %3192 = vmatprep.mubr.msk.f32.mxu0 %vm3476_vm1, %v3477_v8 }
 0xa50   : > { %3205 = vmatprep.subr.mxu0 %v3477_v8  ;;  %v2373_v28 = vpop.permute.xlu0 %2372 }
 0xa56   : > { %3193 = vmatmul.mubr.msk.f32.vlgmr.msra.gmra.mrb[18].mxu0 %vm716_vm2, %v2155_v41 }
 0xa57   : > { %3207 = vmatprep.mubr.msk.f32.mxu0 %vm3476_vm1, %v3477_v8 }
 0xa94   : > { %v2371_v47 = vpop.permute.xlu1 %2370 }
 0xb21   : > { %v2054_v43 = vpop.f32.mrb[16].mxu0 }
 0xb22   : > { %v3182_v44 = vpop.f32.mrb[17].mxu0  ;;  %3186 = vmatmul.mubr.msk.f32.vlgmr.msra.gmra.mrb[14].mxu1 %vm716_vm2, %v2054_v43 }
 0xb23   : > { %3196 = vmatpush3.msra.mxu1 %v2998_v42  ;;  %3197 = vmatprep.mubr.msk.f32.mxu1 %vm3476_vm1, %v3477_v8  ;;  %v3004_v44 = vld [vmem:[%s4100_s10] ss:$0 sm:$0xff] }
 0xb24   : > { %3200 = vmatprep.subr.mxu1 %v3477_v8 }
 0xb26   : > { %3198 = vmatmul.mubr.msk.f32.vlgmr.msra.gmra.mrb[16].mxu1 %vm716_vm2, %v2284_v27 }
 0xb27   : > { %3202 = vmatprep.mubr.msk.f32.mxu1 %vm3476_vm1, %v3477_v8 }
 0xb29   : > { %v2232_v45 = vpop.f32.mrb[18].mxu0 }
 0xb2a   : > { %3201 = vmatpush3.xpose.msk.msra.mxu1 %vm716_vm2, %v2373_v28  ;;  %2241 = vrot.lane.b32.xlu1 %v2232_v45, %s4147_s16  ;;  %v3194_v46 = vpop.f32.mrb[19].mxu0  ;;  %s3415_s16 = sshll.u32 %s3502_s22, 4  ;;  %s3416_s16 = int_to_ptr.vmem [resolvable:$false] %s3415_s16 }
 0xb2b   : > { %2237 = vrot.lane.b32.xlu0 %v2232_v45, %s4146_s17  ;;  %3210 = vmatprep.subr.mxu1 %v3477_v8  ;;  %s3501_s17 = smov 40  }
 0xb2d   : > { %3203 = vmatmul.mubr.msk.f32.vlgmr.msra.gmra.mrb[18].mxu1 %vm716_vm2, %v2371_v47 }
 0xb2e   : > { %2249 = vrot.lane.b32.xlu1 %v2232_v45, %s4149_s27  ;;  %3212 = vmatprep.mubr.msk.f32.mxu1 %vm3476_vm1, %v3477_v8  ;;  %s509_s27 = sand.u32 1, %s3465_s19  }
 0xb2f   : > { %2245 = vrot.lane.b32.xlu0 %v2232_v45, %s4148_s23  ;;  %s2850_s29 = scalar_lea.sflag [#allocation4], %s509_s27  ;;  %s3417_s23 = scalar_lea.vmem %s3416_s16, 256 }
 0xb32   : > { %2257 = vrot.lane.b32.xlu1 %v2232_v45, %s4153_s2 }
 0xb33   : > { %2253 = vrot.lane.b32.xlu0 %v2232_v45, %s4150_s30  ;;  %s2950_s30 = sshll.u32 %s509_s27, 3 }
 0xb34   : > { %s511_s3 = scalar_lea.vmem [#allocation3], %s2950_s30 }
 0xb35   : > { %s2863_s20 = sshll.u32 %s511_s3, 4  ;;  %s4049_s20 = int_to_ptr.vmem [resolvable:$true] %s2863_s20 }
 0xb36   : > { %p3418_p0 = scmp.lt.s32.totalorder %s4049_s20, %s3416_s16 }
 0xb9c   : > { %v2242_v48 = vpop.permute.xlu1 %2241 }
 0xb9d   : > { %2244 = vst.msk [vmem:[#allocation2] sm:$0x2] %vm805_vm7, %v2242_v48  ;;  %v2238_v50 = vpop.permute.xlu0 %2237  ;;  %v2733_v48 = vld [vmem:[%s4103_s13] sm:$0xff] }
 0xb9e   : > { %2240 = vst.msk [vmem:[#allocation2] sm:$0x1] %vm800_vm5, %v2238_v50  ;;  %v2734_v50 = vld [vmem:[%s4103_s13 + $0x8] sm:$0xff] }
 0xba0   : > { %v2250_v51 = vpop.permute.xlu1 %2249 }
 0xba1   : > { %2252 = vst.msk [vmem:[#allocation2] sm:$0x8] %vm815_vm8, %v2250_v51  ;;  %v2246_v52 = vpop.permute.xlu0 %2245  ;;  %v3282_v51 = vpack.c.bf16 %v2734_v50, %v2733_v48 }
 0xba2   : > { %2248 = vst.msk [vmem:[#allocation2] sm:$0x4] %vm810_vm4, %v2246_v52  ;;  %v2735_v52 = vld [vmem:[%s4103_s13 + $0x10] sm:$0xff] }
 0xba4   : > { %v2258_v53 = vpop.permute.xlu1 %2257 }
 0xba5   : > { %2260 = vst.msk [vmem:[#allocation2] sm:$0x20] %vm825_vm9, %v2258_v53  ;;  %v2254_v54 = vpop.permute.xlu0 %2253  ;;  %v2736_v53 = vld [vmem:[%s4103_s13 + $0x18] sm:$0xff] }
 0xba6   : > { %2256 = vst.msk [vmem:[#allocation2] sm:$0x10] %vm820_vm6, %v2254_v54  ;;  %v3285_v54 = vpack.c.bf16 %v2736_v53, %v2735_v52 }
 0xbf5   : > { %v2128_v56 = vpop.f32.mrb[14].mxu1 }
 0xbf6   : > { %v2132_v58 = vadd.f32 %v2128_v56, %v3876_v49  ;;  %v3187_v59 = vpop.f32.mrb[15].mxu1  ;;  %v2737_v56 = vld [vmem:[%s4103_s13 + $0x20] sm:$0xff] }
 0xbf9   : > { %v2353_v60 = vpop.f32.mrb[16].mxu1 }
 0xbfa   : > { %v3199_v61 = vpop.f32.mrb[17].mxu1  ;;  %2364 = vperm.xlu1 %3382, %v2353_v60   ;;  %2359 = vperm.xlu0 %3381, %v2353_v60   ;;  %v2739_v60 = vld [vmem:[%s4103_s13 + $0x30] sm:$0xff] }
 0xbfb   : > { %v2740_v61 = vld [vmem:[%s4103_s13 + $0x38] sm:$0xff] }
 0xbfe   : > { %2265 = vrot.lane.b32.xlu1 %v2232_v45, %s4151_s0  ;;  %2261 = vrot.lane.b32.xlu0 %v2232_v45, %s4152_s25  ;;  %v3005_v45 = vld [vmem:[%s4100_s10 + $0x1] ss:$0 sm:$0xff] }
 0xbff   : > { %3388 = vset.pattern.permute.xlu0 %v3480_v36 }
 0xc00   : > { %v2444_v62 = vpop.f32.mrb[18].mxu1 }
 0xc01   : > { %v3204_v37 = vpop.f32.mrb[19].mxu1 }
 0xc02   : > { %v3006_v37 = vld [vmem:[%s4102_s12] ss:$0 sm:$0xff] }
 0xc79   : > { %v2365_v63 = vpop.permute.xlu1 %2364  ;;  %v2360_v1 = vpop.permute.xlu0 %2359 }
 0xc7a   : > { %v2367_v49 = vmul.f32 %v2365_v63, %v3745_v55  ;;  %v2362_v4 = vmul.f32 %v2360_v1, %v3748_v57 }
 0xc7c   : > { %v2368_v7 = vadd.f32 %v2367_v49, %v2362_v4 }
 0xc7d   : > { %v2266_v2 = vpop.permute.xlu1 %2265  ;;  %v2262_v3 = vpop.permute.xlu0 %2261 }
 0xc7e   : > { %2268 = vst.msk [vmem:[#allocation2] sm:$0x80] %vm835_vm11, %v2266_v2 }
 0xc7f   : > { %2264 = vst.msk [vmem:[#allocation2] sm:$0x40] %vm830_vm10, %v2262_v3 }
 0xc86   : > { %v2269_v6 = vld [vmem:[#allocation2] sm:$0xff] }
 0xc87   : > { %v2445_v9 = vadd.f32 %v2444_v62, %v2269_v6  ;;  %v3291_v62 = vpack.c.bf16 %v2740_v61, %v2739_v60 }
 0xc89   : > { %v2448_v10 = vadd.f32 %v2445_v9, %v2368_v7 }
 0xc8b   : > { %v2449_v12 = vmul.f32 0.35355338, %v2448_v10 }
 0xc8d   : > { %v2450_v36 = vsub.f32 %v2449_v12, %v3758_v0  ;;  %v2538_v0 = vld [vmem:[%s4095_s5 + $0x18] sm:$0xff] }
 0xc8e   : > { %3211 = vmatpush3.msra.mxu1 %v2538_v0 }
 0xc8f   : > { %v2451_v13 = vsel %vm716_vm2, %v2450_v36, -inf  ;;  %3281 = vmatprep.subr.bf16.mxu1 %v3475_v5 }
 0xc90   : > { %2452 = vmax.xlane.f32.xlu0 %v2451_v13 }
 0xca6   : > { %2462 = vrot.lane.b32.xlu0 %v3673_v21, %s3501_s17  ;;  %s3411_s17 = scalar_lea.vmem %s4049_s20, 128 }
 0xca7   : > { %p3412_p11 = scmp.ne.s32.totalorder %s4049_s20, %s3411_s17  ;;  %p3419_p1 = scmp.lt.s32.totalorder %s3417_s23, %s3411_s17 }
 0xca9   : > { %p3413_p12 = pnand %p3412_p11, %p3621_p5  ;;  %p3420_p2 = por %p3419_p1, %p3418_p0 }
 0xcab   : > { %p3414_p13 = pneg %p3413_p12 }
 0xcad   : > { %p3421_p3 = pnand %p3420_p2, %p3414_p13 }
 0xd1d   : > { %v2453_v14 = vpop.xlane.xlu0 %2452 }
 0xd1e   : > { %v2454_v15 = vsub.f32 %v2450_v36, %v2453_v14 }
 0xd20   : > { %v2455_v16 = vmul.f32 1.442695, %v2454_v15 }
 0xd21   : > { %v2463_v17 = vpop.permute.xlu0 %2462 }
 0xd22   : > { %3401 = vpow2.f32 %v2455_v16  ;;  %3206 = vmatpush3.msra.mxu0 %v2463_v17 }
 0xd23   : > { %3275 = vmatprep.subr.bf16.mxu0 %v3475_v5 }
 0xd2c   : > { %v3402_v55 = vpop.eup %3401 }
 0xd2d   : > { %v2457_v57 = vsel %vm716_vm2, %v3402_v55, 0.0 }
 0xd2e   : > { %2458 = vadd.xlane.f32.xlu1 %v2457_v57 }
 0xdbb   : > { %v2459_v21 = vpop.xlane.xlu1 %2458 }
 0xdbc   : > { %3403 = vrcp.f32 %v2459_v21 }
 0xdc6   : > { %v3404_v18 = vpop.eup %3403 }
 0xdc7   : > { %v2461_v19 = vmul.f32 %v3404_v18, %v3402_v55 }
 0xdc9   : > { %3208 = vmatmul.mubr.msk.f32.vlgmr.msra.gmra.mrb[20].mxu0 %vm716_vm2, %v2461_v19 }
 0xdca   : > { %3223 = vmatprep.mubr.msk.f32.mxu0 %vm3476_vm1, %v3477_v8 }
 0xe9c   : > { %v2534_v20 = vpop.f32.mrb[20].mxu0 }
 0xe9d   : > { %v3209_v22 = vpop.f32.mrb[21].mxu0  ;;  %3213 = vmatmul.mubr.msk.f32.vlgmr.msra.gmra.mrb[20].mxu1 %vm716_vm2, %v2534_v20 }
 0xe9e   : > { %3242 = vmatprep.mubr.msk.f32.mxu1 %vm3476_vm1, %v3477_v8  ;;  %v2641_v8 = vld [vmem:[%s4101_s11 + $0x8] sm:$0xff]  ;;  %3283 = vmatpush3.bf16.msra.mxu1 %v3282_v51 }
 0xe9f   : > { %v3276_v35 = vpack.c.bf16 %v2641_v8, %v2640_v34  ;;  %3284 = vmatprep.subr.bf16.mxu1 %v3475_v5 }
 0xea1   : > { %3277 = vmatpush3.bf16.msra.mxu0 %v3276_v35 }
 0xea2   : > { %3278 = vmatprep.subr.bf16.mxu0 %v3475_v5  ;;  %3286 = vmatpush3.bf16.msra.mxu1 %v3285_v54 }
 0xea3   : > { %3287 = vmatprep.subr.bf16.mxu1 %v3475_v5 }
 0xf70   : > { %v2608_v23 = vpop.f32.mrb[20].mxu1 }
 0xf71   : > { %v2612_v24 = vadd.f32 %v2608_v23, %v2132_v58  ;;  %v3214_v25 = vpop.f32.mrb[21].mxu1  ;;  %v2738_v58 = vld [vmem:[%s4103_s13 + $0x28] sm:$0xff] }
 0xf72   : > { %v3288_v59 = vpack.c.bf16 %v2738_v58, %v2737_v56 }
 0xf73   : > { %v2613_v26 = vadd.f32 %v2612_v24, %v3659_v11  ;;  %v2642_v11 = vld [vmem:[%s4101_s11 + $0x10] sm:$0xff]  ;;  %v3010_v24 = vld [vmem:[%s4100_s10 + $0x2] ss:$0 sm:$0xff] }
 0xf74   : > { %v3279_v39 = vpack.c.bf16 %v2643_v38, %v2642_v11  ;;  %3289 = vmatpush3.bf16.msra.mxu1 %v3288_v59 }
 0xf75   : > { %v2616_v27 = vsel %vm531_vm0, %v2613_v26, 0.0  ;;  %3290 = vmatprep.subr.bf16.mxu1 %v3475_v5  ;;  %v3008_v5 = vld [vmem:[%s4104_s14] ss:$0 sm:$0xff] }
 0xf76   : > { %2617 = vadd.xlane.f32.xlu1 %v2616_v27  ;;  %3280 = vmatpush3.bf16.msra.mxu0 %v3279_v39 }
 0xf78   : > { %3292 = vmatpush3.bf16.msra.mxu1 %v3291_v62 }
0x1003   : > { %v2618_v29 = vpop.xlane.xlu1 %2617 }
0x1004   : > { %v2620_v31 = vmul.f32 0.03125, %v2618_v29 }
0x1006   : > { %v2621_v32 = vsub.f32 %v2613_v26, %v2620_v31  ;;  %v3011_v26 = vld [vmem:[%s4100_s10 + $0x3] ss:$0 sm:$0xff] }
0x1008   : > { %v2622_v30 = vmul.f32 %v2621_v32, %v2621_v32 }
0x100a   : > { %v2623_v33 = vsel %vm531_vm0, %v2622_v30, 0.0 }
0x100b   : > { %2624 = vadd.xlane.f32.xlu1 %v2623_v33 }
0x1098   : > { %v2625_v40 = vpop.xlane.xlu1 %2624 }
0x1099   : > { %v2626_v41 = vmul.f32 0.03125, %v2625_v40 }
0x109b   : > { %v2627_v42 = vadd.f32 1e-12, %v2626_v41 }
0x109d   : > { %3405 = vrsqrt.f32 %v2627_v42 }
0x10a7   : > { %v3406_v43 = vpop.eup %3405 }
0x10a8   : > { %v2629_v28 = vmul.f32 %v3406_v43, %v2621_v32 }
0x10aa   : > { %v2634_v46 = vmul.f32 %v3004_v44, %v2629_v28 }
0x10ac   : > { %v2639_v47 = vadd.f32 %v3005_v45, %v2634_v46 }
0x10ae   : > { %3224 = vmatmul.mubr.msk.f32.vlgmr.msra.gmra.mrb[22].mxu0 %vm531_vm0, %v2639_v47 }
0x1181   : > { %v2720_v63 = vpop.f32.mrb[22].mxu0 }
0x1182   : > { %v2721_v1 = vadd.f32 %v3006_v37, %v2720_v63  ;;  %v3225_v2 = vpop.f32.mrb[23].mxu0 }
0x1184   : > { %v2725_v3 = vmul.f32 0.044715, %v2721_v1  ;;  %v2724_v10 = vmul.f32 0.5, %v2721_v1 }
0x1186   : > { %v2726_v49 = vmul.f32 %v2725_v3, %v2721_v1 }
0x1188   : > { %v2727_v4 = vmul.f32 %v2726_v49, %v2721_v1 }
0x118a   : > { %v2728_v6 = vadd.f32 %v2727_v4, %v2721_v1 }
0x118c   : > { %v2729_v7 = vmul.f32 0.7978846, %v2728_v6 }
0x118e   : > { %3407 = vtanh.f32 %v2729_v7 }
0x1198   : > { %v3408_v9 = vpop.eup %3407 }
0x1199   : > { %v2731_v12 = vadd.f32 1.0, %v3408_v9 }
0x119b   : > { %v2732_v36 = vmul.f32 %v2731_v12, %v2724_v10 }
0x119d   : > { %3243 = vmatmul.mubr.msk.f32.vlgmr.msra.gmra.mrb[22].mxu1 %vm2748_vm12, %v2732_v36 }
0x1270   : > { %v2818_v13 = vpop.f32.mrb[22].mxu1 }
0x1271   : > { %v2819_v14 = vadd.f32 %v3008_v5, %v2818_v13  ;;  %v3244_v15 = vpop.f32.mrb[23].mxu1 }
0x1273   : > { %v2822_v16 = vadd.f32 %v2819_v14, %v2639_v47 }
0x1275   : > { %v2825_v17 = vsel %vm531_vm0, %v2822_v16, 0.0 }
0x1276   : > { %2826 = vadd.xlane.f32.xlu1 %v2825_v17 }
0x1303   : > { %v2827_v55 = vpop.xlane.xlu1 %2826 }
0x1304   : > { %v2828_v57 = vmul.f32 0.03125, %v2827_v55 }
0x1306   : > { %v2829_v0 = vsub.f32 %v2822_v16, %v2828_v57 }
0x1308   : > { %v2830_v21 = vmul.f32 %v2829_v0, %v2829_v0 }
0x130a   : > { %v2831_v18 = vsel %vm531_vm0, %v2830_v21, 0.0 }
0x130b   : > { %2832 = vadd.xlane.f32.xlu1 %v2831_v18 }
0x1398   : > { %v2833_v19 = vpop.xlane.xlu1 %2832 }
0x1399   : > { %v2834_v20 = vmul.f32 0.03125, %v2833_v19 }
0x139b   : > { %v2835_v22 = vadd.f32 1e-12, %v2834_v20 }
0x139d   : > { %3409 = vrsqrt.f32 %v2835_v22 }
0x13a7   : > { %v3410_v23 = vpop.eup %3409 }
0x13a8   : > { %v2837_v25 = vmul.f32 %v3410_v23, %v2829_v0 }
0x13aa   : > { %v2842_v27 = vmul.f32 %v3010_v24, %v2837_v25 }
0x13ac   : > { %v2847_v29 = vadd.f32 %v3011_v26, %v2842_v27 }
0x13ae   : > { %2848 = vst.msk [vmem:[%s511_s3] sm:$0xff] %vm531_vm0, %v2847_v29 }
0x13af   : > { %3424 = shalt.err (!%p3421_p3)
}
0x13b0   : > { %s3425_s27 = scalar_lea.hbm %s4047_s24, 128  ;;  %s3429_s25 = scalar_lea.hbm %s4105_s15, 256 }
0x13b1   : > { %p3426_p4 = scmp.ne.s32.totalorder %s4047_s24, %s3425_s27  ;;  %p3430_p9 = scmp.lt.u32.totalorder %s4047_s24, %s4105_s15 }
0x13b2   : > { %p3431_p10 = scmp.lt.u32.totalorder %s3429_s25, %s3425_s27  ;;  %p3433_p12 = scmp.lt.u32.totalorder %s3425_s27, %s4047_s24 }
0x13b3   : > { %p3427_p7 = pnand %p3426_p4, %p3621_p5 }
0x13b4   : > { %p3432_p11 = por %p3431_p10, %p3430_p9 }
0x13b5   : > { %p3428_p8 = pneg %p3427_p7 }
0x13b6   : > { %p3434_p13 = por %p3433_p12, %p3432_p11 }
0x13b8   : > { %p3435_p0 = pnand %p3434_p13, %p3428_p8 }
0x13ba   : > { %3438 = shalt.err (!%p3435_p0)
}
0x13bb   : > { %3293 = dma.vmem_to_hbm [thread:$0]  (%p3621_p5), %s4049_s20, 128, %s4047_s24, %s2850_s29  }
0x13bc PF: > { %s4154_s26 = sld [smem:[#allocation6_spill]]  ;;  %p3299_p1 = scmp.ge.s32.totalorder %s3473_s21, 2 }
0x13be   : > { %p3296_p2 = pnand %p3299_p1, %p3625_p6 }
0x13c2   : > { %s2875_s1 = sand.u32 1, %s4154_s26  }
0x13c3   : > { %s2876_s18 = scalar_lea.sflag [#allocation4], %s2875_s1 }
0x13c4   : > { %3456 = dma.done.wait (!%p3296_p2), %s2876_s18, 128  }
0x13c5   : > { %3458 = vsyncadd (!%p3296_p2), %s2876_s18, 4294967168  ;;  %s4156_s21 = sld [smem:[#allocation8_spill]]  ;;  %s4157_s17 = sld [smem:[#allocation7_spill]] }
0x13c6   : > { %s4158_s20 = sld [smem:[#allocation9_spill]]  ;;  %s4159_s18 = smov %s3465_s19 }
0x13cb   : > { %p25_p3 = scmp.ge.s32.totalorder %s4156_s21, 4   ;;  %s4160_s19 = smov %s4157_s17 }
0x13cd   :  { %27 = sbr.rel (!%p25_p3) target bundleno = 9 (0x9), region = 124 }
0x13d4   :  { %2881 = vsyncpa [#allocation4], 1 }
0x13d5   :  { %2883 = vsyncpa [#allocation4 + $0x1], 1 }

</bundles_post_ra>
